<compile_context>
chip_gen: v7x
topology: tpu7x:2x2x1
jax: 0.10.0
libtpu: 0.0.40
codegen_flags: <defaults>
</compile_context>

<pallas_src>
import jax
import jax.numpy as jnp
from jax import lax
from jax.experimental import pallas as pl
from jax.experimental.pallas import tpu as pltpu

EMB = 32
HIDDEN = 128
NUM_LAYERS = 2


def _lstm_cell(gates, h, c, H):
    """PyTorch gate order i|f|g|o along the 4H axis. All math in f32."""
    i = jax.nn.sigmoid(gates[:, 0:H])
    f = jax.nn.sigmoid(gates[:, H:2 * H])
    g = jnp.tanh(gates[:, 2 * H:3 * H])
    o = jax.nn.sigmoid(gates[:, 3 * H:4 * H])
    c_new = f * c + i * g
    h_new = o * jnp.tanh(c_new)
    return h_new, c_new


# ----------------------------------------------------------------------------
# Layer-0 kernel: BOTH directions fused into one body; the two independent
# recurrences are interleaved inside a single time loop.  Backward-direction
# time reversal is handled by indexing (tb = T-1-t); the output is written as
# a single lane-dense (T, B, 2H) block in time order.
# ----------------------------------------------------------------------------
def lstm_layer0_kernel(xpf_ref, xpb_ref, b_ref, whh_ref, y_ref):
    # xpf_ref: (T, Bp, 4H) bf16  fwd-direction x@W_ih, time order
    # xpb_ref: (T, Bp, 4H) bf16  bwd-direction x@W_ih, time order
    # b_ref  : (1, 8H)     f32   [b_fwd | b_bwd]  (b_ih + b_hh per direction)
    # whh_ref: (2, H, 4H)  bf16  recurrent weights [fwd, bwd]
    # y_ref  : (T, Bp, 2H) f32   time order; [:, :, :H]=fwd h, [:, :, H:]=bwd h
    T, Bp, G = xpf_ref.shape
    H = G // 4

    # Hoisted loads: weights and biases stay in vregs across the whole loop.
    whh_f = whh_ref[0]
    whh_b = whh_ref[1]
    b_f = b_ref[:, 0:G]          # (1, 4H) f32
    b_b = b_ref[:, G:2 * G]      # (1, 4H) f32

    def step(t, carry):
        h_f, c_f, h_b, c_b = carry
        tb = T - 1 - t
        # Two independent dot -> gate chains per iteration (interleaved by the
        # LLO scheduler: MXU / EUP / VPU slots of one chain hide the other's
        # latency on single-TC chips).
        g_f = (xpf_ref[t].astype(jnp.float32) + b_f
               + jnp.dot(h_f.astype(jnp.bfloat16), whh_f,
                         preferred_element_type=jnp.float32))
        g_b = (xpb_ref[tb].astype(jnp.float32) + b_b
               + jnp.dot(h_b.astype(jnp.bfloat16), whh_b,
                         preferred_element_type=jnp.float32))
        h_f, c_f = _lstm_cell(g_f, h_f, c_f, H)
        h_b, c_b = _lstm_cell(g_b, h_b, c_b, H)
        # Lane-dense writes at 128-lane-aligned offsets (unmasked stores).
        y_ref[t, :, 0:H] = h_f
        y_ref[tb, :, H:2 * H] = h_b
        return h_f, c_f, h_b, c_b

    z = jnp.zeros((Bp, H), jnp.float32)
    lax.fori_loop(0, T, step, (z, z, z, z), unroll=min(T, 8))


def lstm_layer0(xpf, xpb, b, whh):
    T, Bp, G = xpf.shape
    H = G // 4
    return pl.pallas_call(
        lstm_layer0_kernel,
        out_shape=jax.ShapeDtypeStruct((T, Bp, 2 * H), jnp.float32),
        grid_spec=pltpu.PrefetchScalarGridSpec(
            num_scalar_prefetch=0,
            grid=(1,),
            in_specs=[
                pl.BlockSpec((T, Bp, G), lambda i: (0, 0, 0)),
                pl.BlockSpec((T, Bp, G), lambda i: (0, 0, 0)),
                pl.BlockSpec((1, 2 * G), lambda i: (0, 0)),
                pl.BlockSpec((2, H, G), lambda i: (0, 0, 0)),
            ],
            out_specs=pl.BlockSpec((T, Bp, 2 * H), lambda i: (0, 0, 0)),
        ),
        compiler_params=pltpu.CompilerParams(
            dimension_semantics=("arbitrary",),
            vmem_limit_bytes=32 * 1024 * 1024),
    )(xpf, xpb, b, whh)


# ----------------------------------------------------------------------------
# Layer-1 (last layer) kernel: only out[:, T-1, :] is consumed downstream, so
# the forward direction keeps only its final h and the backward direction
# needs exactly one step (t = T-1, zero initial state).
# ----------------------------------------------------------------------------
def lstm_last_kernel(xpf_ref, xpb_ref, b_ref, whh_ref, o_ref):
    # xpf_ref: (T, Bp, 4H) bf16  fwd-direction projections, time order
    # xpb_ref: (Bp, 4H)    bf16  bwd-direction projection at t = T-1 only
    # b_ref  : (1, 8H)     f32   [b_fwd | b_bwd]
    # whh_ref: (2, H, 4H)  bf16  recurrent weights (only [0]=fwd is needed)
    # o_ref  : (Bp, 2H)    f32   concat(h_fwd_final, h_bwd at t=T-1)
    T, Bp, G = xpf_ref.shape
    H = G // 4
    whh = whh_ref[0]
    b_f = b_ref[:, 0:G]
    b_b = b_ref[:, G:2 * G]

    def step(t, carry):
        h, c = carry
        gates = (xpf_ref[t].astype(jnp.float32) + b_f
                 + jnp.dot(h.astype(jnp.bfloat16), whh,
                           preferred_element_type=jnp.float32))
        return _lstm_cell(gates, h, c, H)

    z = jnp.zeros((Bp, H), jnp.float32)
    h_fwd, _ = lax.fori_loop(0, T, step, (z, z), unroll=min(T, 8))

    # Backward direction, single step from zero state: f*c0 == 0, no W_hh term.
    gb = xpb_ref[...].astype(jnp.float32) + b_b
    ib = jax.nn.sigmoid(gb[:, 0:H])
    gg = jnp.tanh(gb[:, 2 * H:3 * H])
    ob = jax.nn.sigmoid(gb[:, 3 * H:4 * H])
    hb = ob * jnp.tanh(ib * gg)

    o_ref[:, 0:H] = h_fwd
    o_ref[:, H:2 * H] = hb


def lstm_last_layer(xpf, xpb_last, b, whh):
    T, Bp, G = xpf.shape
    H = G // 4
    return pl.pallas_call(
        lstm_last_kernel,
        out_shape=jax.ShapeDtypeStruct((Bp, 2 * H), jnp.float32),
        grid_spec=pltpu.PrefetchScalarGridSpec(
            num_scalar_prefetch=0,
            grid=(1,),
            in_specs=[
                pl.BlockSpec((T, Bp, G), lambda i: (0, 0, 0)),
                pl.BlockSpec((Bp, G), lambda i: (0, 0)),
                pl.BlockSpec((1, 2 * G), lambda i: (0, 0)),
                pl.BlockSpec((2, H, G), lambda i: (0, 0, 0)),
            ],
            out_specs=pl.BlockSpec((Bp, 2 * H), lambda i: (0, 0)),
        ),
        compiler_params=pltpu.CompilerParams(
            dimension_semantics=("arbitrary",),
            vmem_limit_bytes=32 * 1024 * 1024),
    )(xpf, xpb_last, b, whh)


# ----------------------------------------------------------------------------
# Parameters (PyTorch-equivalent shapes; W stored transposed, b_ih+b_hh summed)
# ----------------------------------------------------------------------------
def init_params(key, ntoken, emb=EMB, hidden=HIDDEN, num_layers=NUM_LAYERS):
    params = {}
    key, sub = jax.random.split(key)
    params["embedding"] = jax.random.normal(sub, (ntoken, emb), jnp.float32) * 0.1

    scale = 1.0 / float(hidden) ** 0.5
    layers = []
    in_size = emb
    for _ in range(num_layers):
        w_ih_dirs, w_hh_dirs, b_dirs = [], [], []
        for _direction in range(2):
            key, k1, k2, k3, k4 = jax.random.split(key, 5)
            w_ih = jax.random.uniform(k1, (in_size, 4 * hidden), jnp.float32,
                                      -scale, scale)
            w_hh = jax.random.uniform(k2, (hidden, 4 * hidden), jnp.float32,
                                      -scale, scale)
            b = (jax.random.uniform(k3, (4 * hidden,), jnp.float32, -scale, scale)
                 + jax.random.uniform(k4, (4 * hidden,), jnp.float32, -scale, scale))
            w_ih_dirs.append(w_ih)
            w_hh_dirs.append(w_hh)
            b_dirs.append(b)
        layers.append({
            # NOTE: bf16 weight storage -> small drift vs the fp32 PyTorch ref.
            "w_ih_fwd": w_ih_dirs[0].astype(jnp.bfloat16),      # (in, 4H)
            "w_ih_bwd": w_ih_dirs[1].astype(jnp.bfloat16),      # (in, 4H)
            "w_hh": jnp.stack(w_hh_dirs, 0).astype(jnp.bfloat16),  # (2, H, 4H)
            "b": jnp.concatenate(b_dirs).reshape(1, 8 * hidden),   # (1, 8H) f32
        })
        in_size = 2 * hidden
    params["lstm"] = layers
    return params


# ----------------------------------------------------------------------------
# Forward pass
# ----------------------------------------------------------------------------
def white_sprague_forward(params, src):
    """src: int32 (B, T) token ids. Returns squeeze(out[:, T-1, :])."""
    B, T = src.shape
    H = HIDDEN
    G = 4 * H
    Bp = ((B + 7) // 8) * 8          # pad batch to a full 8-row sublane tile

    # Embedding lookup (XLA gather glue); Dropout(0.2) is identity in eval mode.
    # TODO(synk): training-mode dropout mask (pltpu.prng_random_bits) not applied.
    emb = params["embedding"][src]                   # (B, T, EMB)
    x = jnp.transpose(emb, (1, 0, 2))                # time-major (T, B, EMB)
    if Bp != B:
        x = jnp.pad(x, ((0, 0), (0, Bp - B), (0, 0)))
    x2 = x.reshape(T * Bp, EMB).astype(jnp.bfloat16)

    # ----- layer 0: full bidirectional sequence ------------------------------
    # Input projections hoisted out of the recurrence (no sequential dep);
    # stored bf16, bias folded into the kernel step.
    l0 = params["lstm"][0]
    pf0 = jnp.dot(x2, l0["w_ih_fwd"], preferred_element_type=jnp.float32
                  ).astype(jnp.bfloat16).reshape(T, Bp, G)
    pb0 = jnp.dot(x2, l0["w_ih_bwd"], preferred_element_type=jnp.float32
                  ).astype(jnp.bfloat16).reshape(T, Bp, G)

    y = lstm_layer0(pf0, pb0, l0["b"], l0["w_hh"])   # (T, Bp, 2H) f32, time order

    # ----- layer 1: only out[:, T-1, :] is consumed ---------------------------
    l1 = params["lstm"][1]
    x1 = y.astype(jnp.bfloat16)
    pf1 = jnp.dot(x1.reshape(T * Bp, 2 * H), l1["w_ih_fwd"],
                  preferred_element_type=jnp.float32
                  ).astype(jnp.bfloat16).reshape(T, Bp, G)
    # Backward direction starts at t = T-1 from zero state -> only one
    # projection row is ever needed.
    pb1_last = jnp.dot(x1[T - 1], l1["w_ih_bwd"],
                       preferred_element_type=jnp.float32
                       ).astype(jnp.bfloat16)        # (Bp, 4H)

    out_p = lstm_last_layer(pf1, pb1_last, l1["b"], l1["w_hh"])   # (Bp, 2H)
    out = out_p[:B]                                  # drop batch padding

    # torch.squeeze removes all size-1 dims; same here.
    return jnp.squeeze(out)


if __name__ == "__main__":
    ntoken = 50
    batch, seq = 2, 8

    key = jax.random.PRNGKey(0)
    key, pkey, skey = jax.random.split(key, 3)

    params = init_params(pkey, ntoken)
    src = jax.random.randint(skey, (batch, seq), 0, ntoken, dtype=jnp.int32)

    out = jax.jit(white_sprague_forward)(params, src)
    out = jax.block_until_ready(out)

    assert out.shape == (batch, 2 * HIDDEN), out.shape
    assert jnp.all(jnp.isfinite(out))
    print("KERNEL_OK")
</pallas_src>

<mosaic_0001>
module attributes {stable_mosaic.version = 11 : i64} {
  func.func @lstm_layer0_kernel(%arg0: i32, %arg1: memref<8x8x512xbf16, #tpu.memory_space<vmem>>, %arg2: memref<8x8x512xbf16, #tpu.memory_space<vmem>>, %arg3: memref<1x1024xf32, #tpu.memory_space<vmem>>, %arg4: memref<2x128x512xbf16, #tpu.memory_space<vmem>>, %arg5: memref<8x8x256xf32, #tpu.memory_space<vmem>>) attributes {dimension_semantics = [#tpu.dimension_semantics<arbitrary>], iteration_bounds = array<i64: 1>, scalar_prefetch = 0 : i64, scratch_operands = 0 : i64, tpu.core_type = #tpu.core_type<tc>, window_params = [{pipeline_mode = #tpu.pipeline_mode<synchronous>, transform_indices = @transform_0, window_bounds = array<i64: 8, 8, 512>}, {pipeline_mode = #tpu.pipeline_mode<synchronous>, transform_indices = @transform_1, window_bounds = array<i64: 8, 8, 512>}, {pipeline_mode = #tpu.pipeline_mode<synchronous>, transform_indices = @transform_2, window_bounds = array<i64: 1, 1024>}, {pipeline_mode = #tpu.pipeline_mode<synchronous>, transform_indices = @transform_3, window_bounds = array<i64: 2, 128, 512>}, {pipeline_mode = #tpu.pipeline_mode<synchronous>, transform_indices = @transform_4, window_bounds = array<i64: 8, 8, 256>}]} {
    %c0 = arith.constant 0 : index
    %c0_0 = arith.constant 0 : index
    %c0_1 = arith.constant 0 : index
    %0 = vector.load %arg4[%c0, %c0_0, %c0_1] : memref<2x128x512xbf16, #tpu.memory_space<vmem>>, vector<1x128x512xbf16>
    %1 = vector.shape_cast %0 : vector<1x128x512xbf16> to vector<128x512xbf16>
    %c1 = arith.constant 1 : index
    %c0_2 = arith.constant 0 : index
    %c0_3 = arith.constant 0 : index
    %2 = vector.load %arg4[%c1, %c0_2, %c0_3] : memref<2x128x512xbf16, #tpu.memory_space<vmem>>, vector<1x128x512xbf16>
    %3 = vector.shape_cast %2 : vector<1x128x512xbf16> to vector<128x512xbf16>
    %c0_4 = arith.constant 0 : index
    %c0_5 = arith.constant 0 : index
    %4 = vector.load %arg3[%c0_4, %c0_5] : memref<1x1024xf32, #tpu.memory_space<vmem>>, vector<1x512xf32>
    %c0_6 = arith.constant 0 : index
    %c512 = arith.constant 512 : index
    %5 = vector.load %arg3[%c0_6, %c512] : memref<1x1024xf32, #tpu.memory_space<vmem>>, vector<1x512xf32>
    %cst = arith.constant 0.000000e+00 : f32
    %6 = vector.broadcast %cst : f32 to vector<8x128xf32>
    %c0_i32 = arith.constant 0 : i32
    %c7_i32 = arith.constant 7 : i32
    %7 = arith.subi %c7_i32, %c0_i32 : i32
    %8 = arith.index_cast %c0_i32 : i32 to index
    %c0_7 = arith.constant 0 : index
    %c0_8 = arith.constant 0 : index
    %9 = vector.load %arg1[%8, %c0_7, %c0_8] : memref<8x8x512xbf16, #tpu.memory_space<vmem>>, vector<1x8x512xbf16>
    %10 = vector.shape_cast %9 : vector<1x8x512xbf16> to vector<8x512xbf16>
    %11 = arith.extf %10 : vector<8x512xbf16> to vector<8x512xf32>
    %12 = vector.broadcast %4 : vector<1x512xf32> to vector<8x512xf32>
    %13 = arith.addf %11, %12 : vector<8x512xf32>
    %14 = arith.truncf %6 : vector<8x128xf32> to vector<8x128xbf16>
    %cst_9 = arith.constant dense<0.000000e+00> : vector<8x512xf32>
    %15 = tpu.matmul %14, %1, %cst_9 {dimension_numbers = #tpu.dot_dimension_numbers<[1], [0], [0], [1], [0, 0, 1, 1], [], []>} : vector<8x128xbf16>, vector<128x512xbf16>, vector<8x512xf32> -> vector<8x512xf32>
    %16 = arith.addf %13, %15 : vector<8x512xf32>
    %17 = arith.index_cast %7 : i32 to index
    %c0_10 = arith.constant 0 : index
    %c0_11 = arith.constant 0 : index
    %18 = vector.load %arg2[%17, %c0_10, %c0_11] : memref<8x8x512xbf16, #tpu.memory_space<vmem>>, vector<1x8x512xbf16>
    %19 = vector.shape_cast %18 : vector<1x8x512xbf16> to vector<8x512xbf16>
    %20 = arith.extf %19 : vector<8x512xbf16> to vector<8x512xf32>
    %21 = vector.broadcast %5 : vector<1x512xf32> to vector<8x512xf32>
    %22 = arith.addf %20, %21 : vector<8x512xf32>
    %23 = arith.truncf %6 : vector<8x128xf32> to vector<8x128xbf16>
    %cst_12 = arith.constant dense<0.000000e+00> : vector<8x512xf32>
    %24 = tpu.matmul %23, %3, %cst_12 {dimension_numbers = #tpu.dot_dimension_numbers<[1], [0], [0], [1], [0, 0, 1, 1], [], []>} : vector<8x128xbf16>, vector<128x512xbf16>, vector<8x512xf32> -> vector<8x512xf32>
    %25 = arith.addf %22, %24 : vector<8x512xf32>
    %26 = vector.extract_strided_slice %16 {offsets = [0, 0], sizes = [8, 128], strides = [1, 1]} : vector<8x512xf32> to vector<8x128xf32>
    %27 = arith.negf %26 : vector<8x128xf32>
    %28 = math.exp %27 : vector<8x128xf32>
    %cst_13 = arith.constant 1.000000e+00 : f32
    %29 = vector.broadcast %cst_13 : f32 to vector<8x128xf32>
    %30 = arith.addf %29, %28 : vector<8x128xf32>
    %31 = arith.divf %29, %30 : vector<8x128xf32>
    %32 = vector.extract_strided_slice %16 {offsets = [0, 128], sizes = [8, 128], strides = [1, 1]} : vector<8x512xf32> to vector<8x128xf32>
    %33 = arith.negf %32 : vector<8x128xf32>
    %34 = math.exp %33 : vector<8x128xf32>
    %cst_14 = arith.constant 1.000000e+00 : f32
    %35 = vector.broadcast %cst_14 : f32 to vector<8x128xf32>
    %36 = arith.addf %35, %34 : vector<8x128xf32>
    %37 = arith.divf %35, %36 : vector<8x128xf32>
    %38 = vector.extract_strided_slice %16 {offsets = [0, 256], sizes = [8, 128], strides = [1, 1]} : vector<8x512xf32> to vector<8x128xf32>
    %39 = math.tanh %38 : vector<8x128xf32>
    %40 = vector.extract_strided_slice %16 {offsets = [0, 384], sizes = [8, 128], strides = [1, 1]} : vector<8x512xf32> to vector<8x128xf32>
    %41 = arith.negf %40 : vector<8x128xf32>
    %42 = math.exp %41 : vector<8x128xf32>
    %cst_15 = arith.constant 1.000000e+00 : f32
    %43 = vector.broadcast %cst_15 : f32 to vector<8x128xf32>
    %44 = arith.addf %43, %42 : vector<8x128xf32>
    %45 = arith.divf %43, %44 : vector<8x128xf32>
    %46 = arith.mulf %37, %6 : vector<8x128xf32>
    %47 = arith.mulf %31, %39 : vector<8x128xf32>
    %48 = arith.addf %46, %47 : vector<8x128xf32>
    %49 = math.tanh %48 : vector<8x128xf32>
    %50 = arith.mulf %45, %49 : vector<8x128xf32>
    %51 = vector.extract_strided_slice %25 {offsets = [0, 0], sizes = [8, 128], strides = [1, 1]} : vector<8x512xf32> to vector<8x128xf32>
    %52 = arith.negf %51 : vector<8x128xf32>
    %53 = math.exp %52 : vector<8x128xf32>
    %cst_16 = arith.constant 1.000000e+00 : f32
    %54 = vector.broadcast %cst_16 : f32 to vector<8x128xf32>
    %55 = arith.addf %54, %53 : vector<8x128xf32>
    %56 = arith.divf %54, %55 : vector<8x128xf32>
    %57 = vector.extract_strided_slice %25 {offsets = [0, 128], sizes = [8, 128], strides = [1, 1]} : vector<8x512xf32> to vector<8x128xf32>
    %58 = arith.negf %57 : vector<8x128xf32>
    %59 = math.exp %58 : vector<8x128xf32>
    %cst_17 = arith.constant 1.000000e+00 : f32
    %60 = vector.broadcast %cst_17 : f32 to vector<8x128xf32>
    %61 = arith.addf %60, %59 : vector<8x128xf32>
    %62 = arith.divf %60, %61 : vector<8x128xf32>
    %63 = vector.extract_strided_slice %25 {offsets = [0, 256], sizes = [8, 128], strides = [1, 1]} : vector<8x512xf32> to vector<8x128xf32>
    %64 = math.tanh %63 : vector<8x128xf32>
    %65 = vector.extract_strided_slice %25 {offsets = [0, 384], sizes = [8, 128], strides = [1, 1]} : vector<8x512xf32> to vector<8x128xf32>
    %66 = arith.negf %65 : vector<8x128xf32>
    %67 = math.exp %66 : vector<8x128xf32>
    %cst_18 = arith.constant 1.000000e+00 : f32
    %68 = vector.broadcast %cst_18 : f32 to vector<8x128xf32>
    %69 = arith.addf %68, %67 : vector<8x128xf32>
    %70 = arith.divf %68, %69 : vector<8x128xf32>
    %71 = arith.mulf %62, %6 : vector<8x128xf32>
    %72 = arith.mulf %56, %64 : vector<8x128xf32>
    %73 = arith.addf %71, %72 : vector<8x128xf32>
    %74 = math.tanh %73 : vector<8x128xf32>
    %75 = arith.mulf %70, %74 : vector<8x128xf32>
    %76 = arith.index_cast %c0_i32 : i32 to index
    %c0_19 = arith.constant 0 : index
    %c0_20 = arith.constant 0 : index
    %77 = vector.load %arg5[%76, %c0_19, %c0_20] : memref<8x8x256xf32, #tpu.memory_space<vmem>>, vector<1x8x128xf32>
    %78 = vector.shape_cast %77 : vector<1x8x128xf32> to vector<8x128xf32>
    %79 = vector.shape_cast %50 : vector<8x128xf32> to vector<1x8x128xf32>
    tpu.vector_store %arg5[%76, %c0_19, %c0_20], %79 {strides = array<i32>} : memref<8x8x256xf32, #tpu.memory_space<vmem>>, vector<1x8x128xf32>,
    %80 = arith.index_cast %7 : i32 to index
    %c0_21 = arith.constant 0 : index
    %c128 = arith.constant 128 : index
    %81 = vector.load %arg5[%80, %c0_21, %c128] : memref<8x8x256xf32, #tpu.memory_space<vmem>>, vector<1x8x128xf32>
    %82 = vector.shape_cast %81 : vector<1x8x128xf32> to vector<8x128xf32>
    %83 = vector.shape_cast %75 : vector<8x128xf32> to vector<1x8x128xf32>
    tpu.vector_store %arg5[%80, %c0_21, %c128], %83 {strides = array<i32>} : memref<8x8x256xf32, #tpu.memory_space<vmem>>, vector<1x8x128xf32>,
    %c1_i32 = arith.constant 1 : i32
    %c7_i32_22 = arith.constant 7 : i32
    %84 = arith.subi %c7_i32_22, %c1_i32 : i32
    %85 = arith.index_cast %c1_i32 : i32 to index
    %c0_23 = arith.constant 0 : index
    %c0_24 = arith.constant 0 : index
    %86 = vector.load %arg1[%85, %c0_23, %c0_24] : memref<8x8x512xbf16, #tpu.memory_space<vmem>>, vector<1x8x512xbf16>
    %87 = vector.shape_cast %86 : vector<1x8x512xbf16> to vector<8x512xbf16>
    %88 = arith.extf %87 : vector<8x512xbf16> to vector<8x512xf32>
    %89 = vector.broadcast %4 : vector<1x512xf32> to vector<8x512xf32>
    %90 = arith.addf %88, %89 : vector<8x512xf32>
    %91 = arith.truncf %50 : vector<8x128xf32> to vector<8x128xbf16>
    %cst_25 = arith.constant dense<0.000000e+00> : vector<8x512xf32>
    %92 = tpu.matmul %91, %1, %cst_25 {dimension_numbers = #tpu.dot_dimension_numbers<[1], [0], [0], [1], [0, 0, 1, 1], [], []>} : vector<8x128xbf16>, vector<128x512xbf16>, vector<8x512xf32> -> vector<8x512xf32>
    %93 = arith.addf %90, %92 : vector<8x512xf32>
    %94 = arith.index_cast %84 : i32 to index
    %c0_26 = arith.constant 0 : index
    %c0_27 = arith.constant 0 : index
    %95 = vector.load %arg2[%94, %c0_26, %c0_27] : memref<8x8x512xbf16, #tpu.memory_space<vmem>>, vector<1x8x512xbf16>
    %96 = vector.shape_cast %95 : vector<1x8x512xbf16> to vector<8x512xbf16>
    %97 = arith.extf %96 : vector<8x512xbf16> to vector<8x512xf32>
    %98 = vector.broadcast %5 : vector<1x512xf32> to vector<8x512xf32>
    %99 = arith.addf %97, %98 : vector<8x512xf32>
    %100 = arith.truncf %75 : vector<8x128xf32> to vector<8x128xbf16>
    %cst_28 = arith.constant dense<0.000000e+00> : vector<8x512xf32>
    %101 = tpu.matmul %100, %3, %cst_28 {dimension_numbers = #tpu.dot_dimension_numbers<[1], [0], [0], [1], [0, 0, 1, 1], [], []>} : vector<8x128xbf16>, vector<128x512xbf16>, vector<8x512xf32> -> vector<8x512xf32>
    %102 = arith.addf %99, %101 : vector<8x512xf32>
    %103 = vector.extract_strided_slice %93 {offsets = [0, 0], sizes = [8, 128], strides = [1, 1]} : vector<8x512xf32> to vector<8x128xf32>
    %104 = arith.negf %103 : vector<8x128xf32>
    %105 = math.exp %104 : vector<8x128xf32>
    %cst_29 = arith.constant 1.000000e+00 : f32
    %106 = vector.broadcast %cst_29 : f32 to vector<8x128xf32>
    %107 = arith.addf %106, %105 : vector<8x128xf32>
    %108 = arith.divf %106, %107 : vector<8x128xf32>
    %109 = vector.extract_strided_slice %93 {offsets = [0, 128], sizes = [8, 128], strides = [1, 1]} : vector<8x512xf32> to vector<8x128xf32>
    %110 = arith.negf %109 : vector<8x128xf32>
    %111 = math.exp %110 : vector<8x128xf32>
    %cst_30 = arith.constant 1.000000e+00 : f32
    %112 = vector.broadcast %cst_30 : f32 to vector<8x128xf32>
    %113 = arith.addf %112, %111 : vector<8x128xf32>
    %114 = arith.divf %112, %113 : vector<8x128xf32>
    %115 = vector.extract_strided_slice %93 {offsets = [0, 256], sizes = [8, 128], strides = [1, 1]} : vector<8x512xf32> to vector<8x128xf32>
    %116 = math.tanh %115 : vector<8x128xf32>
    %117 = vector.extract_strided_slice %93 {offsets = [0, 384], sizes = [8, 128], strides = [1, 1]} : vector<8x512xf32> to vector<8x128xf32>
    %118 = arith.negf %117 : vector<8x128xf32>
    %119 = math.exp %118 : vector<8x128xf32>
    %cst_31 = arith.constant 1.000000e+00 : f32
    %120 = vector.broadcast %cst_31 : f32 to vector<8x128xf32>
    %121 = arith.addf %120, %119 : vector<8x128xf32>
    %122 = arith.divf %120, %121 : vector<8x128xf32>
    %123 = arith.mulf %114, %48 : vector<8x128xf32>
    %124 = arith.mulf %108, %116 : vector<8x128xf32>
    %125 = arith.addf %123, %124 : vector<8x128xf32>
    %126 = math.tanh %125 : vector<8x128xf32>
    %127 = arith.mulf %122, %126 : vector<8x128xf32>
    %128 = vector.extract_strided_slice %102 {offsets = [0, 0], sizes = [8, 128], strides = [1, 1]} : vector<8x512xf32> to vector<8x128xf32>
    %129 = arith.negf %128 : vector<8x128xf32>
    %130 = math.exp %129 : vector<8x128xf32>
    %cst_32 = arith.constant 1.000000e+00 : f32
    %131 = vector.broadcast %cst_32 : f32 to vector<8x128xf32>
    %132 = arith.addf %131, %130 : vector<8x128xf32>
    %133 = arith.divf %131, %132 : vector<8x128xf32>
    %134 = vector.extract_strided_slice %102 {offsets = [0, 128], sizes = [8, 128], strides = [1, 1]} : vector<8x512xf32> to vector<8x128xf32>
    %135 = arith.negf %134 : vector<8x128xf32>
    %136 = math.exp %135 : vector<8x128xf32>
    %cst_33 = arith.constant 1.000000e+00 : f32
    %137 = vector.broadcast %cst_33 : f32 to vector<8x128xf32>
    %138 = arith.addf %137, %136 : vector<8x128xf32>
    %139 = arith.divf %137, %138 : vector<8x128xf32>
    %140 = vector.extract_strided_slice %102 {offsets = [0, 256], sizes = [8, 128], strides = [1, 1]} : vector<8x512xf32> to vector<8x128xf32>
    %141 = math.tanh %140 : vector<8x128xf32>
    %142 = vector.extract_strided_slice %102 {offsets = [0, 384], sizes = [8, 128], strides = [1, 1]} : vector<8x512xf32> to vector<8x128xf32>
    %143 = arith.negf %142 : vector<8x128xf32>
    %144 = math.exp %143 : vector<8x128xf32>
    %cst_34 = arith.constant 1.000000e+00 : f32
    %145 = vector.broadcast %cst_34 : f32 to vector<8x128xf32>
    %146 = arith.addf %145, %144 : vector<8x128xf32>
    %147 = arith.divf %145, %146 : vector<8x128xf32>
    %148 = arith.mulf %139, %73 : vector<8x128xf32>
    %149 = arith.mulf %133, %141 : vector<8x128xf32>
    %150 = arith.addf %148, %149 : vector<8x128xf32>
    %151 = math.tanh %150 : vector<8x128xf32>
    %152 = arith.mulf %147, %151 : vector<8x128xf32>
    %153 = arith.index_cast %c1_i32 : i32 to index
    %c0_35 = arith.constant 0 : index
    %c0_36 = arith.constant 0 : index
    %154 = vector.load %arg5[%153, %c0_35, %c0_36] : memref<8x8x256xf32, #tpu.memory_space<vmem>>, vector<1x8x128xf32>
    %155 = vector.shape_cast %154 : vector<1x8x128xf32> to vector<8x128xf32>
    %156 = vector.shape_cast %127 : vector<8x128xf32> to vector<1x8x128xf32>
    tpu.vector_store %arg5[%153, %c0_35, %c0_36], %156 {strides = array<i32>} : memref<8x8x256xf32, #tpu.memory_space<vmem>>, vector<1x8x128xf32>,
    %157 = arith.index_cast %84 : i32 to index
    %c0_37 = arith.constant 0 : index
    %c128_38 = arith.constant 128 : index
    %158 = vector.load %arg5[%157, %c0_37, %c128_38] : memref<8x8x256xf32, #tpu.memory_space<vmem>>, vector<1x8x128xf32>
    %159 = vector.shape_cast %158 : vector<1x8x128xf32> to vector<8x128xf32>
    %160 = vector.shape_cast %152 : vector<8x128xf32> to vector<1x8x128xf32>
    tpu.vector_store %arg5[%157, %c0_37, %c128_38], %160 {strides = array<i32>} : memref<8x8x256xf32, #tpu.memory_space<vmem>>, vector<1x8x128xf32>,
    %c2_i32 = arith.constant 2 : i32
    %c7_i32_39 = arith.constant 7 : i32
    %161 = arith.subi %c7_i32_39, %c2_i32 : i32
    %162 = arith.index_cast %c2_i32 : i32 to index
    %c0_40 = arith.constant 0 : index
    %c0_41 = arith.constant 0 : index
    %163 = vector.load %arg1[%162, %c0_40, %c0_41] : memref<8x8x512xbf16, #tpu.memory_space<vmem>>, vector<1x8x512xbf16>
    %164 = vector.shape_cast %163 : vector<1x8x512xbf16> to vector<8x512xbf16>
    %165 = arith.extf %164 : vector<8x512xbf16> to vector<8x512xf32>
    %166 = vector.broadcast %4 : vector<1x512xf32> to vector<8x512xf32>
    %167 = arith.addf %165, %166 : vector<8x512xf32>
    %168 = arith.truncf %127 : vector<8x128xf32> to vector<8x128xbf16>
    %cst_42 = arith.constant dense<0.000000e+00> : vector<8x512xf32>
    %169 = tpu.matmul %168, %1, %cst_42 {dimension_numbers = #tpu.dot_dimension_numbers<[1], [0], [0], [1], [0, 0, 1, 1], [], []>} : vector<8x128xbf16>, vector<128x512xbf16>, vector<8x512xf32> -> vector<8x512xf32>
    %170 = arith.addf %167, %169 : vector<8x512xf32>
    %171 = arith.index_cast %161 : i32 to index
    %c0_43 = arith.constant 0 : index
    %c0_44 = arith.constant 0 : index
    %172 = vector.load %arg2[%171, %c0_43, %c0_44] : memref<8x8x512xbf16, #tpu.memory_space<vmem>>, vector<1x8x512xbf16>
    %173 = vector.shape_cast %172 : vector<1x8x512xbf16> to vector<8x512xbf16>
    %174 = arith.extf %173 : vector<8x512xbf16> to vector<8x512xf32>
    %175 = vector.broadcast %5 : vector<1x512xf32> to vector<8x512xf32>
    %176 = arith.addf %174, %175 : vector<8x512xf32>
    %177 = arith.truncf %152 : vector<8x128xf32> to vector<8x128xbf16>
    %cst_45 = arith.constant dense<0.000000e+00> : vector<8x512xf32>
    %178 = tpu.matmul %177, %3, %cst_45 {dimension_numbers = #tpu.dot_dimension_numbers<[1], [0], [0], [1], [0, 0, 1, 1], [], []>} : vector<8x128xbf16>, vector<128x512xbf16>, vector<8x512xf32> -> vector<8x512xf32>
    %179 = arith.addf %176, %178 : vector<8x512xf32>
    %180 = vector.extract_strided_slice %170 {offsets = [0, 0], sizes = [8, 128], strides = [1, 1]} : vector<8x512xf32> to vector<8x128xf32>
    %181 = arith.negf %180 : vector<8x128xf32>
    %182 = math.exp %181 : vector<8x128xf32>
    %cst_46 = arith.constant 1.000000e+00 : f32
    %183 = vector.broadcast %cst_46 : f32 to vector<8x128xf32>
    %184 = arith.addf %183, %182 : vector<8x128xf32>
    %185 = arith.divf %183, %184 : vector<8x128xf32>
    %186 = vector.extract_strided_slice %170 {offsets = [0, 128], sizes = [8, 128], strides = [1, 1]} : vector<8x512xf32> to vector<8x128xf32>
    %187 = arith.negf %186 : vector<8x128xf32>
    %188 = math.exp %187 : vector<8x128xf32>
    %cst_47 = arith.constant 1.000000e+00 : f32
    %189 = vector.broadcast %cst_47 : f32 to vector<8x128xf32>
    %190 = arith.addf %189, %188 : vector<8x128xf32>
    %191 = arith.divf %189, %190 : vector<8x128xf32>
    %192 = vector.extract_strided_slice %170 {offsets = [0, 256], sizes = [8, 128], strides = [1, 1]} : vector<8x512xf32> to vector<8x128xf32>
    %193 = math.tanh %192 : vector<8x128xf32>
    %194 = vector.extract_strided_slice %170 {offsets = [0, 384], sizes = [8, 128], strides = [1, 1]} : vector<8x512xf32> to vector<8x128xf32>
    %195 = arith.negf %194 : vector<8x128xf32>
    %196 = math.exp %195 : vector<8x128xf32>
    %cst_48 = arith.constant 1.000000e+00 : f32
    %197 = vector.broadcast %cst_48 : f32 to vector<8x128xf32>
    %198 = arith.addf %197, %196 : vector<8x128xf32>
    %199 = arith.divf %197, %198 : vector<8x128xf32>
    %200 = arith.mulf %191, %125 : vector<8x128xf32>
    %201 = arith.mulf %185, %193 : vector<8x128xf32>
    %202 = arith.addf %200, %201 : vector<8x128xf32>
    %203 = math.tanh %202 : vector<8x128xf32>
    %204 = arith.mulf %199, %203 : vector<8x128xf32>
    %205 = vector.extract_strided_slice %179 {offsets = [0, 0], sizes = [8, 128], strides = [1, 1]} : vector<8x512xf32> to vector<8x128xf32>
    %206 = arith.negf %205 : vector<8x128xf32>
    %207 = math.exp %206 : vector<8x128xf32>
    %cst_49 = arith.constant 1.000000e+00 : f32
    %208 = vector.broadcast %cst_49 : f32 to vector<8x128xf32>
    %209 = arith.addf %208, %207 : vector<8x128xf32>
    %210 = arith.divf %208, %209 : vector<8x128xf32>
    %211 = vector.extract_strided_slice %179 {offsets = [0, 128], sizes = [8, 128], strides = [1, 1]} : vector<8x512xf32> to vector<8x128xf32>
    %212 = arith.negf %211 : vector<8x128xf32>
    %213 = math.exp %212 : vector<8x128xf32>
    %cst_50 = arith.constant 1.000000e+00 : f32
    %214 = vector.broadcast %cst_50 : f32 to vector<8x128xf32>
    %215 = arith.addf %214, %213 : vector<8x128xf32>
    %216 = arith.divf %214, %215 : vector<8x128xf32>
    %217 = vector.extract_strided_slice %179 {offsets = [0, 256], sizes = [8, 128], strides = [1, 1]} : vector<8x512xf32> to vector<8x128xf32>
    %218 = math.tanh %217 : vector<8x128xf32>
    %219 = vector.extract_strided_slice %179 {offsets = [0, 384], sizes = [8, 128], strides = [1, 1]} : vector<8x512xf32> to vector<8x128xf32>
    %220 = arith.negf %219 : vector<8x128xf32>
    %221 = math.exp %220 : vector<8x128xf32>
    %cst_51 = arith.constant 1.000000e+00 : f32
    %222 = vector.broadcast %cst_51 : f32 to vector<8x128xf32>
    %223 = arith.addf %222, %221 : vector<8x128xf32>
    %224 = arith.divf %222, %223 : vector<8x128xf32>
    %225 = arith.mulf %216, %150 : vector<8x128xf32>
    %226 = arith.mulf %210, %218 : vector<8x128xf32>
    %227 = arith.addf %225, %226 : vector<8x128xf32>
    %228 = math.tanh %227 : vector<8x128xf32>
    %229 = arith.mulf %224, %228 : vector<8x128xf32>
    %230 = arith.index_cast %c2_i32 : i32 to index
    %c0_52 = arith.constant 0 : index
    %c0_53 = arith.constant 0 : index
    %231 = vector.load %arg5[%230, %c0_52, %c0_53] : memref<8x8x256xf32, #tpu.memory_space<vmem>>, vector<1x8x128xf32>
    %232 = vector.shape_cast %231 : vector<1x8x128xf32> to vector<8x128xf32>
    %233 = vector.shape_cast %204 : vector<8x128xf32> to vector<1x8x128xf32>
    tpu.vector_store %arg5[%230, %c0_52, %c0_53], %233 {strides = array<i32>} : memref<8x8x256xf32, #tpu.memory_space<vmem>>, vector<1x8x128xf32>,
    %234 = arith.index_cast %161 : i32 to index
    %c0_54 = arith.constant 0 : index
    %c128_55 = arith.constant 128 : index
    %235 = vector.load %arg5[%234, %c0_54, %c128_55] : memref<8x8x256xf32, #tpu.memory_space<vmem>>, vector<1x8x128xf32>
    %236 = vector.shape_cast %235 : vector<1x8x128xf32> to vector<8x128xf32>
    %237 = vector.shape_cast %229 : vector<8x128xf32> to vector<1x8x128xf32>
    tpu.vector_store %arg5[%234, %c0_54, %c128_55], %237 {strides = array<i32>} : memref<8x8x256xf32, #tpu.memory_space<vmem>>, vector<1x8x128xf32>,
    %c3_i32 = arith.constant 3 : i32
    %c7_i32_56 = arith.constant 7 : i32
    %238 = arith.subi %c7_i32_56, %c3_i32 : i32
    %239 = arith.index_cast %c3_i32 : i32 to index
    %c0_57 = arith.constant 0 : index
    %c0_58 = arith.constant 0 : index
    %240 = vector.load %arg1[%239, %c0_57, %c0_58] : memref<8x8x512xbf16, #tpu.memory_space<vmem>>, vector<1x8x512xbf16>
    %241 = vector.shape_cast %240 : vector<1x8x512xbf16> to vector<8x512xbf16>
    %242 = arith.extf %241 : vector<8x512xbf16> to vector<8x512xf32>
    %243 = vector.broadcast %4 : vector<1x512xf32> to vector<8x512xf32>
    %244 = arith.addf %242, %243 : vector<8x512xf32>
    %245 = arith.truncf %204 : vector<8x128xf32> to vector<8x128xbf16>
    %cst_59 = arith.constant dense<0.000000e+00> : vector<8x512xf32>
    %246 = tpu.matmul %245, %1, %cst_59 {dimension_numbers = #tpu.dot_dimension_numbers<[1], [0], [0], [1], [0, 0, 1, 1], [], []>} : vector<8x128xbf16>, vector<128x512xbf16>, vector<8x512xf32> -> vector<8x512xf32>
    %247 = arith.addf %244, %246 : vector<8x512xf32>
    %248 = arith.index_cast %238 : i32 to index
    %c0_60 = arith.constant 0 : index
    %c0_61 = arith.constant 0 : index
    %249 = vector.load %arg2[%248, %c0_60, %c0_61] : memref<8x8x512xbf16, #tpu.memory_space<vmem>>, vector<1x8x512xbf16>
    %250 = vector.shape_cast %249 : vector<1x8x512xbf16> to vector<8x512xbf16>
    %251 = arith.extf %250 : vector<8x512xbf16> to vector<8x512xf32>
    %252 = vector.broadcast %5 : vector<1x512xf32> to vector<8x512xf32>
    %253 = arith.addf %251, %252 : vector<8x512xf32>
    %254 = arith.truncf %229 : vector<8x128xf32> to vector<8x128xbf16>
    %cst_62 = arith.constant dense<0.000000e+00> : vector<8x512xf32>
    %255 = tpu.matmul %254, %3, %cst_62 {dimension_numbers = #tpu.dot_dimension_numbers<[1], [0], [0], [1], [0, 0, 1, 1], [], []>} : vector<8x128xbf16>, vector<128x512xbf16>, vector<8x512xf32> -> vector<8x512xf32>
    %256 = arith.addf %253, %255 : vector<8x512xf32>
    %257 = vector.extract_strided_slice %247 {offsets = [0, 0], sizes = [8, 128], strides = [1, 1]} : vector<8x512xf32> to vector<8x128xf32>
    %258 = arith.negf %257 : vector<8x128xf32>
    %259 = math.exp %258 : vector<8x128xf32>
    %cst_63 = arith.constant 1.000000e+00 : f32
    %260 = vector.broadcast %cst_63 : f32 to vector<8x128xf32>
    %261 = arith.addf %260, %259 : vector<8x128xf32>
    %262 = arith.divf %260, %261 : vector<8x128xf32>
    %263 = vector.extract_strided_slice %247 {offsets = [0, 128], sizes = [8, 128], strides = [1, 1]} : vector<8x512xf32> to vector<8x128xf32>
    %264 = arith.negf %263 : vector<8x128xf32>
    %265 = math.exp %264 : vector<8x128xf32>
    %cst_64 = arith.constant 1.000000e+00 : f32
    %266 = vector.broadcast %cst_64 : f32 to vector<8x128xf32>
    %267 = arith.addf %266, %265 : vector<8x128xf32>
    %268 = arith.divf %266, %267 : vector<8x128xf32>
    %269 = vector.extract_strided_slice %247 {offsets = [0, 256], sizes = [8, 128], strides = [1, 1]} : vector<8x512xf32> to vector<8x128xf32>
    %270 = math.tanh %269 : vector<8x128xf32>
    %271 = vector.extract_strided_slice %247 {offsets = [0, 384], sizes = [8, 128], strides = [1, 1]} : vector<8x512xf32> to vector<8x128xf32>
    %272 = arith.negf %271 : vector<8x128xf32>
    %273 = math.exp %272 : vector<8x128xf32>
    %cst_65 = arith.constant 1.000000e+00 : f32
    %274 = vector.broadcast %cst_65 : f32 to vector<8x128xf32>
    %275 = arith.addf %274, %273 : vector<8x128xf32>
    %276 = arith.divf %274, %275 : vector<8x128xf32>
    %277 = arith.mulf %268, %202 : vector<8x128xf32>
    %278 = arith.mulf %262, %270 : vector<8x128xf32>
    %279 = arith.addf %277, %278 : vector<8x128xf32>
    %280 = math.tanh %279 : vector<8x128xf32>
    %281 = arith.mulf %276, %280 : vector<8x128xf32>
    %282 = vector.extract_strided_slice %256 {offsets = [0, 0], sizes = [8, 128], strides = [1, 1]} : vector<8x512xf32> to vector<8x128xf32>
    %283 = arith.negf %282 : vector<8x128xf32>
    %284 = math.exp %283 : vector<8x128xf32>
    %cst_66 = arith.constant 1.000000e+00 : f32
    %285 = vector.broadcast %cst_66 : f32 to vector<8x128xf32>
    %286 = arith.addf %285, %284 : vector<8x128xf32>
    %287 = arith.divf %285, %286 : vector<8x128xf32>
    %288 = vector.extract_strided_slice %256 {offsets = [0, 128], sizes = [8, 128], strides = [1, 1]} : vector<8x512xf32> to vector<8x128xf32>
    %289 = arith.negf %288 : vector<8x128xf32>
    %290 = math.exp %289 : vector<8x128xf32>
    %cst_67 = arith.constant 1.000000e+00 : f32
    %291 = vector.broadcast %cst_67 : f32 to vector<8x128xf32>
    %292 = arith.addf %291, %290 : vector<8x128xf32>
    %293 = arith.divf %291, %292 : vector<8x128xf32>
    %294 = vector.extract_strided_slice %256 {offsets = [0, 256], sizes = [8, 128], strides = [1, 1]} : vector<8x512xf32> to vector<8x128xf32>
    %295 = math.tanh %294 : vector<8x128xf32>
    %296 = vector.extract_strided_slice %256 {offsets = [0, 384], sizes = [8, 128], strides = [1, 1]} : vector<8x512xf32> to vector<8x128xf32>
    %297 = arith.negf %296 : vector<8x128xf32>
    %298 = math.exp %297 : vector<8x128xf32>
    %cst_68 = arith.constant 1.000000e+00 : f32
    %299 = vector.broadcast %cst_68 : f32 to vector<8x128xf32>
    %300 = arith.addf %299, %298 : vector<8x128xf32>
    %301 = arith.divf %299, %300 : vector<8x128xf32>
    %302 = arith.mulf %293, %227 : vector<8x128xf32>
    %303 = arith.mulf %287, %295 : vector<8x128xf32>
    %304 = arith.addf %302, %303 : vector<8x128xf32>
    %305 = math.tanh %304 : vector<8x128xf32>
    %306 = arith.mulf %301, %305 : vector<8x128xf32>
    %307 = arith.index_cast %c3_i32 : i32 to index
    %c0_69 = arith.constant 0 : index
    %c0_70 = arith.constant 0 : index
    %308 = vector.load %arg5[%307, %c0_69, %c0_70] : memref<8x8x256xf32, #tpu.memory_space<vmem>>, vector<1x8x128xf32>
    %309 = vector.shape_cast %308 : vector<1x8x128xf32> to vector<8x128xf32>
    %310 = vector.shape_cast %281 : vector<8x128xf32> to vector<1x8x128xf32>
    tpu.vector_store %arg5[%307, %c0_69, %c0_70], %310 {strides = array<i32>} : memref<8x8x256xf32, #tpu.memory_space<vmem>>, vector<1x8x128xf32>,
    %311 = arith.index_cast %238 : i32 to index
    %c0_71 = arith.constant 0 : index
    %c128_72 = arith.constant 128 : index
    %312 = vector.load %arg5[%311, %c0_71, %c128_72] : memref<8x8x256xf32, #tpu.memory_space<vmem>>, vector<1x8x128xf32>
    %313 = vector.shape_cast %312 : vector<1x8x128xf32> to vector<8x128xf32>
    %314 = vector.shape_cast %306 : vector<8x128xf32> to vector<1x8x128xf32>
    tpu.vector_store %arg5[%311, %c0_71, %c128_72], %314 {strides = array<i32>} : memref<8x8x256xf32, #tpu.memory_space<vmem>>, vector<1x8x128xf32>,
    %c4_i32 = arith.constant 4 : i32
    %c7_i32_73 = arith.constant 7 : i32
    %315 = arith.subi %c7_i32_73, %c4_i32 : i32
    %316 = arith.index_cast %c4_i32 : i32 to index
    %c0_74 = arith.constant 0 : index
    %c0_75 = arith.constant 0 : index
    %317 = vector.load %arg1[%316, %c0_74, %c0_75] : memref<8x8x512xbf16, #tpu.memory_space<vmem>>, vector<1x8x512xbf16>
    %318 = vector.shape_cast %317 : vector<1x8x512xbf16> to vector<8x512xbf16>
    %319 = arith.extf %318 : vector<8x512xbf16> to vector<8x512xf32>
    %320 = vector.broadcast %4 : vector<1x512xf32> to vector<8x512xf32>
    %321 = arith.addf %319, %320 : vector<8x512xf32>
    %322 = arith.truncf %281 : vector<8x128xf32> to vector<8x128xbf16>
    %cst_76 = arith.constant dense<0.000000e+00> : vector<8x512xf32>
    %323 = tpu.matmul %322, %1, %cst_76 {dimension_numbers = #tpu.dot_dimension_numbers<[1], [0], [0], [1], [0, 0, 1, 1], [], []>} : vector<8x128xbf16>, vector<128x512xbf16>, vector<8x512xf32> -> vector<8x512xf32>
    %324 = arith.addf %321, %323 : vector<8x512xf32>
    %325 = arith.index_cast %315 : i32 to index
    %c0_77 = arith.constant 0 : index
    %c0_78 = arith.constant 0 : index
    %326 = vector.load %arg2[%325, %c0_77, %c0_78] : memref<8x8x512xbf16, #tpu.memory_space<vmem>>, vector<1x8x512xbf16>
    %327 = vector.shape_cast %326 : vector<1x8x512xbf16> to vector<8x512xbf16>
    %328 = arith.extf %327 : vector<8x512xbf16> to vector<8x512xf32>
    %329 = vector.broadcast %5 : vector<1x512xf32> to vector<8x512xf32>
    %330 = arith.addf %328, %329 : vector<8x512xf32>
    %331 = arith.truncf %306 : vector<8x128xf32> to vector<8x128xbf16>
    %cst_79 = arith.constant dense<0.000000e+00> : vector<8x512xf32>
    %332 = tpu.matmul %331, %3, %cst_79 {dimension_numbers = #tpu.dot_dimension_numbers<[1], [0], [0], [1], [0, 0, 1, 1], [], []>} : vector<8x128xbf16>, vector<128x512xbf16>, vector<8x512xf32> -> vector<8x512xf32>
    %333 = arith.addf %330, %332 : vector<8x512xf32>
    %334 = vector.extract_strided_slice %324 {offsets = [0, 0], sizes = [8, 128], strides = [1, 1]} : vector<8x512xf32> to vector<8x128xf32>
    %335 = arith.negf %334 : vector<8x128xf32>
    %336 = math.exp %335 : vector<8x128xf32>
    %cst_80 = arith.constant 1.000000e+00 : f32
    %337 = vector.broadcast %cst_80 : f32 to vector<8x128xf32>
    %338 = arith.addf %337, %336 : vector<8x128xf32>
    %339 = arith.divf %337, %338 : vector<8x128xf32>
    %340 = vector.extract_strided_slice %324 {offsets = [0, 128], sizes = [8, 128], strides = [1, 1]} : vector<8x512xf32> to vector<8x128xf32>
    %341 = arith.negf %340 : vector<8x128xf32>
    %342 = math.exp %341 : vector<8x128xf32>
    %cst_81 = arith.constant 1.000000e+00 : f32
    %343 = vector.broadcast %cst_81 : f32 to vector<8x128xf32>
    %344 = arith.addf %343, %342 : vector<8x128xf32>
    %345 = arith.divf %343, %344 : vector<8x128xf32>
    %346 = vector.extract_strided_slice %324 {offsets = [0, 256], sizes = [8, 128], strides = [1, 1]} : vector<8x512xf32> to vector<8x128xf32>
    %347 = math.tanh %346 : vector<8x128xf32>
    %348 = vector.extract_strided_slice %324 {offsets = [0, 384], sizes = [8, 128], strides = [1, 1]} : vector<8x512xf32> to vector<8x128xf32>
    %349 = arith.negf %348 : vector<8x128xf32>
    %350 = math.exp %349 : vector<8x128xf32>
    %cst_82 = arith.constant 1.000000e+00 : f32
    %351 = vector.broadcast %cst_82 : f32 to vector<8x128xf32>
    %352 = arith.addf %351, %350 : vector<8x128xf32>
    %353 = arith.divf %351, %352 : vector<8x128xf32>
    %354 = arith.mulf %345, %279 : vector<8x128xf32>
    %355 = arith.mulf %339, %347 : vector<8x128xf32>
    %356 = arith.addf %354, %355 : vector<8x128xf32>
    %357 = math.tanh %356 : vector<8x128xf32>
    %358 = arith.mulf %353, %357 : vector<8x128xf32>
    %359 = vector.extract_strided_slice %333 {offsets = [0, 0], sizes = [8, 128], strides = [1, 1]} : vector<8x512xf32> to vector<8x128xf32>
    %360 = arith.negf %359 : vector<8x128xf32>
    %361 = math.exp %360 : vector<8x128xf32>
    %cst_83 = arith.constant 1.000000e+00 : f32
    %362 = vector.broadcast %cst_83 : f32 to vector<8x128xf32>
    %363 = arith.addf %362, %361 : vector<8x128xf32>
    %364 = arith.divf %362, %363 : vector<8x128xf32>
    %365 = vector.extract_strided_slice %333 {offsets = [0, 128], sizes = [8, 128], strides = [1, 1]} : vector<8x512xf32> to vector<8x128xf32>
    %366 = arith.negf %365 : vector<8x128xf32>
    %367 = math.exp %366 : vector<8x128xf32>
    %cst_84 = arith.constant 1.000000e+00 : f32
    %368 = vector.broadcast %cst_84 : f32 to vector<8x128xf32>
    %369 = arith.addf %368, %367 : vector<8x128xf32>
    %370 = arith.divf %368, %369 : vector<8x128xf32>
    %371 = vector.extract_strided_slice %333 {offsets = [0, 256], sizes = [8, 128], strides = [1, 1]} : vector<8x512xf32> to vector<8x128xf32>
    %372 = math.tanh %371 : vector<8x128xf32>
    %373 = vector.extract_strided_slice %333 {offsets = [0, 384], sizes = [8, 128], strides = [1, 1]} : vector<8x512xf32> to vector<8x128xf32>
    %374 = arith.negf %373 : vector<8x128xf32>
    %375 = math.exp %374 : vector<8x128xf32>
    %cst_85 = arith.constant 1.000000e+00 : f32
    %376 = vector.broadcast %cst_85 : f32 to vector<8x128xf32>
    %377 = arith.addf %376, %375 : vector<8x128xf32>
    %378 = arith.divf %376, %377 : vector<8x128xf32>
    %379 = arith.mulf %370, %304 : vector<8x128xf32>
    %380 = arith.mulf %364, %372 : vector<8x128xf32>
    %381 = arith.addf %379, %380 : vector<8x128xf32>
    %382 = math.tanh %381 : vector<8x128xf32>
    %383 = arith.mulf %378, %382 : vector<8x128xf32>
    %384 = arith.index_cast %c4_i32 : i32 to index
    %c0_86 = arith.constant 0 : index
    %c0_87 = arith.constant 0 : index
    %385 = vector.load %arg5[%384, %c0_86, %c0_87] : memref<8x8x256xf32, #tpu.memory_space<vmem>>, vector<1x8x128xf32>
    %386 = vector.shape_cast %385 : vector<1x8x128xf32> to vector<8x128xf32>
    %387 = vector.shape_cast %358 : vector<8x128xf32> to vector<1x8x128xf32>
    tpu.vector_store %arg5[%384, %c0_86, %c0_87], %387 {strides = array<i32>} : memref<8x8x256xf32, #tpu.memory_space<vmem>>, vector<1x8x128xf32>,
    %388 = arith.index_cast %315 : i32 to index
    %c0_88 = arith.constant 0 : index
    %c128_89 = arith.constant 128 : index
    %389 = vector.load %arg5[%388, %c0_88, %c128_89] : memref<8x8x256xf32, #tpu.memory_space<vmem>>, vector<1x8x128xf32>
    %390 = vector.shape_cast %389 : vector<1x8x128xf32> to vector<8x128xf32>
    %391 = vector.shape_cast %383 : vector<8x128xf32> to vector<1x8x128xf32>
    tpu.vector_store %arg5[%388, %c0_88, %c128_89], %391 {strides = array<i32>} : memref<8x8x256xf32, #tpu.memory_space<vmem>>, vector<1x8x128xf32>,
    %c5_i32 = arith.constant 5 : i32
    %c7_i32_90 = arith.constant 7 : i32
    %392 = arith.subi %c7_i32_90, %c5_i32 : i32
    %393 = arith.index_cast %c5_i32 : i32 to index
    %c0_91 = arith.constant 0 : index
    %c0_92 = arith.constant 0 : index
    %394 = vector.load %arg1[%393, %c0_91, %c0_92] : memref<8x8x512xbf16, #tpu.memory_space<vmem>>, vector<1x8x512xbf16>
    %395 = vector.shape_cast %394 : vector<1x8x512xbf16> to vector<8x512xbf16>
    %396 = arith.extf %395 : vector<8x512xbf16> to vector<8x512xf32>
    %397 = vector.broadcast %4 : vector<1x512xf32> to vector<8x512xf32>
    %398 = arith.addf %396, %397 : vector<8x512xf32>
    %399 = arith.truncf %358 : vector<8x128xf32> to vector<8x128xbf16>
    %cst_93 = arith.constant dense<0.000000e+00> : vector<8x512xf32>
    %400 = tpu.matmul %399, %1, %cst_93 {dimension_numbers = #tpu.dot_dimension_numbers<[1], [0], [0], [1], [0, 0, 1, 1], [], []>} : vector<8x128xbf16>, vector<128x512xbf16>, vector<8x512xf32> -> vector<8x512xf32>
    %401 = arith.addf %398, %400 : vector<8x512xf32>
    %402 = arith.index_cast %392 : i32 to index
    %c0_94 = arith.constant 0 : index
    %c0_95 = arith.constant 0 : index
    %403 = vector.load %arg2[%402, %c0_94, %c0_95] : memref<8x8x512xbf16, #tpu.memory_space<vmem>>, vector<1x8x512xbf16>
    %404 = vector.shape_cast %403 : vector<1x8x512xbf16> to vector<8x512xbf16>
    %405 = arith.extf %404 : vector<8x512xbf16> to vector<8x512xf32>
    %406 = vector.broadcast %5 : vector<1x512xf32> to vector<8x512xf32>
    %407 = arith.addf %405, %406 : vector<8x512xf32>
    %408 = arith.truncf %383 : vector<8x128xf32> to vector<8x128xbf16>
    %cst_96 = arith.constant dense<0.000000e+00> : vector<8x512xf32>
    %409 = tpu.matmul %408, %3, %cst_96 {dimension_numbers = #tpu.dot_dimension_numbers<[1], [0], [0], [1], [0, 0, 1, 1], [], []>} : vector<8x128xbf16>, vector<128x512xbf16>, vector<8x512xf32> -> vector<8x512xf32>
    %410 = arith.addf %407, %409 : vector<8x512xf32>
    %411 = vector.extract_strided_slice %401 {offsets = [0, 0], sizes = [8, 128], strides = [1, 1]} : vector<8x512xf32> to vector<8x128xf32>
    %412 = arith.negf %411 : vector<8x128xf32>
    %413 = math.exp %412 : vector<8x128xf32>
    %cst_97 = arith.constant 1.000000e+00 : f32
    %414 = vector.broadcast %cst_97 : f32 to vector<8x128xf32>
    %415 = arith.addf %414, %413 : vector<8x128xf32>
    %416 = arith.divf %414, %415 : vector<8x128xf32>
    %417 = vector.extract_strided_slice %401 {offsets = [0, 128], sizes = [8, 128], strides = [1, 1]} : vector<8x512xf32> to vector<8x128xf32>
    %418 = arith.negf %417 : vector<8x128xf32>
    %419 = math.exp %418 : vector<8x128xf32>
    %cst_98 = arith.constant 1.000000e+00 : f32
    %420 = vector.broadcast %cst_98 : f32 to vector<8x128xf32>
    %421 = arith.addf %420, %419 : vector<8x128xf32>
    %422 = arith.divf %420, %421 : vector<8x128xf32>
    %423 = vector.extract_strided_slice %401 {offsets = [0, 256], sizes = [8, 128], strides = [1, 1]} : vector<8x512xf32> to vector<8x128xf32>
    %424 = math.tanh %423 : vector<8x128xf32>
    %425 = vector.extract_strided_slice %401 {offsets = [0, 384], sizes = [8, 128], strides = [1, 1]} : vector<8x512xf32> to vector<8x128xf32>
    %426 = arith.negf %425 : vector<8x128xf32>
    %427 = math.exp %426 : vector<8x128xf32>
    %cst_99 = arith.constant 1.000000e+00 : f32
    %428 = vector.broadcast %cst_99 : f32 to vector<8x128xf32>
    %429 = arith.addf %428, %427 : vector<8x128xf32>
    %430 = arith.divf %428, %429 : vector<8x128xf32>
    %431 = arith.mulf %422, %356 : vector<8x128xf32>
    %432 = arith.mulf %416, %424 : vector<8x128xf32>
    %433 = arith.addf %431, %432 : vector<8x128xf32>
    %434 = math.tanh %433 : vector<8x128xf32>
    %435 = arith.mulf %430, %434 : vector<8x128xf32>
    %436 = vector.extract_strided_slice %410 {offsets = [0, 0], sizes = [8, 128], strides = [1, 1]} : vector<8x512xf32> to vector<8x128xf32>
    %437 = arith.negf %436 : vector<8x128xf32>
    %438 = math.exp %437 : vector<8x128xf32>
    %cst_100 = arith.constant 1.000000e+00 : f32
    %439 = vector.broadcast %cst_100 : f32 to vector<8x128xf32>
    %440 = arith.addf %439, %438 : vector<8x128xf32>
    %441 = arith.divf %439, %440 : vector<8x128xf32>
    %442 = vector.extract_strided_slice %410 {offsets = [0, 128], sizes = [8, 128], strides = [1, 1]} : vector<8x512xf32> to vector<8x128xf32>
    %443 = arith.negf %442 : vector<8x128xf32>
    %444 = math.exp %443 : vector<8x128xf32>
    %cst_101 = arith.constant 1.000000e+00 : f32
    %445 = vector.broadcast %cst_101 : f32 to vector<8x128xf32>
    %446 = arith.addf %445, %444 : vector<8x128xf32>
    %447 = arith.divf %445, %446 : vector<8x128xf32>
    %448 = vector.extract_strided_slice %410 {offsets = [0, 256], sizes = [8, 128], strides = [1, 1]} : vector<8x512xf32> to vector<8x128xf32>
    %449 = math.tanh %448 : vector<8x128xf32>
    %450 = vector.extract_strided_slice %410 {offsets = [0, 384], sizes = [8, 128], strides = [1, 1]} : vector<8x512xf32> to vector<8x128xf32>
    %451 = arith.negf %450 : vector<8x128xf32>
    %452 = math.exp %451 : vector<8x128xf32>
    %cst_102 = arith.constant 1.000000e+00 : f32
    %453 = vector.broadcast %cst_102 : f32 to vector<8x128xf32>
    %454 = arith.addf %453, %452 : vector<8x128xf32>
    %455 = arith.divf %453, %454 : vector<8x128xf32>
    %456 = arith.mulf %447, %381 : vector<8x128xf32>
    %457 = arith.mulf %441, %449 : vector<8x128xf32>
    %458 = arith.addf %456, %457 : vector<8x128xf32>
    %459 = math.tanh %458 : vector<8x128xf32>
    %460 = arith.mulf %455, %459 : vector<8x128xf32>
    %461 = arith.index_cast %c5_i32 : i32 to index
    %c0_103 = arith.constant 0 : index
    %c0_104 = arith.constant 0 : index
    %462 = vector.load %arg5[%461, %c0_103, %c0_104] : memref<8x8x256xf32, #tpu.memory_space<vmem>>, vector<1x8x128xf32>
    %463 = vector.shape_cast %462 : vector<1x8x128xf32> to vector<8x128xf32>
    %464 = vector.shape_cast %435 : vector<8x128xf32> to vector<1x8x128xf32>
    tpu.vector_store %arg5[%461, %c0_103, %c0_104], %464 {strides = array<i32>} : memref<8x8x256xf32, #tpu.memory_space<vmem>>, vector<1x8x128xf32>,
    %465 = arith.index_cast %392 : i32 to index
    %c0_105 = arith.constant 0 : index
    %c128_106 = arith.constant 128 : index
    %466 = vector.load %arg5[%465, %c0_105, %c128_106] : memref<8x8x256xf32, #tpu.memory_space<vmem>>, vector<1x8x128xf32>
    %467 = vector.shape_cast %466 : vector<1x8x128xf32> to vector<8x128xf32>
    %468 = vector.shape_cast %460 : vector<8x128xf32> to vector<1x8x128xf32>
    tpu.vector_store %arg5[%465, %c0_105, %c128_106], %468 {strides = array<i32>} : memref<8x8x256xf32, #tpu.memory_space<vmem>>, vector<1x8x128xf32>,
    %c6_i32 = arith.constant 6 : i32
    %c7_i32_107 = arith.constant 7 : i32
    %469 = arith.subi %c7_i32_107, %c6_i32 : i32
    %470 = arith.index_cast %c6_i32 : i32 to index
    %c0_108 = arith.constant 0 : index
    %c0_109 = arith.constant 0 : index
    %471 = vector.load %arg1[%470, %c0_108, %c0_109] : memref<8x8x512xbf16, #tpu.memory_space<vmem>>, vector<1x8x512xbf16>
    %472 = vector.shape_cast %471 : vector<1x8x512xbf16> to vector<8x512xbf16>
    %473 = arith.extf %472 : vector<8x512xbf16> to vector<8x512xf32>
    %474 = vector.broadcast %4 : vector<1x512xf32> to vector<8x512xf32>
    %475 = arith.addf %473, %474 : vector<8x512xf32>
    %476 = arith.truncf %435 : vector<8x128xf32> to vector<8x128xbf16>
    %cst_110 = arith.constant dense<0.000000e+00> : vector<8x512xf32>
    %477 = tpu.matmul %476, %1, %cst_110 {dimension_numbers = #tpu.dot_dimension_numbers<[1], [0], [0], [1], [0, 0, 1, 1], [], []>} : vector<8x128xbf16>, vector<128x512xbf16>, vector<8x512xf32> -> vector<8x512xf32>
    %478 = arith.addf %475, %477 : vector<8x512xf32>
    %479 = arith.index_cast %469 : i32 to index
    %c0_111 = arith.constant 0 : index
    %c0_112 = arith.constant 0 : index
    %480 = vector.load %arg2[%479, %c0_111, %c0_112] : memref<8x8x512xbf16, #tpu.memory_space<vmem>>, vector<1x8x512xbf16>
    %481 = vector.shape_cast %480 : vector<1x8x512xbf16> to vector<8x512xbf16>
    %482 = arith.extf %481 : vector<8x512xbf16> to vector<8x512xf32>
    %483 = vector.broadcast %5 : vector<1x512xf32> to vector<8x512xf32>
    %484 = arith.addf %482, %483 : vector<8x512xf32>
    %485 = arith.truncf %460 : vector<8x128xf32> to vector<8x128xbf16>
    %cst_113 = arith.constant dense<0.000000e+00> : vector<8x512xf32>
    %486 = tpu.matmul %485, %3, %cst_113 {dimension_numbers = #tpu.dot_dimension_numbers<[1], [0], [0], [1], [0, 0, 1, 1], [], []>} : vector<8x128xbf16>, vector<128x512xbf16>, vector<8x512xf32> -> vector<8x512xf32>
    %487 = arith.addf %484, %486 : vector<8x512xf32>
    %488 = vector.extract_strided_slice %478 {offsets = [0, 0], sizes = [8, 128], strides = [1, 1]} : vector<8x512xf32> to vector<8x128xf32>
    %489 = arith.negf %488 : vector<8x128xf32>
    %490 = math.exp %489 : vector<8x128xf32>
    %cst_114 = arith.constant 1.000000e+00 : f32
    %491 = vector.broadcast %cst_114 : f32 to vector<8x128xf32>
    %492 = arith.addf %491, %490 : vector<8x128xf32>
    %493 = arith.divf %491, %492 : vector<8x128xf32>
    %494 = vector.extract_strided_slice %478 {offsets = [0, 128], sizes = [8, 128], strides = [1, 1]} : vector<8x512xf32> to vector<8x128xf32>
    %495 = arith.negf %494 : vector<8x128xf32>
    %496 = math.exp %495 : vector<8x128xf32>
    %cst_115 = arith.constant 1.000000e+00 : f32
    %497 = vector.broadcast %cst_115 : f32 to vector<8x128xf32>
    %498 = arith.addf %497, %496 : vector<8x128xf32>
    %499 = arith.divf %497, %498 : vector<8x128xf32>
    %500 = vector.extract_strided_slice %478 {offsets = [0, 256], sizes = [8, 128], strides = [1, 1]} : vector<8x512xf32> to vector<8x128xf32>
    %501 = math.tanh %500 : vector<8x128xf32>
    %502 = vector.extract_strided_slice %478 {offsets = [0, 384], sizes = [8, 128], strides = [1, 1]} : vector<8x512xf32> to vector<8x128xf32>
    %503 = arith.negf %502 : vector<8x128xf32>
    %504 = math.exp %503 : vector<8x128xf32>
    %cst_116 = arith.constant 1.000000e+00 : f32
    %505 = vector.broadcast %cst_116 : f32 to vector<8x128xf32>
    %506 = arith.addf %505, %504 : vector<8x128xf32>
    %507 = arith.divf %505, %506 : vector<8x128xf32>
    %508 = arith.mulf %499, %433 : vector<8x128xf32>
    %509 = arith.mulf %493, %501 : vector<8x128xf32>
    %510 = arith.addf %508, %509 : vector<8x128xf32>
    %511 = math.tanh %510 : vector<8x128xf32>
    %512 = arith.mulf %507, %511 : vector<8x128xf32>
    %513 = vector.extract_strided_slice %487 {offsets = [0, 0], sizes = [8, 128], strides = [1, 1]} : vector<8x512xf32> to vector<8x128xf32>
    %514 = arith.negf %513 : vector<8x128xf32>
    %515 = math.exp %514 : vector<8x128xf32>
    %cst_117 = arith.constant 1.000000e+00 : f32
    %516 = vector.broadcast %cst_117 : f32 to vector<8x128xf32>
    %517 = arith.addf %516, %515 : vector<8x128xf32>
    %518 = arith.divf %516, %517 : vector<8x128xf32>
    %519 = vector.extract_strided_slice %487 {offsets = [0, 128], sizes = [8, 128], strides = [1, 1]} : vector<8x512xf32> to vector<8x128xf32>
    %520 = arith.negf %519 : vector<8x128xf32>
    %521 = math.exp %520 : vector<8x128xf32>
    %cst_118 = arith.constant 1.000000e+00 : f32
    %522 = vector.broadcast %cst_118 : f32 to vector<8x128xf32>
    %523 = arith.addf %522, %521 : vector<8x128xf32>
    %524 = arith.divf %522, %523 : vector<8x128xf32>
    %525 = vector.extract_strided_slice %487 {offsets = [0, 256], sizes = [8, 128], strides = [1, 1]} : vector<8x512xf32> to vector<8x128xf32>
    %526 = math.tanh %525 : vector<8x128xf32>
    %527 = vector.extract_strided_slice %487 {offsets = [0, 384], sizes = [8, 128], strides = [1, 1]} : vector<8x512xf32> to vector<8x128xf32>
    %528 = arith.negf %527 : vector<8x128xf32>
    %529 = math.exp %528 : vector<8x128xf32>
    %cst_119 = arith.constant 1.000000e+00 : f32
    %530 = vector.broadcast %cst_119 : f32 to vector<8x128xf32>
    %531 = arith.addf %530, %529 : vector<8x128xf32>
    %532 = arith.divf %530, %531 : vector<8x128xf32>
    %533 = arith.mulf %524, %458 : vector<8x128xf32>
    %534 = arith.mulf %518, %526 : vector<8x128xf32>
    %535 = arith.addf %533, %534 : vector<8x128xf32>
    %536 = math.tanh %535 : vector<8x128xf32>
    %537 = arith.mulf %532, %536 : vector<8x128xf32>
    %538 = arith.index_cast %c6_i32 : i32 to index
    %c0_120 = arith.constant 0 : index
    %c0_121 = arith.constant 0 : index
    %539 = vector.load %arg5[%538, %c0_120, %c0_121] : memref<8x8x256xf32, #tpu.memory_space<vmem>>, vector<1x8x128xf32>
    %540 = vector.shape_cast %539 : vector<1x8x128xf32> to vector<8x128xf32>
    %541 = vector.shape_cast %512 : vector<8x128xf32> to vector<1x8x128xf32>
    tpu.vector_store %arg5[%538, %c0_120, %c0_121], %541 {strides = array<i32>} : memref<8x8x256xf32, #tpu.memory_space<vmem>>, vector<1x8x128xf32>,
    %542 = arith.index_cast %469 : i32 to index
    %c0_122 = arith.constant 0 : index
    %c128_123 = arith.constant 128 : index
    %543 = vector.load %arg5[%542, %c0_122, %c128_123] : memref<8x8x256xf32, #tpu.memory_space<vmem>>, vector<1x8x128xf32>
    %544 = vector.shape_cast %543 : vector<1x8x128xf32> to vector<8x128xf32>
    %545 = vector.shape_cast %537 : vector<8x128xf32> to vector<1x8x128xf32>
    tpu.vector_store %arg5[%542, %c0_122, %c128_123], %545 {strides = array<i32>} : memref<8x8x256xf32, #tpu.memory_space<vmem>>, vector<1x8x128xf32>,
    %c7_i32_124 = arith.constant 7 : i32
    %c7_i32_125 = arith.constant 7 : i32
    %546 = arith.subi %c7_i32_125, %c7_i32_124 : i32
    %547 = arith.index_cast %c7_i32_124 : i32 to index
    %c0_126 = arith.constant 0 : index
    %c0_127 = arith.constant 0 : index
    %548 = vector.load %arg1[%547, %c0_126, %c0_127] : memref<8x8x512xbf16, #tpu.memory_space<vmem>>, vector<1x8x512xbf16>
    %549 = vector.shape_cast %548 : vector<1x8x512xbf16> to vector<8x512xbf16>
    %550 = arith.extf %549 : vector<8x512xbf16> to vector<8x512xf32>
    %551 = vector.broadcast %4 : vector<1x512xf32> to vector<8x512xf32>
    %552 = arith.addf %550, %551 : vector<8x512xf32>
    %553 = arith.truncf %512 : vector<8x128xf32> to vector<8x128xbf16>
    %cst_128 = arith.constant dense<0.000000e+00> : vector<8x512xf32>
    %554 = tpu.matmul %553, %1, %cst_128 {dimension_numbers = #tpu.dot_dimension_numbers<[1], [0], [0], [1], [0, 0, 1, 1], [], []>} : vector<8x128xbf16>, vector<128x512xbf16>, vector<8x512xf32> -> vector<8x512xf32>
    %555 = arith.addf %552, %554 : vector<8x512xf32>
    %556 = arith.index_cast %546 : i32 to index
    %c0_129 = arith.constant 0 : index
    %c0_130 = arith.constant 0 : index
    %557 = vector.load %arg2[%556, %c0_129, %c0_130] : memref<8x8x512xbf16, #tpu.memory_space<vmem>>, vector<1x8x512xbf16>
    %558 = vector.shape_cast %557 : vector<1x8x512xbf16> to vector<8x512xbf16>
    %559 = arith.extf %558 : vector<8x512xbf16> to vector<8x512xf32>
    %560 = vector.broadcast %5 : vector<1x512xf32> to vector<8x512xf32>
    %561 = arith.addf %559, %560 : vector<8x512xf32>
    %562 = arith.truncf %537 : vector<8x128xf32> to vector<8x128xbf16>
    %cst_131 = arith.constant dense<0.000000e+00> : vector<8x512xf32>
    %563 = tpu.matmul %562, %3, %cst_131 {dimension_numbers = #tpu.dot_dimension_numbers<[1], [0], [0], [1], [0, 0, 1, 1], [], []>} : vector<8x128xbf16>, vector<128x512xbf16>, vector<8x512xf32> -> vector<8x512xf32>
    %564 = arith.addf %561, %563 : vector<8x512xf32>
    %565 = vector.extract_strided_slice %555 {offsets = [0, 0], sizes = [8, 128], strides = [1, 1]} : vector<8x512xf32> to vector<8x128xf32>
    %566 = arith.negf %565 : vector<8x128xf32>
    %567 = math.exp %566 : vector<8x128xf32>
    %cst_132 = arith.constant 1.000000e+00 : f32
    %568 = vector.broadcast %cst_132 : f32 to vector<8x128xf32>
    %569 = arith.addf %568, %567 : vector<8x128xf32>
    %570 = arith.divf %568, %569 : vector<8x128xf32>
    %571 = vector.extract_strided_slice %555 {offsets = [0, 128], sizes = [8, 128], strides = [1, 1]} : vector<8x512xf32> to vector<8x128xf32>
    %572 = arith.negf %571 : vector<8x128xf32>
    %573 = math.exp %572 : vector<8x128xf32>
    %cst_133 = arith.constant 1.000000e+00 : f32
    %574 = vector.broadcast %cst_133 : f32 to vector<8x128xf32>
    %575 = arith.addf %574, %573 : vector<8x128xf32>
    %576 = arith.divf %574, %575 : vector<8x128xf32>
    %577 = vector.extract_strided_slice %555 {offsets = [0, 256], sizes = [8, 128], strides = [1, 1]} : vector<8x512xf32> to vector<8x128xf32>
    %578 = math.tanh %577 : vector<8x128xf32>
    %579 = vector.extract_strided_slice %555 {offsets = [0, 384], sizes = [8, 128], strides = [1, 1]} : vector<8x512xf32> to vector<8x128xf32>
    %580 = arith.negf %579 : vector<8x128xf32>
    %581 = math.exp %580 : vector<8x128xf32>
    %cst_134 = arith.constant 1.000000e+00 : f32
    %582 = vector.broadcast %cst_134 : f32 to vector<8x128xf32>
    %583 = arith.addf %582, %581 : vector<8x128xf32>
    %584 = arith.divf %582, %583 : vector<8x128xf32>
    %585 = arith.mulf %576, %510 : vector<8x128xf32>
    %586 = arith.mulf %570, %578 : vector<8x128xf32>
    %587 = arith.addf %585, %586 : vector<8x128xf32>
    %588 = math.tanh %587 : vector<8x128xf32>
    %589 = arith.mulf %584, %588 : vector<8x128xf32>
    %590 = vector.extract_strided_slice %564 {offsets = [0, 0], sizes = [8, 128], strides = [1, 1]} : vector<8x512xf32> to vector<8x128xf32>
    %591 = arith.negf %590 : vector<8x128xf32>
    %592 = math.exp %591 : vector<8x128xf32>
    %cst_135 = arith.constant 1.000000e+00 : f32
    %593 = vector.broadcast %cst_135 : f32 to vector<8x128xf32>
    %594 = arith.addf %593, %592 : vector<8x128xf32>
    %595 = arith.divf %593, %594 : vector<8x128xf32>
    %596 = vector.extract_strided_slice %564 {offsets = [0, 128], sizes = [8, 128], strides = [1, 1]} : vector<8x512xf32> to vector<8x128xf32>
    %597 = arith.negf %596 : vector<8x128xf32>
    %598 = math.exp %597 : vector<8x128xf32>
    %cst_136 = arith.constant 1.000000e+00 : f32
    %599 = vector.broadcast %cst_136 : f32 to vector<8x128xf32>
    %600 = arith.addf %599, %598 : vector<8x128xf32>
    %601 = arith.divf %599, %600 : vector<8x128xf32>
    %602 = vector.extract_strided_slice %564 {offsets = [0, 256], sizes = [8, 128], strides = [1, 1]} : vector<8x512xf32> to vector<8x128xf32>
    %603 = math.tanh %602 : vector<8x128xf32>
    %604 = vector.extract_strided_slice %564 {offsets = [0, 384], sizes = [8, 128], strides = [1, 1]} : vector<8x512xf32> to vector<8x128xf32>
    %605 = arith.negf %604 : vector<8x128xf32>
    %606 = math.exp %605 : vector<8x128xf32>
    %cst_137 = arith.constant 1.000000e+00 : f32
    %607 = vector.broadcast %cst_137 : f32 to vector<8x128xf32>
    %608 = arith.addf %607, %606 : vector<8x128xf32>
    %609 = arith.divf %607, %608 : vector<8x128xf32>
    %610 = arith.mulf %601, %535 : vector<8x128xf32>
    %611 = arith.mulf %595, %603 : vector<8x128xf32>
    %612 = arith.addf %610, %611 : vector<8x128xf32>
    %613 = math.tanh %612 : vector<8x128xf32>
    %614 = arith.mulf %609, %613 : vector<8x128xf32>
    %615 = arith.index_cast %c7_i32_124 : i32 to index
    %c0_138 = arith.constant 0 : index
    %c0_139 = arith.constant 0 : index
    %616 = vector.load %arg5[%615, %c0_138, %c0_139] : memref<8x8x256xf32, #tpu.memory_space<vmem>>, vector<1x8x128xf32>
    %617 = vector.shape_cast %616 : vector<1x8x128xf32> to vector<8x128xf32>
    %618 = vector.shape_cast %589 : vector<8x128xf32> to vector<1x8x128xf32>
    tpu.vector_store %arg5[%615, %c0_138, %c0_139], %618 {strides = array<i32>} : memref<8x8x256xf32, #tpu.memory_space<vmem>>, vector<1x8x128xf32>,
    %619 = arith.index_cast %546 : i32 to index
    %c0_140 = arith.constant 0 : index
    %c128_141 = arith.constant 128 : index
    %620 = vector.load %arg5[%619, %c0_140, %c128_141] : memref<8x8x256xf32, #tpu.memory_space<vmem>>, vector<1x8x128xf32>
    %621 = vector.shape_cast %620 : vector<1x8x128xf32> to vector<8x128xf32>
    %622 = vector.shape_cast %614 : vector<8x128xf32> to vector<1x8x128xf32>
    tpu.vector_store %arg5[%619, %c0_140, %c128_141], %622 {strides = array<i32>} : memref<8x8x256xf32, #tpu.memory_space<vmem>>, vector<1x8x128xf32>,
    %c8_i32 = arith.constant 8 : i32
    return
  }
  func.func @transform_0(%arg0: i32) -> (i32, i32, i32) {
    %c0_i32 = arith.constant 0 : i32
    %c0_i32_0 = arith.constant 0 : i32
    %c0_i32_1 = arith.constant 0 : i32
    %c0_i32_2 = arith.constant 0 : i32
    return %c0_i32, %c0_i32_0, %c0_i32_1 : i32, i32, i32
  }
  func.func @transform_1(%arg0: i32) -> (i32, i32, i32) {
    %c0_i32 = arith.constant 0 : i32
    %c0_i32_0 = arith.constant 0 : i32
    %c0_i32_1 = arith.constant 0 : i32
    %c0_i32_2 = arith.constant 0 : i32
    return %c0_i32, %c0_i32_0, %c0_i32_1 : i32, i32, i32
  }
  func.func @transform_2(%arg0: i32) -> (i32, i32) {
    %c0_i32 = arith.constant 0 : i32
    %c0_i32_0 = arith.constant 0 : i32
    %c0_i32_1 = arith.constant 0 : i32
    return %c0_i32, %c0_i32_0 : i32, i32
  }
  func.func @transform_3(%arg0: i32) -> (i32, i32, i32) {
    %c0_i32 = arith.constant 0 : i32
    %c0_i32_0 = arith.constant 0 : i32
    %c0_i32_1 = arith.constant 0 : i32
    %c0_i32_2 = arith.constant 0 : i32
    return %c0_i32, %c0_i32_0, %c0_i32_1 : i32, i32, i32
  }
  func.func @transform_4(%arg0: i32) -> (i32, i32, i32) {
    %c0_i32 = arith.constant 0 : i32
    %c0_i32_0 = arith.constant 0 : i32
    %c0_i32_1 = arith.constant 0 : i32
    %c0_i32_2 = arith.constant 0 : i32
    return %c0_i32, %c0_i32_0, %c0_i32_1 : i32, i32, i32
  }
}

module attributes {stable_mosaic.version = 11 : i64} {
  func.func @lstm_last_kernel(%arg0: i32, %arg1: memref<8x8x512xbf16, #tpu.memory_space<vmem>>, %arg2: memref<8x512xbf16, #tpu.memory_space<vmem>>, %arg3: memref<1x1024xf32, #tpu.memory_space<vmem>>, %arg4: memref<2x128x512xbf16, #tpu.memory_space<vmem>>, %arg5: memref<8x256xf32, #tpu.memory_space<vmem>>) attributes {dimension_semantics = [#tpu.dimension_semantics<arbitrary>], iteration_bounds = array<i64: 1>, scalar_prefetch = 0 : i64, scratch_operands = 0 : i64, tpu.core_type = #tpu.core_type<tc>, window_params = [{pipeline_mode = #tpu.pipeline_mode<synchronous>, transform_indices = @transform_0, window_bounds = array<i64: 8, 8, 512>}, {pipeline_mode = #tpu.pipeline_mode<synchronous>, transform_indices = @transform_1, window_bounds = array<i64: 8, 512>}, {pipeline_mode = #tpu.pipeline_mode<synchronous>, transform_indices = @transform_2, window_bounds = array<i64: 1, 1024>}, {pipeline_mode = #tpu.pipeline_mode<synchronous>, transform_indices = @transform_3, window_bounds = array<i64: 2, 128, 512>}, {pipeline_mode = #tpu.pipeline_mode<synchronous>, transform_indices = @transform_4, window_bounds = array<i64: 8, 256>}]} {
    %c0 = arith.constant 0 : index
    %c0_0 = arith.constant 0 : index
    %c0_1 = arith.constant 0 : index
    %0 = vector.load %arg4[%c0, %c0_0, %c0_1] : memref<2x128x512xbf16, #tpu.memory_space<vmem>>, vector<1x128x512xbf16>
    %1 = vector.shape_cast %0 : vector<1x128x512xbf16> to vector<128x512xbf16>
    %c0_2 = arith.constant 0 : index
    %c0_3 = arith.constant 0 : index
    %2 = vector.load %arg3[%c0_2, %c0_3] : memref<1x1024xf32, #tpu.memory_space<vmem>>, vector<1x512xf32>
    %c0_4 = arith.constant 0 : index
    %c512 = arith.constant 512 : index
    %3 = vector.load %arg3[%c0_4, %c512] : memref<1x1024xf32, #tpu.memory_space<vmem>>, vector<1x512xf32>
    %cst = arith.constant 0.000000e+00 : f32
    %4 = vector.broadcast %cst : f32 to vector<8x128xf32>
    %c0_i32 = arith.constant 0 : i32
    %5 = arith.index_cast %c0_i32 : i32 to index
    %c0_5 = arith.constant 0 : index
    %c0_6 = arith.constant 0 : index
    %6 = vector.load %arg1[%5, %c0_5, %c0_6] : memref<8x8x512xbf16, #tpu.memory_space<vmem>>, vector<1x8x512xbf16>
    %7 = vector.shape_cast %6 : vector<1x8x512xbf16> to vector<8x512xbf16>
    %8 = arith.extf %7 : vector<8x512xbf16> to vector<8x512xf32>
    %9 = vector.broadcast %2 : vector<1x512xf32> to vector<8x512xf32>
    %10 = arith.addf %8, %9 : vector<8x512xf32>
    %11 = arith.truncf %4 : vector<8x128xf32> to vector<8x128xbf16>
    %cst_7 = arith.constant dense<0.000000e+00> : vector<8x512xf32>
    %12 = tpu.matmul %11, %1, %cst_7 {dimension_numbers = #tpu.dot_dimension_numbers<[1], [0], [0], [1], [0, 0, 1, 1], [], []>} : vector<8x128xbf16>, vector<128x512xbf16>, vector<8x512xf32> -> vector<8x512xf32>
    %13 = arith.addf %10, %12 : vector<8x512xf32>
    %14 = vector.extract_strided_slice %13 {offsets = [0, 0], sizes = [8, 128], strides = [1, 1]} : vector<8x512xf32> to vector<8x128xf32>
    %15 = arith.negf %14 : vector<8x128xf32>
    %16 = math.exp %15 : vector<8x128xf32>
    %cst_8 = arith.constant 1.000000e+00 : f32
    %17 = vector.broadcast %cst_8 : f32 to vector<8x128xf32>
    %18 = arith.addf %17, %16 : vector<8x128xf32>
    %19 = arith.divf %17, %18 : vector<8x128xf32>
    %20 = vector.extract_strided_slice %13 {offsets = [0, 128], sizes = [8, 128], strides = [1, 1]} : vector<8x512xf32> to vector<8x128xf32>
    %21 = arith.negf %20 : vector<8x128xf32>
    %22 = math.exp %21 : vector<8x128xf32>
    %cst_9 = arith.constant 1.000000e+00 : f32
    %23 = vector.broadcast %cst_9 : f32 to vector<8x128xf32>
    %24 = arith.addf %23, %22 : vector<8x128xf32>
    %25 = arith.divf %23, %24 : vector<8x128xf32>
    %26 = vector.extract_strided_slice %13 {offsets = [0, 256], sizes = [8, 128], strides = [1, 1]} : vector<8x512xf32> to vector<8x128xf32>
    %27 = math.tanh %26 : vector<8x128xf32>
    %28 = vector.extract_strided_slice %13 {offsets = [0, 384], sizes = [8, 128], strides = [1, 1]} : vector<8x512xf32> to vector<8x128xf32>
    %29 = arith.negf %28 : vector<8x128xf32>
    %30 = math.exp %29 : vector<8x128xf32>
    %cst_10 = arith.constant 1.000000e+00 : f32
    %31 = vector.broadcast %cst_10 : f32 to vector<8x128xf32>
    %32 = arith.addf %31, %30 : vector<8x128xf32>
    %33 = arith.divf %31, %32 : vector<8x128xf32>
    %34 = arith.mulf %25, %4 : vector<8x128xf32>
    %35 = arith.mulf %19, %27 : vector<8x128xf32>
    %36 = arith.addf %34, %35 : vector<8x128xf32>
    %37 = math.tanh %36 : vector<8x128xf32>
    %38 = arith.mulf %33, %37 : vector<8x128xf32>
    %c1_i32 = arith.constant 1 : i32
    %39 = arith.index_cast %c1_i32 : i32 to index
    %c0_11 = arith.constant 0 : index
    %c0_12 = arith.constant 0 : index
    %40 = vector.load %arg1[%39, %c0_11, %c0_12] : memref<8x8x512xbf16, #tpu.memory_space<vmem>>, vector<1x8x512xbf16>
    %41 = vector.shape_cast %40 : vector<1x8x512xbf16> to vector<8x512xbf16>
    %42 = arith.extf %41 : vector<8x512xbf16> to vector<8x512xf32>
    %43 = vector.broadcast %2 : vector<1x512xf32> to vector<8x512xf32>
    %44 = arith.addf %42, %43 : vector<8x512xf32>
    %45 = arith.truncf %38 : vector<8x128xf32> to vector<8x128xbf16>
    %cst_13 = arith.constant dense<0.000000e+00> : vector<8x512xf32>
    %46 = tpu.matmul %45, %1, %cst_13 {dimension_numbers = #tpu.dot_dimension_numbers<[1], [0], [0], [1], [0, 0, 1, 1], [], []>} : vector<8x128xbf16>, vector<128x512xbf16>, vector<8x512xf32> -> vector<8x512xf32>
    %47 = arith.addf %44, %46 : vector<8x512xf32>
    %48 = vector.extract_strided_slice %47 {offsets = [0, 0], sizes = [8, 128], strides = [1, 1]} : vector<8x512xf32> to vector<8x128xf32>
    %49 = arith.negf %48 : vector<8x128xf32>
    %50 = math.exp %49 : vector<8x128xf32>
    %cst_14 = arith.constant 1.000000e+00 : f32
    %51 = vector.broadcast %cst_14 : f32 to vector<8x128xf32>
    %52 = arith.addf %51, %50 : vector<8x128xf32>
    %53 = arith.divf %51, %52 : vector<8x128xf32>
    %54 = vector.extract_strided_slice %47 {offsets = [0, 128], sizes = [8, 128], strides = [1, 1]} : vector<8x512xf32> to vector<8x128xf32>
    %55 = arith.negf %54 : vector<8x128xf32>
    %56 = math.exp %55 : vector<8x128xf32>
    %cst_15 = arith.constant 1.000000e+00 : f32
    %57 = vector.broadcast %cst_15 : f32 to vector<8x128xf32>
    %58 = arith.addf %57, %56 : vector<8x128xf32>
    %59 = arith.divf %57, %58 : vector<8x128xf32>
    %60 = vector.extract_strided_slice %47 {offsets = [0, 256], sizes = [8, 128], strides = [1, 1]} : vector<8x512xf32> to vector<8x128xf32>
    %61 = math.tanh %60 : vector<8x128xf32>
    %62 = vector.extract_strided_slice %47 {offsets = [0, 384], sizes = [8, 128], strides = [1, 1]} : vector<8x512xf32> to vector<8x128xf32>
    %63 = arith.negf %62 : vector<8x128xf32>
    %64 = math.exp %63 : vector<8x128xf32>
    %cst_16 = arith.constant 1.000000e+00 : f32
    %65 = vector.broadcast %cst_16 : f32 to vector<8x128xf32>
    %66 = arith.addf %65, %64 : vector<8x128xf32>
    %67 = arith.divf %65, %66 : vector<8x128xf32>
    %68 = arith.mulf %59, %36 : vector<8x128xf32>
    %69 = arith.mulf %53, %61 : vector<8x128xf32>
    %70 = arith.addf %68, %69 : vector<8x128xf32>
    %71 = math.tanh %70 : vector<8x128xf32>
    %72 = arith.mulf %67, %71 : vector<8x128xf32>
    %c2_i32 = arith.constant 2 : i32
    %73 = arith.index_cast %c2_i32 : i32 to index
    %c0_17 = arith.constant 0 : index
    %c0_18 = arith.constant 0 : index
    %74 = vector.load %arg1[%73, %c0_17, %c0_18] : memref<8x8x512xbf16, #tpu.memory_space<vmem>>, vector<1x8x512xbf16>
    %75 = vector.shape_cast %74 : vector<1x8x512xbf16> to vector<8x512xbf16>
    %76 = arith.extf %75 : vector<8x512xbf16> to vector<8x512xf32>
    %77 = vector.broadcast %2 : vector<1x512xf32> to vector<8x512xf32>
    %78 = arith.addf %76, %77 : vector<8x512xf32>
    %79 = arith.truncf %72 : vector<8x128xf32> to vector<8x128xbf16>
    %cst_19 = arith.constant dense<0.000000e+00> : vector<8x512xf32>
    %80 = tpu.matmul %79, %1, %cst_19 {dimension_numbers = #tpu.dot_dimension_numbers<[1], [0], [0], [1], [0, 0, 1, 1], [], []>} : vector<8x128xbf16>, vector<128x512xbf16>, vector<8x512xf32> -> vector<8x512xf32>
    %81 = arith.addf %78, %80 : vector<8x512xf32>
    %82 = vector.extract_strided_slice %81 {offsets = [0, 0], sizes = [8, 128], strides = [1, 1]} : vector<8x512xf32> to vector<8x128xf32>
    %83 = arith.negf %82 : vector<8x128xf32>
    %84 = math.exp %83 : vector<8x128xf32>
    %cst_20 = arith.constant 1.000000e+00 : f32
    %85 = vector.broadcast %cst_20 : f32 to vector<8x128xf32>
    %86 = arith.addf %85, %84 : vector<8x128xf32>
    %87 = arith.divf %85, %86 : vector<8x128xf32>
    %88 = vector.extract_strided_slice %81 {offsets = [0, 128], sizes = [8, 128], strides = [1, 1]} : vector<8x512xf32> to vector<8x128xf32>
    %89 = arith.negf %88 : vector<8x128xf32>
    %90 = math.exp %89 : vector<8x128xf32>
    %cst_21 = arith.constant 1.000000e+00 : f32
    %91 = vector.broadcast %cst_21 : f32 to vector<8x128xf32>
    %92 = arith.addf %91, %90 : vector<8x128xf32>
    %93 = arith.divf %91, %92 : vector<8x128xf32>
    %94 = vector.extract_strided_slice %81 {offsets = [0, 256], sizes = [8, 128], strides = [1, 1]} : vector<8x512xf32> to vector<8x128xf32>
    %95 = math.tanh %94 : vector<8x128xf32>
    %96 = vector.extract_strided_slice %81 {offsets = [0, 384], sizes = [8, 128], strides = [1, 1]} : vector<8x512xf32> to vector<8x128xf32>
    %97 = arith.negf %96 : vector<8x128xf32>
    %98 = math.exp %97 : vector<8x128xf32>
    %cst_22 = arith.constant 1.000000e+00 : f32
    %99 = vector.broadcast %cst_22 : f32 to vector<8x128xf32>
    %100 = arith.addf %99, %98 : vector<8x128xf32>
    %101 = arith.divf %99, %100 : vector<8x128xf32>
    %102 = arith.mulf %93, %70 : vector<8x128xf32>
    %103 = arith.mulf %87, %95 : vector<8x128xf32>
    %104 = arith.addf %102, %103 : vector<8x128xf32>
    %105 = math.tanh %104 : vector<8x128xf32>
    %106 = arith.mulf %101, %105 : vector<8x128xf32>
    %c3_i32 = arith.constant 3 : i32
    %107 = arith.index_cast %c3_i32 : i32 to index
    %c0_23 = arith.constant 0 : index
    %c0_24 = arith.constant 0 : index
    %108 = vector.load %arg1[%107, %c0_23, %c0_24] : memref<8x8x512xbf16, #tpu.memory_space<vmem>>, vector<1x8x512xbf16>
    %109 = vector.shape_cast %108 : vector<1x8x512xbf16> to vector<8x512xbf16>
    %110 = arith.extf %109 : vector<8x512xbf16> to vector<8x512xf32>
    %111 = vector.broadcast %2 : vector<1x512xf32> to vector<8x512xf32>
    %112 = arith.addf %110, %111 : vector<8x512xf32>
    %113 = arith.truncf %106 : vector<8x128xf32> to vector<8x128xbf16>
    %cst_25 = arith.constant dense<0.000000e+00> : vector<8x512xf32>
    %114 = tpu.matmul %113, %1, %cst_25 {dimension_numbers = #tpu.dot_dimension_numbers<[1], [0], [0], [1], [0, 0, 1, 1], [], []>} : vector<8x128xbf16>, vector<128x512xbf16>, vector<8x512xf32> -> vector<8x512xf32>
    %115 = arith.addf %112, %114 : vector<8x512xf32>
    %116 = vector.extract_strided_slice %115 {offsets = [0, 0], sizes = [8, 128], strides = [1, 1]} : vector<8x512xf32> to vector<8x128xf32>
    %117 = arith.negf %116 : vector<8x128xf32>
    %118 = math.exp %117 : vector<8x128xf32>
    %cst_26 = arith.constant 1.000000e+00 : f32
    %119 = vector.broadcast %cst_26 : f32 to vector<8x128xf32>
    %120 = arith.addf %119, %118 : vector<8x128xf32>
    %121 = arith.divf %119, %120 : vector<8x128xf32>
    %122 = vector.extract_strided_slice %115 {offsets = [0, 128], sizes = [8, 128], strides = [1, 1]} : vector<8x512xf32> to vector<8x128xf32>
    %123 = arith.negf %122 : vector<8x128xf32>
    %124 = math.exp %123 : vector<8x128xf32>
    %cst_27 = arith.constant 1.000000e+00 : f32
    %125 = vector.broadcast %cst_27 : f32 to vector<8x128xf32>
    %126 = arith.addf %125, %124 : vector<8x128xf32>
    %127 = arith.divf %125, %126 : vector<8x128xf32>
    %128 = vector.extract_strided_slice %115 {offsets = [0, 256], sizes = [8, 128], strides = [1, 1]} : vector<8x512xf32> to vector<8x128xf32>
    %129 = math.tanh %128 : vector<8x128xf32>
    %130 = vector.extract_strided_slice %115 {offsets = [0, 384], sizes = [8, 128], strides = [1, 1]} : vector<8x512xf32> to vector<8x128xf32>
    %131 = arith.negf %130 : vector<8x128xf32>
    %132 = math.exp %131 : vector<8x128xf32>
    %cst_28 = arith.constant 1.000000e+00 : f32
    %133 = vector.broadcast %cst_28 : f32 to vector<8x128xf32>
    %134 = arith.addf %133, %132 : vector<8x128xf32>
    %135 = arith.divf %133, %134 : vector<8x128xf32>
    %136 = arith.mulf %127, %104 : vector<8x128xf32>
    %137 = arith.mulf %121, %129 : vector<8x128xf32>
    %138 = arith.addf %136, %137 : vector<8x128xf32>
    %139 = math.tanh %138 : vector<8x128xf32>
    %140 = arith.mulf %135, %139 : vector<8x128xf32>
    %c4_i32 = arith.constant 4 : i32
    %141 = arith.index_cast %c4_i32 : i32 to index
    %c0_29 = arith.constant 0 : index
    %c0_30 = arith.constant 0 : index
    %142 = vector.load %arg1[%141, %c0_29, %c0_30] : memref<8x8x512xbf16, #tpu.memory_space<vmem>>, vector<1x8x512xbf16>
    %143 = vector.shape_cast %142 : vector<1x8x512xbf16> to vector<8x512xbf16>
    %144 = arith.extf %143 : vector<8x512xbf16> to vector<8x512xf32>
    %145 = vector.broadcast %2 : vector<1x512xf32> to vector<8x512xf32>
    %146 = arith.addf %144, %145 : vector<8x512xf32>
    %147 = arith.truncf %140 : vector<8x128xf32> to vector<8x128xbf16>
    %cst_31 = arith.constant dense<0.000000e+00> : vector<8x512xf32>
    %148 = tpu.matmul %147, %1, %cst_31 {dimension_numbers = #tpu.dot_dimension_numbers<[1], [0], [0], [1], [0, 0, 1, 1], [], []>} : vector<8x128xbf16>, vector<128x512xbf16>, vector<8x512xf32> -> vector<8x512xf32>
    %149 = arith.addf %146, %148 : vector<8x512xf32>
    %150 = vector.extract_strided_slice %149 {offsets = [0, 0], sizes = [8, 128], strides = [1, 1]} : vector<8x512xf32> to vector<8x128xf32>
    %151 = arith.negf %150 : vector<8x128xf32>
    %152 = math.exp %151 : vector<8x128xf32>
    %cst_32 = arith.constant 1.000000e+00 : f32
    %153 = vector.broadcast %cst_32 : f32 to vector<8x128xf32>
    %154 = arith.addf %153, %152 : vector<8x128xf32>
    %155 = arith.divf %153, %154 : vector<8x128xf32>
    %156 = vector.extract_strided_slice %149 {offsets = [0, 128], sizes = [8, 128], strides = [1, 1]} : vector<8x512xf32> to vector<8x128xf32>
    %157 = arith.negf %156 : vector<8x128xf32>
    %158 = math.exp %157 : vector<8x128xf32>
    %cst_33 = arith.constant 1.000000e+00 : f32
    %159 = vector.broadcast %cst_33 : f32 to vector<8x128xf32>
    %160 = arith.addf %159, %158 : vector<8x128xf32>
    %161 = arith.divf %159, %160 : vector<8x128xf32>
    %162 = vector.extract_strided_slice %149 {offsets = [0, 256], sizes = [8, 128], strides = [1, 1]} : vector<8x512xf32> to vector<8x128xf32>
    %163 = math.tanh %162 : vector<8x128xf32>
    %164 = vector.extract_strided_slice %149 {offsets = [0, 384], sizes = [8, 128], strides = [1, 1]} : vector<8x512xf32> to vector<8x128xf32>
    %165 = arith.negf %164 : vector<8x128xf32>
    %166 = math.exp %165 : vector<8x128xf32>
    %cst_34 = arith.constant 1.000000e+00 : f32
    %167 = vector.broadcast %cst_34 : f32 to vector<8x128xf32>
    %168 = arith.addf %167, %166 : vector<8x128xf32>
    %169 = arith.divf %167, %168 : vector<8x128xf32>
    %170 = arith.mulf %161, %138 : vector<8x128xf32>
    %171 = arith.mulf %155, %163 : vector<8x128xf32>
    %172 = arith.addf %170, %171 : vector<8x128xf32>
    %173 = math.tanh %172 : vector<8x128xf32>
    %174 = arith.mulf %169, %173 : vector<8x128xf32>
    %c5_i32 = arith.constant 5 : i32
    %175 = arith.index_cast %c5_i32 : i32 to index
    %c0_35 = arith.constant 0 : index
    %c0_36 = arith.constant 0 : index
    %176 = vector.load %arg1[%175, %c0_35, %c0_36] : memref<8x8x512xbf16, #tpu.memory_space<vmem>>, vector<1x8x512xbf16>
    %177 = vector.shape_cast %176 : vector<1x8x512xbf16> to vector<8x512xbf16>
    %178 = arith.extf %177 : vector<8x512xbf16> to vector<8x512xf32>
    %179 = vector.broadcast %2 : vector<1x512xf32> to vector<8x512xf32>
    %180 = arith.addf %178, %179 : vector<8x512xf32>
    %181 = arith.truncf %174 : vector<8x128xf32> to vector<8x128xbf16>
    %cst_37 = arith.constant dense<0.000000e+00> : vector<8x512xf32>
    %182 = tpu.matmul %181, %1, %cst_37 {dimension_numbers = #tpu.dot_dimension_numbers<[1], [0], [0], [1], [0, 0, 1, 1], [], []>} : vector<8x128xbf16>, vector<128x512xbf16>, vector<8x512xf32> -> vector<8x512xf32>
    %183 = arith.addf %180, %182 : vector<8x512xf32>
    %184 = vector.extract_strided_slice %183 {offsets = [0, 0], sizes = [8, 128], strides = [1, 1]} : vector<8x512xf32> to vector<8x128xf32>
    %185 = arith.negf %184 : vector<8x128xf32>
    %186 = math.exp %185 : vector<8x128xf32>
    %cst_38 = arith.constant 1.000000e+00 : f32
    %187 = vector.broadcast %cst_38 : f32 to vector<8x128xf32>
    %188 = arith.addf %187, %186 : vector<8x128xf32>
    %189 = arith.divf %187, %188 : vector<8x128xf32>
    %190 = vector.extract_strided_slice %183 {offsets = [0, 128], sizes = [8, 128], strides = [1, 1]} : vector<8x512xf32> to vector<8x128xf32>
    %191 = arith.negf %190 : vector<8x128xf32>
    %192 = math.exp %191 : vector<8x128xf32>
    %cst_39 = arith.constant 1.000000e+00 : f32
    %193 = vector.broadcast %cst_39 : f32 to vector<8x128xf32>
    %194 = arith.addf %193, %192 : vector<8x128xf32>
    %195 = arith.divf %193, %194 : vector<8x128xf32>
    %196 = vector.extract_strided_slice %183 {offsets = [0, 256], sizes = [8, 128], strides = [1, 1]} : vector<8x512xf32> to vector<8x128xf32>
    %197 = math.tanh %196 : vector<8x128xf32>
    %198 = vector.extract_strided_slice %183 {offsets = [0, 384], sizes = [8, 128], strides = [1, 1]} : vector<8x512xf32> to vector<8x128xf32>
    %199 = arith.negf %198 : vector<8x128xf32>
    %200 = math.exp %199 : vector<8x128xf32>
    %cst_40 = arith.constant 1.000000e+00 : f32
    %201 = vector.broadcast %cst_40 : f32 to vector<8x128xf32>
    %202 = arith.addf %201, %200 : vector<8x128xf32>
    %203 = arith.divf %201, %202 : vector<8x128xf32>
    %204 = arith.mulf %195, %172 : vector<8x128xf32>
    %205 = arith.mulf %189, %197 : vector<8x128xf32>
    %206 = arith.addf %204, %205 : vector<8x128xf32>
    %207 = math.tanh %206 : vector<8x128xf32>
    %208 = arith.mulf %203, %207 : vector<8x128xf32>
    %c6_i32 = arith.constant 6 : i32
    %209 = arith.index_cast %c6_i32 : i32 to index
    %c0_41 = arith.constant 0 : index
    %c0_42 = arith.constant 0 : index
    %210 = vector.load %arg1[%209, %c0_41, %c0_42] : memref<8x8x512xbf16, #tpu.memory_space<vmem>>, vector<1x8x512xbf16>
    %211 = vector.shape_cast %210 : vector<1x8x512xbf16> to vector<8x512xbf16>
    %212 = arith.extf %211 : vector<8x512xbf16> to vector<8x512xf32>
    %213 = vector.broadcast %2 : vector<1x512xf32> to vector<8x512xf32>
    %214 = arith.addf %212, %213 : vector<8x512xf32>
    %215 = arith.truncf %208 : vector<8x128xf32> to vector<8x128xbf16>
    %cst_43 = arith.constant dense<0.000000e+00> : vector<8x512xf32>
    %216 = tpu.matmul %215, %1, %cst_43 {dimension_numbers = #tpu.dot_dimension_numbers<[1], [0], [0], [1], [0, 0, 1, 1], [], []>} : vector<8x128xbf16>, vector<128x512xbf16>, vector<8x512xf32> -> vector<8x512xf32>
    %217 = arith.addf %214, %216 : vector<8x512xf32>
    %218 = vector.extract_strided_slice %217 {offsets = [0, 0], sizes = [8, 128], strides = [1, 1]} : vector<8x512xf32> to vector<8x128xf32>
    %219 = arith.negf %218 : vector<8x128xf32>
    %220 = math.exp %219 : vector<8x128xf32>
    %cst_44 = arith.constant 1.000000e+00 : f32
    %221 = vector.broadcast %cst_44 : f32 to vector<8x128xf32>
    %222 = arith.addf %221, %220 : vector<8x128xf32>
    %223 = arith.divf %221, %222 : vector<8x128xf32>
    %224 = vector.extract_strided_slice %217 {offsets = [0, 128], sizes = [8, 128], strides = [1, 1]} : vector<8x512xf32> to vector<8x128xf32>
    %225 = arith.negf %224 : vector<8x128xf32>
    %226 = math.exp %225 : vector<8x128xf32>
    %cst_45 = arith.constant 1.000000e+00 : f32
    %227 = vector.broadcast %cst_45 : f32 to vector<8x128xf32>
    %228 = arith.addf %227, %226 : vector<8x128xf32>
    %229 = arith.divf %227, %228 : vector<8x128xf32>
    %230 = vector.extract_strided_slice %217 {offsets = [0, 256], sizes = [8, 128], strides = [1, 1]} : vector<8x512xf32> to vector<8x128xf32>
    %231 = math.tanh %230 : vector<8x128xf32>
    %232 = vector.extract_strided_slice %217 {offsets = [0, 384], sizes = [8, 128], strides = [1, 1]} : vector<8x512xf32> to vector<8x128xf32>
    %233 = arith.negf %232 : vector<8x128xf32>
    %234 = math.exp %233 : vector<8x128xf32>
    %cst_46 = arith.constant 1.000000e+00 : f32
    %235 = vector.broadcast %cst_46 : f32 to vector<8x128xf32>
    %236 = arith.addf %235, %234 : vector<8x128xf32>
    %237 = arith.divf %235, %236 : vector<8x128xf32>
    %238 = arith.mulf %229, %206 : vector<8x128xf32>
    %239 = arith.mulf %223, %231 : vector<8x128xf32>
    %240 = arith.addf %238, %239 : vector<8x128xf32>
    %241 = math.tanh %240 : vector<8x128xf32>
    %242 = arith.mulf %237, %241 : vector<8x128xf32>
    %c7_i32 = arith.constant 7 : i32
    %243 = arith.index_cast %c7_i32 : i32 to index
    %c0_47 = arith.constant 0 : index
    %c0_48 = arith.constant 0 : index
    %244 = vector.load %arg1[%243, %c0_47, %c0_48] : memref<8x8x512xbf16, #tpu.memory_space<vmem>>, vector<1x8x512xbf16>
    %245 = vector.shape_cast %244 : vector<1x8x512xbf16> to vector<8x512xbf16>
    %246 = arith.extf %245 : vector<8x512xbf16> to vector<8x512xf32>
    %247 = vector.broadcast %2 : vector<1x512xf32> to vector<8x512xf32>
    %248 = arith.addf %246, %247 : vector<8x512xf32>
    %249 = arith.truncf %242 : vector<8x128xf32> to vector<8x128xbf16>
    %cst_49 = arith.constant dense<0.000000e+00> : vector<8x512xf32>
    %250 = tpu.matmul %249, %1, %cst_49 {dimension_numbers = #tpu.dot_dimension_numbers<[1], [0], [0], [1], [0, 0, 1, 1], [], []>} : vector<8x128xbf16>, vector<128x512xbf16>, vector<8x512xf32> -> vector<8x512xf32>
    %251 = arith.addf %248, %250 : vector<8x512xf32>
    %252 = vector.extract_strided_slice %251 {offsets = [0, 0], sizes = [8, 128], strides = [1, 1]} : vector<8x512xf32> to vector<8x128xf32>
    %253 = arith.negf %252 : vector<8x128xf32>
    %254 = math.exp %253 : vector<8x128xf32>
    %cst_50 = arith.constant 1.000000e+00 : f32
    %255 = vector.broadcast %cst_50 : f32 to vector<8x128xf32>
    %256 = arith.addf %255, %254 : vector<8x128xf32>
    %257 = arith.divf %255, %256 : vector<8x128xf32>
    %258 = vector.extract_strided_slice %251 {offsets = [0, 128], sizes = [8, 128], strides = [1, 1]} : vector<8x512xf32> to vector<8x128xf32>
    %259 = arith.negf %258 : vector<8x128xf32>
    %260 = math.exp %259 : vector<8x128xf32>
    %cst_51 = arith.constant 1.000000e+00 : f32
    %261 = vector.broadcast %cst_51 : f32 to vector<8x128xf32>
    %262 = arith.addf %261, %260 : vector<8x128xf32>
    %263 = arith.divf %261, %262 : vector<8x128xf32>
    %264 = vector.extract_strided_slice %251 {offsets = [0, 256], sizes = [8, 128], strides = [1, 1]} : vector<8x512xf32> to vector<8x128xf32>
    %265 = math.tanh %264 : vector<8x128xf32>
    %266 = vector.extract_strided_slice %251 {offsets = [0, 384], sizes = [8, 128], strides = [1, 1]} : vector<8x512xf32> to vector<8x128xf32>
    %267 = arith.negf %266 : vector<8x128xf32>
    %268 = math.exp %267 : vector<8x128xf32>
    %cst_52 = arith.constant 1.000000e+00 : f32
    %269 = vector.broadcast %cst_52 : f32 to vector<8x128xf32>
    %270 = arith.addf %269, %268 : vector<8x128xf32>
    %271 = arith.divf %269, %270 : vector<8x128xf32>
    %272 = arith.mulf %263, %240 : vector<8x128xf32>
    %273 = arith.mulf %257, %265 : vector<8x128xf32>
    %274 = arith.addf %272, %273 : vector<8x128xf32>
    %275 = math.tanh %274 : vector<8x128xf32>
    %276 = arith.mulf %271, %275 : vector<8x128xf32>
    %c8_i32 = arith.constant 8 : i32
    %c0_53 = arith.constant 0 : index
    %c0_54 = arith.constant 0 : index
    %277 = vector.load %arg2[%c0_53, %c0_54] : memref<8x512xbf16, #tpu.memory_space<vmem>>, vector<8x512xbf16>
    %278 = arith.extf %277 : vector<8x512xbf16> to vector<8x512xf32>
    %279 = vector.broadcast %3 : vector<1x512xf32> to vector<8x512xf32>
    %280 = arith.addf %278, %279 : vector<8x512xf32>
    %281 = vector.extract_strided_slice %280 {offsets = [0, 0], sizes = [8, 128], strides = [1, 1]} : vector<8x512xf32> to vector<8x128xf32>
    %282 = arith.negf %281 : vector<8x128xf32>
    %283 = math.exp %282 : vector<8x128xf32>
    %cst_55 = arith.constant 1.000000e+00 : f32
    %284 = vector.broadcast %cst_55 : f32 to vector<8x128xf32>
    %285 = arith.addf %284, %283 : vector<8x128xf32>
    %286 = arith.divf %284, %285 : vector<8x128xf32>
    %287 = vector.extract_strided_slice %280 {offsets = [0, 256], sizes = [8, 128], strides = [1, 1]} : vector<8x512xf32> to vector<8x128xf32>
    %288 = math.tanh %287 : vector<8x128xf32>
    %289 = vector.extract_strided_slice %280 {offsets = [0, 384], sizes = [8, 128], strides = [1, 1]} : vector<8x512xf32> to vector<8x128xf32>
    %290 = arith.negf %289 : vector<8x128xf32>
    %291 = math.exp %290 : vector<8x128xf32>
    %cst_56 = arith.constant 1.000000e+00 : f32
    %292 = vector.broadcast %cst_56 : f32 to vector<8x128xf32>
    %293 = arith.addf %292, %291 : vector<8x128xf32>
    %294 = arith.divf %292, %293 : vector<8x128xf32>
    %295 = arith.mulf %286, %288 : vector<8x128xf32>
    %296 = math.tanh %295 : vector<8x128xf32>
    %297 = arith.mulf %294, %296 : vector<8x128xf32>
    %c0_57 = arith.constant 0 : index
    %c0_58 = arith.constant 0 : index
    %298 = vector.load %arg5[%c0_57, %c0_58] : memref<8x256xf32, #tpu.memory_space<vmem>>, vector<8x128xf32>
    tpu.vector_store %arg5[%c0_57, %c0_58], %276 {strides = array<i32>} : memref<8x256xf32, #tpu.memory_space<vmem>>, vector<8x128xf32>,
    %c0_59 = arith.constant 0 : index
    %c128 = arith.constant 128 : index
    %299 = vector.load %arg5[%c0_59, %c128] : memref<8x256xf32, #tpu.memory_space<vmem>>, vector<8x128xf32>
    tpu.vector_store %arg5[%c0_59, %c128], %297 {strides = array<i32>} : memref<8x256xf32, #tpu.memory_space<vmem>>, vector<8x128xf32>,
    return
  }
  func.func @transform_0(%arg0: i32) -> (i32, i32, i32) {
    %c0_i32 = arith.constant 0 : i32
    %c0_i32_0 = arith.constant 0 : i32
    %c0_i32_1 = arith.constant 0 : i32
    %c0_i32_2 = arith.constant 0 : i32
    return %c0_i32, %c0_i32_0, %c0_i32_1 : i32, i32, i32
  }
  func.func @transform_1(%arg0: i32) -> (i32, i32) {
    %c0_i32 = arith.constant 0 : i32
    %c0_i32_0 = arith.constant 0 : i32
    %c0_i32_1 = arith.constant 0 : i32
    return %c0_i32, %c0_i32_0 : i32, i32
  }
  func.func @transform_2(%arg0: i32) -> (i32, i32) {
    %c0_i32 = arith.constant 0 : i32
    %c0_i32_0 = arith.constant 0 : i32
    %c0_i32_1 = arith.constant 0 : i32
    return %c0_i32, %c0_i32_0 : i32, i32
  }
  func.func @transform_3(%arg0: i32) -> (i32, i32, i32) {
    %c0_i32 = arith.constant 0 : i32
    %c0_i32_0 = arith.constant 0 : i32
    %c0_i32_1 = arith.constant 0 : i32
    %c0_i32_2 = arith.constant 0 : i32
    return %c0_i32, %c0_i32_0, %c0_i32_1 : i32, i32, i32
  }
  func.func @transform_4(%arg0: i32) -> (i32, i32) {
    %c0_i32 = arith.constant 0 : i32
    %c0_i32_0 = arith.constant 0 : i32
    %c0_i32_1 = arith.constant 0 : i32
    return %c0_i32, %c0_i32_0 : i32, i32
  }
}

</mosaic_0001>

<bundles_post_ra>
// kernel: white_sprague_forward.3
= control target key start
LH: loop header
LB: loop body
LE: loop exit
PB: predicated region body
PF: predicated region fallthrough
CT: control target
= control target key end

     0   :  { %v1547_v1 = vmov 0   ;;  %v59_v33 = vlaneseq  ;;  %s2257_s3 = inlined_call_operand.vmem [shape: bf16[2,128,512], index: 3, kind: input, shape index: {}]   ;;  %s2258_s2 = inlined_call_operand.vmem [shape: f32[1,1024], index: 2, kind: input, shape index: {}]   ;;  %s2259_s0 = inlined_call_operand.vmem [shape: bf16[8,8,512], index: 0, kind: input, shape index: {}]   ;;  %s2260_s1 = inlined_call_operand.vmem [shape: bf16[8,512], index: 1, kind: input, shape index: {}]   ;;  %s2261_s4 = inlined_call_operand.vmem [shape: f32[8,256], index: 4, kind: output, shape index: {}]  }
   0x1   :  { %v1576_v0 = vld [vmem:[%s2257_s3 + $0x4] ss:$16 sps:$4 sm:$0xff]   ;;  %275 = vmatprep.mubr.bf16.mxu0 %v1547_v1  ;;  %316 = vmatprep.mubr.bf16.mxu1 %v1547_v1  ;;  %v1583_v2 = vld [vmem:[%s2257_s3] ss:$16 sps:$4 sm:$0xff]   ;;  %v1606_v6 = vld [vmem:[%s2257_s3 + $0xc] ss:$16 sps:$4 sm:$0xff]  }
   0x2   :  { %243 = vmatprep.subr.bf16.mxu0 %v1576_v0  ;;  %v1589_v3 = vld [vmem:[%s2257_s3 + $0x24] ss:$16 sps:$4 sm:$0xff]   ;;  %v1595_v4 = vld [vmem:[%s2257_s3 + $0x20] ss:$16 sps:$4 sm:$0xff]   ;;  %v1611_v7 = vld [vmem:[%s2257_s3 + $0x8] ss:$16 sps:$4 sm:$0xff]   ;;  %284 = vmatprep.subr.bf16.mxu1 %v1606_v6 }
   0x3   :  { %244 = vmatpush1.bf16.msra.mxu0 %v1583_v2  ;;  %v1601_v5 = vld [vmem:[%s2257_s3 + $0x44] ss:$16 sps:$4 sm:$0xff]   ;;  %v1617_v8 = vld [vmem:[%s2257_s3 + $0x40] ss:$16 sps:$4 sm:$0xff]   ;;  %285 = vmatpush1.bf16.msra.mxu1 %v1611_v7  ;;  %v1630_v10 = vld [vmem:[%s2257_s3 + $0x2c] ss:$16 sps:$4 sm:$0xff]  }
   0x4   :  { %245 = vmatprep.subr.bf16.mxu0 %v1589_v3  ;;  %v1624_v9 = vld [vmem:[%s2257_s3 + $0x64] ss:$16 sps:$4 sm:$0xff]   ;;  %v1635_v11 = vld [vmem:[%s2257_s3 + $0x28] ss:$16 sps:$4 sm:$0xff]   ;;  %286 = vmatprep.subr.bf16.mxu1 %v1630_v10  ;;  %v1642_v12 = vld [vmem:[%s2257_s3 + $0x60] ss:$16 sps:$4 sm:$0xff]  }
   0x5   :  { %v1647_v13 = vld [vmem:[%s2257_s3 + $0x84] ss:$16 sps:$4 sm:$0xff]   ;;  %v1652_v14 = vld [vmem:[%s2257_s3 + $0x4c] ss:$16 sps:$4 sm:$0xff]   ;;  %v1659_v15 = vld [vmem:[%s2257_s3 + $0x48] ss:$16 sps:$4 sm:$0xff]  }
   0x6   :  { %v1665_v16 = vld [vmem:[%s2257_s3 + $0x6c] ss:$16 sps:$4 sm:$0xff]   ;;  %v1671_v17 = vld [vmem:[%s2257_s3 + $0x80] ss:$16 sps:$4 sm:$0xff]   ;;  %v1677_v18 = vld [vmem:[%s2257_s3 + $0xa4] ss:$16 sps:$4 sm:$0xff]  }
   0x7   :  { %246 = vmatpush1.bf16.msra.mxu0 %v1595_v4  ;;  %287 = vmatpush1.bf16.msra.mxu1 %v1635_v11  ;;  %v1683_v19 = vld [vmem:[%s2257_s3 + $0x68] ss:$16 sps:$4 sm:$0xff]   ;;  %v1689_v20 = vld [vmem:[%s2257_s3 + $0x8c] ss:$16 sps:$4 sm:$0xff]   ;;  %v1695_v21 = vld [vmem:[%s2257_s3 + $0xa0] ss:$16 sps:$4 sm:$0xff]  }
   0x8   :  { %247 = vmatprep.subr.bf16.mxu0 %v1601_v5  ;;  %288 = vmatprep.subr.bf16.mxu1 %v1652_v14  ;;  %v1700_v22 = vld [vmem:[%s2257_s3 + $0xc4] ss:$16 sps:$4 sm:$0xff]   ;;  %v1707_v23 = vld [vmem:[%s2257_s3 + $0x88] ss:$16 sps:$4 sm:$0xff]   ;;  %v1713_v24 = vld [vmem:[%s2257_s3 + $0xac] ss:$16 sps:$4 sm:$0xff]  }
   0x9   :  { %v1719_v25 = vld [vmem:[%s2257_s3 + $0xc0] ss:$16 sps:$4 sm:$0xff]   ;;  %v1725_v26 = vld [vmem:[%s2257_s3 + $0xe4] ss:$16 sps:$4 sm:$0xff]   ;;  %v1731_v27 = vld [vmem:[%s2257_s3 + $0xa8] ss:$16 sps:$4 sm:$0xff]  }
   0xa   :  { %v1737_v28 = vld [vmem:[%s2257_s3 + $0xcc] ss:$16 sps:$4 sm:$0xff]   ;;  %v1743_v29 = vld [vmem:[%s2257_s3 + $0xe0] ss:$16 sps:$4 sm:$0xff]   ;;  %v1750_v30 = vld [vmem:[%s2257_s3 + $0xc8] ss:$16 sps:$4 sm:$0xff]  }
   0xb   :  { %248 = vmatpush1.bf16.msra.mxu0 %v1617_v8  ;;  %289 = vmatpush1.bf16.msra.mxu1 %v1659_v15  ;;  %v1756_v31 = vld [vmem:[%s2257_s3 + $0xec] ss:$16 sps:$4 sm:$0xff]   ;;  %v1763_v32 = vld [vmem:[%s2257_s3 + $0xe8] ss:$16 sps:$4 sm:$0xff]   ;;  %v1805_v34 = vshrl.u32 %v59_v33, 7  ;;  %v52_v42 = vld [vmem:[%s2259_s0] sm:$0xff] }
   0xc   :  { %249 = vmatprep.subr.bf16.mxu0 %v1624_v9  ;;  %290 = vmatprep.subr.bf16.mxu1 %v1665_v16  ;;  %v51_v37 = vld [vmem:[%s2258_s2 + $0x4] sm:$0xf]  ;;  %v50_v41 = vld [vmem:[%s2258_s2] sm:$0xf]  ;;  %v54_v44 = vunpack.c.l.bf16 %v52_v42  ;;  %v55_v46 = vunpack.c.h.bf16 %v52_v42  ;;  %v53_v48 = vld [vmem:[%s2259_s0 + $0x8] sm:$0xff] }
   0xd   :  { %v69_v35 = vsub.s32 2, %v1805_v34  ;;  %v73_v36 = vsub.s32 3, %v1805_v34  ;;  %v2262_v40 = vsub.s32 0, %v1805_v34  ;;  %v65_v43 = vsub.s32 1, %v1805_v34 }
   0xe   :  { %v57_v51 = vunpack.c.h.bf16 %v53_v48  ;;  %v56_v62 = vunpack.c.l.bf16 %v53_v48 }
   0xf   :  { %250 = vmatpush1.bf16.msra.mxu0 %v1642_v12  ;;  %291 = vmatpush1.bf16.msra.mxu1 %v1683_v19  ;;  %v1812_v38 = vrot.slane %v51_v37, %v69_v35  ;;  %v1814_v39 = vrot.slane %v51_v37, %v73_v36  ;;  %v1826_v45 = vrot.slane %v50_v41, %v2262_v40 }
  0x10   :  { %251 = vmatprep.subr.bf16.mxu0 %v1647_v13  ;;  %292 = vmatprep.subr.bf16.mxu1 %v1689_v20  ;;  %v1828_v47 = vrot.slane %v50_v41, %v65_v43  ;;  %v1835_v52 = vrot.slane %v50_v41, %v73_v36  ;;  %v1838_v63 = vrot.slane %v50_v41, %v69_v35 }
  0x11   :  { %v79_v49 = vadd.f32 %v1826_v45, %v54_v44 }
  0x12   :  { %v80_v50 = vadd.f32 %v1828_v47, %v55_v46  ;;  %v82_v60 = vadd.f32 %v1835_v52, %v57_v51  ;;  %v81_v43 = vadd.f32 %v1838_v63, %v56_v62 }
  0x13   :  { %252 = vmatpush1.bf16.msra.mxu0 %v1671_v17  ;;  %293 = vmatpush1.bf16.msra.mxu1 %v1707_v23 }
  0x14   :  { %253 = vmatprep.subr.bf16.mxu0 %v1677_v18  ;;  %294 = vmatprep.subr.bf16.mxu1 %v1713_v24 }
  0x17   :  { %254 = vmatpush1.bf16.msra.mxu0 %v1695_v21  ;;  %295 = vmatpush1.bf16.msra.mxu1 %v1731_v27 }
  0x18   :  { %255 = vmatprep.subr.bf16.mxu0 %v1700_v22  ;;  %296 = vmatprep.subr.bf16.mxu1 %v1737_v28 }
  0x1b   :  { %256 = vmatpush1.bf16.msra.mxu0 %v1719_v25  ;;  %297 = vmatpush1.bf16.msra.mxu1 %v1750_v30 }
  0x1c   :  { %257 = vmatprep.subr.bf16.mxu0 %v1725_v26  ;;  %298 = vmatprep.subr.bf16.mxu1 %v1756_v31 }
  0x1f   :  { %258 = vmatpush1.bf16.msra.mxu0 %v1743_v29  ;;  %299 = vmatpush1.bf16.msra.mxu1 %v1763_v32 }
  0x20   :  { %365 = vmatprep.subr.bf16.mxu0 %v1576_v0  ;;  %406 = vmatprep.subr.bf16.mxu1 %v1606_v6 }
  0x22   :  { %276 = vmatmul.mubr.bf16.vlgmr.msra.gmra.mrb[0].mxu0 %v1547_v1  ;;  %317 = vmatmul.mubr.bf16.vlgmr.msra.gmra.mrb[0].mxu1 %v1547_v1 }
  0x23   :  { %366 = vmatpush1.bf16.msra.mxu0 %v1583_v2  ;;  %397 = vmatprep.mubr.bf16.mxu0 %v1547_v1 }
  0x24   :  { %367 = vmatprep.subr.bf16.mxu0 %v1589_v3  ;;  %407 = vmatpush1.bf16.msra.mxu1 %v1611_v7 }
  0x25   :  { %408 = vmatprep.subr.bf16.mxu1 %v1630_v10  ;;  %438 = vmatprep.mubr.bf16.mxu1 %v1547_v1 }
  0x27   :  { %368 = vmatpush1.bf16.msra.mxu0 %v1595_v4 }
  0x28   :  { %369 = vmatprep.subr.bf16.mxu0 %v1601_v5  ;;  %409 = vmatpush1.bf16.msra.mxu1 %v1635_v11 }
  0x29   :  { %410 = vmatprep.subr.bf16.mxu1 %v1652_v14 }
  0x2b   :  { %370 = vmatpush1.bf16.msra.mxu0 %v1617_v8 }
  0x2c   :  { %371 = vmatprep.subr.bf16.mxu0 %v1624_v9  ;;  %411 = vmatpush1.bf16.msra.mxu1 %v1659_v15 }
  0x2d   :  { %412 = vmatprep.subr.bf16.mxu1 %v1665_v16 }
  0x2f   :  { %372 = vmatpush1.bf16.msra.mxu0 %v1642_v12 }
  0x30   :  { %373 = vmatprep.subr.bf16.mxu0 %v1647_v13  ;;  %413 = vmatpush1.bf16.msra.mxu1 %v1683_v19 }
  0x31   :  { %414 = vmatprep.subr.bf16.mxu1 %v1689_v20 }
  0x33   :  { %374 = vmatpush1.bf16.msra.mxu0 %v1671_v17 }
  0x34   :  { %375 = vmatprep.subr.bf16.mxu0 %v1677_v18  ;;  %415 = vmatpush1.bf16.msra.mxu1 %v1707_v23 }
  0x35   :  { %416 = vmatprep.subr.bf16.mxu1 %v1713_v24 }
  0x37   :  { %376 = vmatpush1.bf16.msra.mxu0 %v1695_v21 }
  0x38   :  { %377 = vmatprep.subr.bf16.mxu0 %v1700_v22  ;;  %417 = vmatpush1.bf16.msra.mxu1 %v1731_v27 }
  0x39   :  { %418 = vmatprep.subr.bf16.mxu1 %v1737_v28 }
  0x3b   :  { %378 = vmatpush1.bf16.msra.mxu0 %v1719_v25 }
  0x3c   :  { %379 = vmatprep.subr.bf16.mxu0 %v1725_v26  ;;  %419 = vmatpush1.bf16.msra.mxu1 %v1750_v30 }
  0x3d   :  { %420 = vmatprep.subr.bf16.mxu1 %v1756_v31 }
  0x3f   :  { %380 = vmatpush1.bf16.msra.mxu0 %v1743_v29 }
  0x40   :  { %487 = vmatprep.subr.bf16.mxu0 %v1576_v0  ;;  %421 = vmatpush1.bf16.msra.mxu1 %v1763_v32 }
  0x41   :  { %528 = vmatprep.subr.bf16.mxu1 %v1606_v6 }
  0xf5   :  { %v277_v53 = vpop.f32.mrb[0].mxu0  ;;  %v318_v33 = vpop.f32.mrb[0].mxu1 }
  0xf6   :  { %v325_v54 = vadd.f32 %v277_v53, %v79_v49  ;;  %v279_v55 = vpop.f32.mrb[1].mxu0  ;;  %v320_v37 = vpop.f32.mrb[1].mxu1  ;;  %v327_v49 = vadd.f32 %v318_v33, %v81_v43 }
  0xf7   :  { %v326_v56 = vadd.f32 %v279_v55, %v80_v50  ;;  %v281_v57 = vpop.f32.mrb[2].mxu0  ;;  %v328_v42 = vadd.f32 %v320_v37, %v82_v60  ;;  %v322_v36 = vpop.f32.mrb[2].mxu1  ;;  %v1288_v37 = vld [vmem:[%s2259_s0 + $0x10] sm:$0xff] }
  0xf8   :  { %v1285_v58 = vmul.f32 -1.442695, %v325_v54  ;;  %v282_v59 = vpop.f32.mrb[3].mxu0  ;;  %v323_v44 = vpop.f32.mrb[3].mxu1  ;;  %v357_v36 = vunpack.c.h.bf16 %v1288_v37 }
  0xf9   :  { %v1286_v61 = vmul.f32 -1.442695, %v326_v56  ;;  %v1287_v46 = vmul.f32 -1.442695, %v328_v42  ;;  %v356_v42 = vunpack.c.l.bf16 %v1288_v37  ;;  %v1289_v44 = vld [vmem:[%s2259_s0 + $0x18] sm:$0xff] }
  0xfa   :  { %1374 = vpow2.f32 %v1285_v58 }
  0xfb   :  { %1376 = vpow2.f32 %v1286_v61  ;;  %v360_v43 = vadd.f32 %v356_v42, %v1826_v45 }
  0xfc   :  { %1378 = vpow2.f32 %v1287_v46  ;;  %v361_v46 = vadd.f32 %v357_v36, %v1828_v47 }
  0xfd   :  { %1380 = vtanh.f32 %v327_v49 }
 0x104   :  { %v1375_v50 = vpop.eup %1374 }
 0x105   :  { %v1377_v53 = vpop.eup %1376  ;;  %v332_v54 = vadd.f32 1.0, %v1375_v50 }
 0x106   :  { %v338_v51 = vadd.f32 1.0, %v1377_v53  ;;  %v1379_v35 = vpop.eup %1378  ;;  %v359_v53 = vunpack.c.h.bf16 %v1289_v44 }
 0x107   :  { %1382 = vrcp.f32 %v332_v54  ;;  %v1381_v41 = vpop.eup %1380  ;;  %v345_v55 = vadd.f32 1.0, %v1379_v35 }
 0x108   :  { %1384 = vrcp.f32 %v338_v51 }
 0x109   :  { %1386 = vrcp.f32 %v345_v55 }
 0x111   :  { %v1383_v48 = vpop.eup %1382 }
 0x112   :  { %v1385_v56 = vpop.eup %1384  ;;  %v349_v57 = vmul.f32 %v1383_v48, %v1381_v41 }
 0x113   :  { %v348_v58 = vmul.f32 0.0, %v1385_v56  ;;  %v1387_v60 = vpop.eup %1386 }
 0x115   :  { %v1841_v59 = vadd.f32 %v349_v57, %v348_v58 }
 0x117   :  { %1388 = vtanh.f32 %v1841_v59 }
 0x121   :  { %v1389_v61 = vpop.eup %1388 }
 0x122   :  { %v352_v62 = vmul.f32 %v1389_v61, %v1387_v60  ;;  %v363_v61 = vadd.f32 %v359_v53, %v1835_v52 }
 0x124   :  { %v364_v33 = vpack.c.bf16 %v352_v62, %v352_v62  ;;  %v358_v62 = vunpack.c.l.bf16 %v1289_v44 }
 0x126   :  { %398 = vmatmul.mubr.bf16.vlgmr.msra.gmra.mrb[4].mxu0 %v364_v33  ;;  %439 = vmatmul.mubr.bf16.vlgmr.msra.gmra.mrb[4].mxu1 %v364_v33  ;;  %v362_v37 = vadd.f32 %v358_v62, %v1838_v63  ;;  %v1294_v62 = vld [vmem:[%s2259_s0 + $0x28] sm:$0xff] }
 0x127   :  { %488 = vmatpush1.bf16.msra.mxu0 %v1583_v2  ;;  %529 = vmatpush1.bf16.msra.mxu1 %v1611_v7 }
 0x128   :  { %489 = vmatprep.subr.bf16.mxu0 %v1589_v3  ;;  %530 = vmatprep.subr.bf16.mxu1 %v1630_v10 }
 0x129   :  { %519 = vmatprep.mubr.bf16.mxu0 %v1547_v1  ;;  %560 = vmatprep.mubr.bf16.mxu1 %v1547_v1 }
 0x12b   :  { %490 = vmatpush1.bf16.msra.mxu0 %v1595_v4  ;;  %531 = vmatpush1.bf16.msra.mxu1 %v1635_v11 }
 0x12c   :  { %491 = vmatprep.subr.bf16.mxu0 %v1601_v5  ;;  %532 = vmatprep.subr.bf16.mxu1 %v1652_v14 }
 0x12f   :  { %492 = vmatpush1.bf16.msra.mxu0 %v1617_v8  ;;  %533 = vmatpush1.bf16.msra.mxu1 %v1659_v15 }
 0x130   :  { %493 = vmatprep.subr.bf16.mxu0 %v1624_v9  ;;  %534 = vmatprep.subr.bf16.mxu1 %v1665_v16 }
 0x133   :  { %494 = vmatpush1.bf16.msra.mxu0 %v1642_v12  ;;  %535 = vmatpush1.bf16.msra.mxu1 %v1683_v19 }
 0x134   :  { %495 = vmatprep.subr.bf16.mxu0 %v1647_v13  ;;  %536 = vmatprep.subr.bf16.mxu1 %v1689_v20 }
 0x137   :  { %496 = vmatpush1.bf16.msra.mxu0 %v1671_v17  ;;  %537 = vmatpush1.bf16.msra.mxu1 %v1707_v23 }
 0x138   :  { %497 = vmatprep.subr.bf16.mxu0 %v1677_v18  ;;  %538 = vmatprep.subr.bf16.mxu1 %v1713_v24 }
 0x13b   :  { %498 = vmatpush1.bf16.msra.mxu0 %v1695_v21  ;;  %539 = vmatpush1.bf16.msra.mxu1 %v1731_v27 }
 0x13c   :  { %499 = vmatprep.subr.bf16.mxu0 %v1700_v22  ;;  %540 = vmatprep.subr.bf16.mxu1 %v1737_v28 }
 0x13f   :  { %500 = vmatpush1.bf16.msra.mxu0 %v1719_v25  ;;  %541 = vmatpush1.bf16.msra.mxu1 %v1750_v30 }
 0x140   :  { %501 = vmatprep.subr.bf16.mxu0 %v1725_v26  ;;  %542 = vmatprep.subr.bf16.mxu1 %v1756_v31 }
 0x143   :  { %502 = vmatpush1.bf16.msra.mxu0 %v1743_v29  ;;  %543 = vmatpush1.bf16.msra.mxu1 %v1763_v32 }
 0x144   :  { %609 = vmatprep.subr.bf16.mxu0 %v1576_v0  ;;  %650 = vmatprep.subr.bf16.mxu1 %v1606_v6 }
 0x1f9   :  { %v399_v49 = vpop.f32.mrb[4].mxu0  ;;  %v440_v50 = vpop.f32.mrb[4].mxu1 }
 0x1fa   :  { %v447_v54 = vadd.f32 %v399_v49, %v360_v43  ;;  %v401_v51 = vpop.f32.mrb[5].mxu0  ;;  %v442_v35 = vpop.f32.mrb[5].mxu1  ;;  %v449_v36 = vadd.f32 %v440_v50, %v362_v37 }
 0x1fb   :  { %v448_v41 = vadd.f32 %v401_v51, %v361_v46  ;;  %v403_v48 = vpop.f32.mrb[6].mxu0  ;;  %v444_v55 = vpop.f32.mrb[6].mxu1  ;;  %v450_v33 = vadd.f32 %v442_v35, %v363_v61 }
 0x1fc   :  { %v1290_v56 = vmul.f32 -1.442695, %v447_v54  ;;  %v404_v57 = vpop.f32.mrb[7].mxu0  ;;  %v445_v58 = vpop.f32.mrb[7].mxu1 }
 0x1fd   :  { %v1291_v60 = vmul.f32 -1.442695, %v448_v41  ;;  %v1292_v42 = vmul.f32 -1.442695, %v450_v33 }
 0x1fe   :  { %1390 = vpow2.f32 %v1290_v56 }
 0x1ff   :  { %1392 = vpow2.f32 %v1291_v60 }
 0x200   :  { %1394 = vpow2.f32 %v1292_v42 }
 0x201   :  { %1396 = vtanh.f32 %v449_v36  ;;  %v481_v36 = vunpack.c.h.bf16 %v1294_v62 }
 0x208   :  { %v1391_v43 = vpop.eup %1390 }
 0x209   :  { %v1393_v49 = vpop.eup %1392  ;;  %v454_v40 = vadd.f32 1.0, %v1391_v43 }
 0x20a   :  { %v460_v46 = vadd.f32 1.0, %v1393_v49  ;;  %v1395_v54 = vpop.eup %1394 }
 0x20b   :  { %1398 = vrcp.f32 %v454_v40  ;;  %v1397_v51 = vpop.eup %1396  ;;  %v467_v44 = vadd.f32 1.0, %v1395_v54  ;;  %v1293_v40 = vld [vmem:[%s2259_s0 + $0x20] sm:$0xff] }
 0x20c   :  { %1400 = vrcp.f32 %v460_v46  ;;  %v479_v60 = vunpack.c.h.bf16 %v1293_v40 }
 0x20d   :  { %1402 = vrcp.f32 %v467_v44 }
 0x20e   :  { %v483_v33 = vadd.f32 %v479_v60, %v1828_v47 }
 0x215   :  { %v1399_v41 = vpop.eup %1398 }
 0x216   :  { %v1401_v53 = vpop.eup %1400  ;;  %v471_v48 = vmul.f32 %v1399_v41, %v1397_v51 }
 0x217   :  { %v470_v35 = vmul.f32 %v1401_v53, %v1841_v59  ;;  %v1403_v50 = vpop.eup %1402  ;;  %v478_v59 = vunpack.c.l.bf16 %v1293_v40 }
 0x219   :  { %v1889_v55 = vadd.f32 %v471_v48, %v470_v35  ;;  %v482_v61 = vadd.f32 %v478_v59, %v1826_v45 }
 0x21b   :  { %1404 = vtanh.f32 %v1889_v55 }
 0x225   :  { %v1405_v56 = vpop.eup %1404 }
 0x226   :  { %v474_v57 = vmul.f32 %v1405_v56, %v1403_v50  ;;  %v485_v50 = vadd.f32 %v481_v36, %v1835_v52  ;;  %v480_v56 = vunpack.c.l.bf16 %v1294_v62 }
 0x228   :  { %v486_v58 = vpack.c.bf16 %v474_v57, %v474_v57 }
 0x22a   :  { %520 = vmatmul.mubr.bf16.vlgmr.msra.gmra.mrb[8].mxu0 %v486_v58  ;;  %561 = vmatmul.mubr.bf16.vlgmr.msra.gmra.mrb[8].mxu1 %v486_v58  ;;  %v484_v58 = vadd.f32 %v480_v56, %v1838_v63 }
 0x22b   :  { %610 = vmatpush1.bf16.msra.mxu0 %v1583_v2  ;;  %651 = vmatpush1.bf16.msra.mxu1 %v1611_v7 }
 0x22c   :  { %611 = vmatprep.subr.bf16.mxu0 %v1589_v3  ;;  %652 = vmatprep.subr.bf16.mxu1 %v1630_v10 }
 0x22d   :  { %641 = vmatprep.mubr.bf16.mxu0 %v1547_v1  ;;  %682 = vmatprep.mubr.bf16.mxu1 %v1547_v1 }
 0x22f   :  { %612 = vmatpush1.bf16.msra.mxu0 %v1595_v4  ;;  %653 = vmatpush1.bf16.msra.mxu1 %v1635_v11 }
 0x230   :  { %613 = vmatprep.subr.bf16.mxu0 %v1601_v5  ;;  %654 = vmatprep.subr.bf16.mxu1 %v1652_v14 }
 0x233   :  { %614 = vmatpush1.bf16.msra.mxu0 %v1617_v8  ;;  %655 = vmatpush1.bf16.msra.mxu1 %v1659_v15 }
 0x234   :  { %615 = vmatprep.subr.bf16.mxu0 %v1624_v9  ;;  %656 = vmatprep.subr.bf16.mxu1 %v1665_v16 }
 0x237   :  { %616 = vmatpush1.bf16.msra.mxu0 %v1642_v12  ;;  %657 = vmatpush1.bf16.msra.mxu1 %v1683_v19 }
 0x238   :  { %617 = vmatprep.subr.bf16.mxu0 %v1647_v13  ;;  %658 = vmatprep.subr.bf16.mxu1 %v1689_v20 }
 0x23b   :  { %618 = vmatpush1.bf16.msra.mxu0 %v1671_v17  ;;  %659 = vmatpush1.bf16.msra.mxu1 %v1707_v23 }
 0x23c   :  { %619 = vmatprep.subr.bf16.mxu0 %v1677_v18  ;;  %660 = vmatprep.subr.bf16.mxu1 %v1713_v24 }
 0x23f   :  { %620 = vmatpush1.bf16.msra.mxu0 %v1695_v21  ;;  %661 = vmatpush1.bf16.msra.mxu1 %v1731_v27 }
 0x240   :  { %621 = vmatprep.subr.bf16.mxu0 %v1700_v22  ;;  %662 = vmatprep.subr.bf16.mxu1 %v1737_v28 }
 0x243   :  { %622 = vmatpush1.bf16.msra.mxu0 %v1719_v25  ;;  %663 = vmatpush1.bf16.msra.mxu1 %v1750_v30 }
 0x244   :  { %623 = vmatprep.subr.bf16.mxu0 %v1725_v26  ;;  %664 = vmatprep.subr.bf16.mxu1 %v1756_v31 }
 0x247   :  { %624 = vmatpush1.bf16.msra.mxu0 %v1743_v29  ;;  %665 = vmatpush1.bf16.msra.mxu1 %v1763_v32 }
 0x248   :  { %731 = vmatprep.subr.bf16.mxu0 %v1576_v0  ;;  %772 = vmatprep.subr.bf16.mxu1 %v1606_v6 }
 0x2fd   :  { %v521_v37 = vpop.f32.mrb[8].mxu0  ;;  %v562_v42 = vpop.f32.mrb[8].mxu1 }
 0x2fe   :  { %v569_v43 = vadd.f32 %v521_v37, %v482_v61  ;;  %v523_v49 = vpop.f32.mrb[9].mxu0  ;;  %v564_v46 = vpop.f32.mrb[9].mxu1  ;;  %v571_v59 = vadd.f32 %v562_v42, %v484_v58 }
 0x2ff   :  { %v570_v54 = vadd.f32 %v523_v49, %v483_v33  ;;  %v525_v51 = vpop.f32.mrb[10].mxu0  ;;  %v566_v41 = vpop.f32.mrb[10].mxu1  ;;  %v572_v57 = vadd.f32 %v564_v46, %v485_v50 }
 0x300   :  { %v1295_v53 = vmul.f32 -1.442695, %v569_v43  ;;  %v526_v48 = vpop.f32.mrb[11].mxu0  ;;  %v567_v44 = vpop.f32.mrb[11].mxu1 }
 0x301   :  { %v1296_v35 = vmul.f32 -1.442695, %v570_v54  ;;  %v1297_v40 = vmul.f32 -1.442695, %v572_v57  ;;  %v1299_v57 = vld [vmem:[%s2259_s0 + $0x38] sm:$0xff] }
 0x302   :  { %1406 = vpow2.f32 %v1295_v53 }
 0x303   :  { %1408 = vpow2.f32 %v1296_v35 }
 0x304   :  { %1410 = vpow2.f32 %v1297_v40 }
 0x305   :  { %1412 = vtanh.f32 %v571_v59 }
 0x30c   :  { %v1407_v60 = vpop.eup %1406 }
 0x30d   :  { %v1409_v61 = vpop.eup %1408  ;;  %v576_v37 = vadd.f32 1.0, %v1407_v60  ;;  %v603_v60 = vunpack.c.h.bf16 %v1299_v57 }
 0x30e   :  { %v582_v33 = vadd.f32 1.0, %v1409_v61  ;;  %v1411_v43 = vpop.eup %1410 }
 0x30f   :  { %1414 = vrcp.f32 %v576_v37  ;;  %v1413_v49 = vpop.eup %1412  ;;  %v589_v62 = vadd.f32 1.0, %v1411_v43 }
 0x310   :  { %1416 = vrcp.f32 %v582_v33 }
 0x311   :  { %1418 = vrcp.f32 %v589_v62 }
 0x319   :  { %v1415_v54 = vpop.eup %1414 }
 0x31a   :  { %v1417_v36 = vpop.eup %1416  ;;  %v593_v51 = vmul.f32 %v1415_v54, %v1413_v49 }
 0x31b   :  { %v592_v46 = vmul.f32 %v1417_v36, %v1889_v55  ;;  %v1419_v42 = vpop.eup %1418  ;;  %v1298_v55 = vld [vmem:[%s2259_s0 + $0x30] sm:$0xff] }
 0x31c   :  { %v600_v35 = vunpack.c.l.bf16 %v1298_v55  ;;  %v601_v50 = vunpack.c.h.bf16 %v1298_v55 }
 0x31d   :  { %v1937_v41 = vadd.f32 %v593_v51, %v592_v46 }
 0x31e   :  { %v604_v56 = vadd.f32 %v600_v35, %v1826_v45  ;;  %v605_v58 = vadd.f32 %v601_v50, %v1828_v47 }
 0x31f   :  { %1420 = vtanh.f32 %v1937_v41 }
 0x329   :  { %v1421_v53 = vpop.eup %1420 }
 0x32a   :  { %v596_v48 = vmul.f32 %v1421_v53, %v1419_v42  ;;  %v607_v42 = vadd.f32 %v603_v60, %v1835_v52  ;;  %v602_v53 = vunpack.c.l.bf16 %v1299_v57 }
 0x32c   :  { %v608_v44 = vpack.c.bf16 %v596_v48, %v596_v48 }
 0x32e   :  { %642 = vmatmul.mubr.bf16.vlgmr.msra.gmra.mrb[12].mxu0 %v608_v44  ;;  %683 = vmatmul.mubr.bf16.vlgmr.msra.gmra.mrb[12].mxu1 %v608_v44  ;;  %v606_v44 = vadd.f32 %v602_v53, %v1838_v63 }
 0x32f   :  { %732 = vmatpush1.bf16.msra.mxu0 %v1583_v2  ;;  %773 = vmatpush1.bf16.msra.mxu1 %v1611_v7 }
 0x330   :  { %733 = vmatprep.subr.bf16.mxu0 %v1589_v3  ;;  %774 = vmatprep.subr.bf16.mxu1 %v1630_v10 }
 0x331   :  { %763 = vmatprep.mubr.bf16.mxu0 %v1547_v1  ;;  %804 = vmatprep.mubr.bf16.mxu1 %v1547_v1 }
 0x333   :  { %734 = vmatpush1.bf16.msra.mxu0 %v1595_v4  ;;  %775 = vmatpush1.bf16.msra.mxu1 %v1635_v11 }
 0x334   :  { %735 = vmatprep.subr.bf16.mxu0 %v1601_v5  ;;  %776 = vmatprep.subr.bf16.mxu1 %v1652_v14 }
 0x337   :  { %736 = vmatpush1.bf16.msra.mxu0 %v1617_v8  ;;  %777 = vmatpush1.bf16.msra.mxu1 %v1659_v15 }
 0x338   :  { %737 = vmatprep.subr.bf16.mxu0 %v1624_v9  ;;  %778 = vmatprep.subr.bf16.mxu1 %v1665_v16 }
 0x33b   :  { %738 = vmatpush1.bf16.msra.mxu0 %v1642_v12  ;;  %779 = vmatpush1.bf16.msra.mxu1 %v1683_v19 }
 0x33c   :  { %739 = vmatprep.subr.bf16.mxu0 %v1647_v13  ;;  %780 = vmatprep.subr.bf16.mxu1 %v1689_v20 }
 0x33f   :  { %740 = vmatpush1.bf16.msra.mxu0 %v1671_v17  ;;  %781 = vmatpush1.bf16.msra.mxu1 %v1707_v23 }
 0x340   :  { %741 = vmatprep.subr.bf16.mxu0 %v1677_v18  ;;  %782 = vmatprep.subr.bf16.mxu1 %v1713_v24 }
 0x343   :  { %742 = vmatpush1.bf16.msra.mxu0 %v1695_v21  ;;  %783 = vmatpush1.bf16.msra.mxu1 %v1731_v27 }
 0x344   :  { %743 = vmatprep.subr.bf16.mxu0 %v1700_v22  ;;  %784 = vmatprep.subr.bf16.mxu1 %v1737_v28 }
 0x347   :  { %744 = vmatpush1.bf16.msra.mxu0 %v1719_v25  ;;  %785 = vmatpush1.bf16.msra.mxu1 %v1750_v30 }
 0x348   :  { %745 = vmatprep.subr.bf16.mxu0 %v1725_v26  ;;  %786 = vmatprep.subr.bf16.mxu1 %v1756_v31 }
 0x34b   :  { %746 = vmatpush1.bf16.msra.mxu0 %v1743_v29  ;;  %787 = vmatpush1.bf16.msra.mxu1 %v1763_v32 }
 0x34c   :  { %853 = vmatprep.subr.bf16.mxu0 %v1576_v0  ;;  %894 = vmatprep.subr.bf16.mxu1 %v1606_v6 }
 0x401   :  { %v643_v40 = vpop.f32.mrb[12].mxu0  ;;  %v684_v59 = vpop.f32.mrb[12].mxu1 }
 0x402   :  { %v691_v61 = vadd.f32 %v643_v40, %v604_v56  ;;  %v645_v37 = vpop.f32.mrb[13].mxu0  ;;  %v686_v33 = vpop.f32.mrb[13].mxu1  ;;  %v693_v35 = vadd.f32 %v684_v59, %v606_v44 }
 0x403   :  { %v692_v43 = vadd.f32 %v645_v37, %v605_v58  ;;  %v647_v49 = vpop.f32.mrb[14].mxu0  ;;  %v688_v54 = vpop.f32.mrb[14].mxu1  ;;  %v694_v48 = vadd.f32 %v686_v33, %v607_v42 }
 0x404   :  { %v1300_v36 = vmul.f32 -1.442695, %v691_v61  ;;  %v648_v51 = vpop.f32.mrb[15].mxu0  ;;  %v689_v62 = vpop.f32.mrb[15].mxu1 }
 0x405   :  { %v1301_v46 = vmul.f32 -1.442695, %v692_v43  ;;  %v1302_v55 = vmul.f32 -1.442695, %v694_v48 }
 0x406   :  { %1422 = vpow2.f32 %v1300_v36 }
 0x407   :  { %1424 = vpow2.f32 %v1301_v46 }
 0x408   :  { %1426 = vpow2.f32 %v1302_v55 }
 0x409   :  { %1428 = vtanh.f32 %v693_v35 }
 0x410   :  { %v1423_v50 = vpop.eup %1422 }
 0x411   :  { %v1425_v56 = vpop.eup %1424  ;;  %v698_v40 = vadd.f32 1.0, %v1423_v50 }
 0x412   :  { %v704_v58 = vadd.f32 1.0, %v1425_v56  ;;  %v1427_v61 = vpop.eup %1426 }
 0x413   :  { %1430 = vrcp.f32 %v698_v40  ;;  %v1429_v37 = vpop.eup %1428  ;;  %v711_v57 = vadd.f32 1.0, %v1427_v61 }
 0x414   :  { %1432 = vrcp.f32 %v704_v58 }
 0x415   :  { %1434 = vrcp.f32 %v711_v57 }
 0x41d   :  { %v1431_v43 = vpop.eup %1430 }
 0x41e   :  { %v1433_v60 = vpop.eup %1432  ;;  %v715_v49 = vmul.f32 %v1431_v43, %v1429_v37 }
 0x41f   :  { %v714_v33 = vmul.f32 %v1433_v60, %v1937_v41  ;;  %v1435_v59 = vpop.eup %1434 }
 0x421   :  { %v1985_v54 = vadd.f32 %v715_v49, %v714_v33 }
 0x423   :  { %1436 = vtanh.f32 %v1985_v54 }
 0x42d   :  { %v1437_v36 = vpop.eup %1436 }
 0x42e   :  { %v718_v51 = vmul.f32 %v1437_v36, %v1435_v59 }
 0x430   :  { %v730_v62 = vpack.c.bf16 %v718_v51, %v718_v51 }
 0x432   :  { %764 = vmatmul.mubr.bf16.vlgmr.msra.gmra.mrb[16].mxu0 %v730_v62  ;;  %805 = vmatmul.mubr.bf16.vlgmr.msra.gmra.mrb[16].mxu1 %v730_v62 }
 0x433   :  { %854 = vmatpush1.bf16.msra.mxu0 %v1583_v2  ;;  %895 = vmatpush1.bf16.msra.mxu1 %v1611_v7  ;;  %v1303_v2 = vld [vmem:[%s2259_s0 + $0x40] sm:$0xff]  ;;  %v1304_v7 = vld [vmem:[%s2259_s0 + $0x48] sm:$0xff] }
 0x434   :  { %855 = vmatprep.subr.bf16.mxu0 %v1589_v3  ;;  %896 = vmatprep.subr.bf16.mxu1 %v1630_v10  ;;  %v722_v3 = vunpack.c.l.bf16 %v1303_v2  ;;  %v724_v35 = vunpack.c.l.bf16 %v1304_v7 }
 0x435   :  { %885 = vmatprep.mubr.bf16.mxu0 %v1547_v1  ;;  %926 = vmatprep.mubr.bf16.mxu1 %v1547_v1 }
 0x436   :  { %v728_v56 = vadd.f32 %v724_v35, %v1838_v63 }
 0x437   :  { %856 = vmatpush1.bf16.msra.mxu0 %v1595_v4  ;;  %897 = vmatpush1.bf16.msra.mxu1 %v1635_v11  ;;  %v723_v4 = vunpack.c.h.bf16 %v1303_v2  ;;  %v725_v11 = vunpack.c.h.bf16 %v1304_v7 }
 0x438   :  { %857 = vmatprep.subr.bf16.mxu0 %v1601_v5  ;;  %898 = vmatprep.subr.bf16.mxu1 %v1652_v14  ;;  %v726_v5 = vadd.f32 %v722_v3, %v1826_v45 }
 0x439   :  { %v729_v55 = vadd.f32 %v725_v11, %v1835_v52  ;;  %v2065_v11 = vld [vmem:[%s2257_s3 + $0x20] ss:$16 sps:$4 sm:$0xff]  }
 0x43b   :  { %858 = vmatpush1.bf16.msra.mxu0 %v1617_v8  ;;  %899 = vmatpush1.bf16.msra.mxu1 %v1659_v15  ;;  %v727_v8 = vadd.f32 %v723_v4, %v1828_v47 }
 0x43c   :  { %859 = vmatprep.subr.bf16.mxu0 %v1624_v9  ;;  %900 = vmatprep.subr.bf16.mxu1 %v1665_v16 }
 0x43f   :  { %860 = vmatpush1.bf16.msra.mxu0 %v1642_v12  ;;  %901 = vmatpush1.bf16.msra.mxu1 %v1683_v19 }
 0x440   :  { %861 = vmatprep.subr.bf16.mxu0 %v1647_v13  ;;  %902 = vmatprep.subr.bf16.mxu1 %v1689_v20 }
 0x443   :  { %862 = vmatpush1.bf16.msra.mxu0 %v1671_v17  ;;  %903 = vmatpush1.bf16.msra.mxu1 %v1707_v23 }
 0x444   :  { %863 = vmatprep.subr.bf16.mxu0 %v1677_v18  ;;  %904 = vmatprep.subr.bf16.mxu1 %v1713_v24 }
 0x447   :  { %864 = vmatpush1.bf16.msra.mxu0 %v1695_v21  ;;  %905 = vmatpush1.bf16.msra.mxu1 %v1731_v27 }
 0x448   :  { %865 = vmatprep.subr.bf16.mxu0 %v1700_v22  ;;  %906 = vmatprep.subr.bf16.mxu1 %v1737_v28 }
 0x44b   :  { %866 = vmatpush1.bf16.msra.mxu0 %v1719_v25  ;;  %907 = vmatpush1.bf16.msra.mxu1 %v1750_v30 }
 0x44c   :  { %867 = vmatprep.subr.bf16.mxu0 %v1725_v26  ;;  %908 = vmatprep.subr.bf16.mxu1 %v1756_v31 }
 0x44f   :  { %868 = vmatpush1.bf16.msra.mxu0 %v1743_v29  ;;  %909 = vmatpush1.bf16.msra.mxu1 %v1763_v32 }
 0x450   :  { %975 = vmatprep.subr.bf16.mxu0 %v1576_v0  ;;  %1016 = vmatprep.subr.bf16.mxu1 %v1606_v6 }
 0x505   :  { %v765_v9 = vpop.f32.mrb[16].mxu0  ;;  %v806_v10 = vpop.f32.mrb[16].mxu1 }
 0x506   :  { %v813_v0 = vadd.f32 %v765_v9, %v726_v5  ;;  %v767_v12 = vpop.f32.mrb[17].mxu0  ;;  %v808_v6 = vpop.f32.mrb[17].mxu1  ;;  %v815_v58 = vadd.f32 %v806_v10, %v728_v56  ;;  %v2051_v9 = vld [vmem:[%s2257_s3 + $0x24] ss:$16 sps:$4 sm:$0xff]   ;;  %v2057_v10 = vld [vmem:[%s2257_s3 + $0x2c] ss:$16 sps:$4 sm:$0xff]  }
 0x507   :  { %v814_v13 = vadd.f32 %v767_v12, %v727_v8  ;;  %v769_v41 = vpop.f32.mrb[18].mxu0  ;;  %v810_v46 = vpop.f32.mrb[18].mxu1  ;;  %v816_v50 = vadd.f32 %v808_v6, %v729_v55  ;;  %v2039_v8 = vld [vmem:[%s2257_s3] ss:$16 sps:$4 sm:$0xff]   ;;  %v2077_v12 = vld [vmem:[%s2257_s3 + $0x44] ss:$16 sps:$4 sm:$0xff]  }
 0x508   :  { %v1305_v42 = vmul.f32 -1.442695, %v813_v0  ;;  %v770_v53 = vpop.f32.mrb[19].mxu0  ;;  %v811_v48 = vpop.f32.mrb[19].mxu1  ;;  %v2071_v0 = vld [vmem:[%s2257_s3 + $0x28] ss:$16 sps:$4 sm:$0xff]  }
 0x509   :  { %v1306_v44 = vmul.f32 -1.442695, %v814_v13  ;;  %v1307_v40 = vmul.f32 -1.442695, %v816_v50  ;;  %v2084_v6 = vld [vmem:[%s2257_s3 + $0x40] ss:$16 sps:$4 sm:$0xff]  }
 0x50a   :  { %1438 = vpow2.f32 %v1305_v42  ;;  %v2091_v13 = vld [vmem:[%s2257_s3 + $0x64] ss:$16 sps:$4 sm:$0xff]  }
 0x50b   :  { %1440 = vpow2.f32 %v1306_v44 }
 0x50c   :  { %1442 = vpow2.f32 %v1307_v40 }
 0x50d   :  { %1444 = vtanh.f32 %v815_v58 }
 0x514   :  { %v1439_v61 = vpop.eup %1438 }
 0x515   :  { %v1441_v37 = vpop.eup %1440  ;;  %v820_v43 = vadd.f32 1.0, %v1439_v61 }
 0x516   :  { %v826_v60 = vadd.f32 1.0, %v1441_v37  ;;  %v1443_v49 = vpop.eup %1442 }
 0x517   :  { %1446 = vrcp.f32 %v820_v43  ;;  %v1445_v57 = vpop.eup %1444  ;;  %v833_v51 = vadd.f32 1.0, %v1443_v49 }
 0x518   :  { %1448 = vrcp.f32 %v826_v60 }
 0x519   :  { %1450 = vrcp.f32 %v833_v51 }
 0x521   :  { %v1447_v33 = vpop.eup %1446 }
 0x522   :  { %v1449_v59 = vpop.eup %1448  ;;  %v837_v36 = vmul.f32 %v1447_v33, %v1445_v57 }
 0x523   :  { %v836_v62 = vmul.f32 %v1449_v59, %v1985_v54  ;;  %v1451_v3 = vpop.eup %1450  ;;  %v2045_v54 = vld [vmem:[%s2257_s3 + $0x8] ss:$16 sps:$4 sm:$0xff]  }
 0x525   :  { %v2033_v2 = vadd.f32 %v837_v36, %v836_v62 }
 0x527   :  { %1452 = vtanh.f32 %v2033_v2 }
 0x531   :  { %v1453_v4 = vpop.eup %1452 }
 0x532   :  { %v840_v5 = vmul.f32 %v1453_v4, %v1451_v3 }
 0x534   :  { %v852_v7 = vpack.c.bf16 %v840_v5, %v840_v5 }
 0x536   :  { %886 = vmatmul.mubr.bf16.vlgmr.msra.gmra.mrb[20].mxu0 %v852_v7  ;;  %927 = vmatmul.mubr.bf16.vlgmr.msra.gmra.mrb[20].mxu1 %v852_v7  ;;  %v1528_v7 = vld [vmem:[%s2257_s3 + $0x48] ss:$16 sps:$4 sm:$0xff]  }
 0x537   :  { %976 = vmatpush1.bf16.msra.mxu0 %v2039_v8  ;;  %1017 = vmatpush1.bf16.msra.mxu1 %v2045_v54 }
 0x538   :  { %977 = vmatprep.subr.bf16.mxu0 %v2051_v9  ;;  %1018 = vmatprep.subr.bf16.mxu1 %v2057_v10 }
 0x539   :  { %1007 = vmatprep.mubr.bf16.mxu0 %v1547_v1  ;;  %1048 = vmatprep.mubr.bf16.mxu1 %v1547_v1 }
 0x53b   :  { %978 = vmatpush1.bf16.msra.mxu0 %v2065_v11  ;;  %1019 = vmatpush1.bf16.msra.mxu1 %v2071_v0 }
 0x53c   :  { %979 = vmatprep.subr.bf16.mxu0 %v2077_v12  ;;  %1020 = vmatprep.subr.bf16.mxu1 %v1652_v14  ;;  %v2098_v14 = vld [vmem:[%s2257_s3 + $0x60] ss:$16 sps:$4 sm:$0xff]  }
 0x53f   :  { %980 = vmatpush1.bf16.msra.mxu0 %v2084_v6  ;;  %1021 = vmatpush1.bf16.msra.mxu1 %v1659_v15  ;;  %v2105_v15 = vld [vmem:[%s2257_s3 + $0x84] ss:$16 sps:$4 sm:$0xff]  }
 0x540   :  { %981 = vmatprep.subr.bf16.mxu0 %v2091_v13  ;;  %1022 = vmatprep.subr.bf16.mxu1 %v1665_v16  ;;  %v1525_v16 = vld [vmem:[%s2257_s3 + $0x4] ss:$16 sps:$4 sm:$0xff]  }
 0x543   :  { %982 = vmatpush1.bf16.msra.mxu0 %v2098_v14  ;;  %1023 = vmatpush1.bf16.msra.mxu1 %v1683_v19 }
 0x544   :  { %983 = vmatprep.subr.bf16.mxu0 %v2105_v15  ;;  %1024 = vmatprep.subr.bf16.mxu1 %v1689_v20 }
 0x547   :  { %984 = vmatpush1.bf16.msra.mxu0 %v1671_v17  ;;  %1025 = vmatpush1.bf16.msra.mxu1 %v1707_v23  ;;  %v1526_v17 = vld [vmem:[%s2257_s3 + $0xc] ss:$16 sps:$4 sm:$0xff]  }
 0x548   :  { %985 = vmatprep.subr.bf16.mxu0 %v1677_v18  ;;  %1026 = vmatprep.subr.bf16.mxu1 %v1713_v24  ;;  %v1308_v18 = vld [vmem:[%s2259_s0 + $0x50] sm:$0xff] }
 0x549   :  { %v844_v19 = vunpack.c.l.bf16 %v1308_v18  ;;  %v845_v20 = vunpack.c.h.bf16 %v1308_v18  ;;  %v1543_v18 = vld [vmem:[%s2257_s3 + $0xec] ss:$16 sps:$4 sm:$0xff]  }
 0x54b   :  { %986 = vmatpush1.bf16.msra.mxu0 %v1695_v21  ;;  %1027 = vmatpush1.bf16.msra.mxu1 %v1731_v27  ;;  %v848_v21 = vadd.f32 %v844_v19, %v1826_v45  ;;  %v849_v23 = vadd.f32 %v845_v20, %v1828_v47  ;;  %v1544_v19 = vld [vmem:[%s2257_s3 + $0xe0] ss:$16 sps:$4 sm:$0xff]   ;;  %v1545_v20 = vld [vmem:[%s2257_s3 + $0xe8] ss:$16 sps:$4 sm:$0xff]  }
 0x54c   :  { %987 = vmatprep.subr.bf16.mxu0 %v1700_v22  ;;  %1028 = vmatprep.subr.bf16.mxu1 %v1737_v28  ;;  %v1309_v22 = vld [vmem:[%s2259_s0 + $0x58] sm:$0xff] }
 0x54d   :  { %v846_v44 = vunpack.c.l.bf16 %v1309_v22 }
 0x54f   :  { %988 = vmatpush1.bf16.msra.mxu0 %v1719_v25  ;;  %1029 = vmatpush1.bf16.msra.mxu1 %v1750_v30  ;;  %v850_v35 = vadd.f32 %v846_v44, %v1838_v63 }
 0x550   :  { %989 = vmatprep.subr.bf16.mxu0 %v1725_v26  ;;  %1030 = vmatprep.subr.bf16.mxu1 %v1756_v31  ;;  %v847_v26 = vunpack.c.h.bf16 %v1309_v22 }
 0x552   :  { %v851_v48 = vadd.f32 %v847_v26, %v1835_v52 }
 0x553   :  { %990 = vmatpush1.bf16.msra.mxu0 %v1743_v29  ;;  %1031 = vmatpush1.bf16.msra.mxu1 %v1763_v32 }
 0x554   :  { %1097 = vmatprep.subr.bf16.mxu0 %v1525_v16  ;;  %1138 = vmatprep.subr.bf16.mxu1 %v1526_v17  ;;  %v1541_v16 = vld [vmem:[%s2257_s3 + $0xc8] ss:$16 sps:$4 sm:$0xff]   ;;  %v1542_v17 = vld [vmem:[%s2257_s3 + $0xe4] ss:$16 sps:$4 sm:$0xff]  }
 0x609   :  { %v887_v24 = vpop.f32.mrb[20].mxu0  ;;  %v928_v25 = vpop.f32.mrb[20].mxu1 }
 0x60a   :  { %v935_v27 = vadd.f32 %v887_v24, %v848_v21  ;;  %v889_v28 = vpop.f32.mrb[21].mxu0  ;;  %v930_v29 = vpop.f32.mrb[21].mxu1  ;;  %v937_v56 = vadd.f32 %v928_v25, %v850_v35  ;;  %v1313_v21 = vld [vmem:[%s2259_s0 + $0x60] sm:$0xff]  ;;  %v1314_v25 = vld [vmem:[%s2259_s0 + $0x68] sm:$0xff] }
 0x60b   :  { %v936_v30 = vadd.f32 %v889_v28, %v849_v23  ;;  %v891_v31 = vpop.f32.mrb[22].mxu0  ;;  %v932_v32 = vpop.f32.mrb[22].mxu1  ;;  %v938_v55 = vadd.f32 %v930_v29, %v851_v48  ;;  %v966_v22 = vunpack.c.l.bf16 %v1313_v21  ;;  %v967_v23 = vunpack.c.h.bf16 %v1313_v21 }
 0x60c   :  { %v1310_v41 = vmul.f32 -1.442695, %v935_v27  ;;  %v892_v46 = vpop.f32.mrb[23].mxu0  ;;  %v933_v42 = vpop.f32.mrb[23].mxu1  ;;  %v969_v29 = vunpack.c.h.bf16 %v1314_v25 }
 0x60d   :  { %v1311_v53 = vmul.f32 -1.442695, %v936_v30  ;;  %v1312_v50 = vmul.f32 -1.442695, %v938_v55  ;;  %v970_v24 = vadd.f32 %v966_v22, %v1826_v45  ;;  %v971_v26 = vadd.f32 %v967_v23, %v1828_v47 }
 0x60e   :  { %1454 = vpow2.f32 %v1310_v41  ;;  %v973_v35 = vadd.f32 %v969_v29, %v1835_v52  ;;  %v1319_v29 = vld [vmem:[%s2259_s0 + $0x78] sm:$0xff] }
 0x60f   :  { %1456 = vpow2.f32 %v1311_v53 }
 0x610   :  { %1458 = vpow2.f32 %v1312_v50  ;;  %v968_v50 = vunpack.c.l.bf16 %v1314_v25 }
 0x611   :  { %1460 = vtanh.f32 %v937_v56 }
 0x618   :  { %v1455_v40 = vpop.eup %1454 }
 0x619   :  { %v1457_v58 = vpop.eup %1456  ;;  %v942_v61 = vadd.f32 1.0, %v1455_v40  ;;  %v972_v40 = vadd.f32 %v968_v50, %v1838_v63 }
 0x61a   :  { %v948_v37 = vadd.f32 1.0, %v1457_v58  ;;  %v1459_v43 = vpop.eup %1458 }
 0x61b   :  { %1462 = vrcp.f32 %v942_v61  ;;  %v1461_v60 = vpop.eup %1460  ;;  %v955_v59 = vadd.f32 1.0, %v1459_v43 }
 0x61c   :  { %1464 = vrcp.f32 %v948_v37 }
 0x61d   :  { %1466 = vrcp.f32 %v955_v59 }
 0x625   :  { %v1463_v49 = vpop.eup %1462 }
 0x626   :  { %v1465_v57 = vpop.eup %1464  ;;  %v959_v33 = vmul.f32 %v1463_v49, %v1461_v60 }
 0x627   :  { %v958_v36 = vmul.f32 %v1465_v57, %v2033_v2  ;;  %v1467_v62 = vpop.eup %1466  ;;  %v1527_v2 = vld [vmem:[%s2257_s3 + $0x4c] ss:$16 sps:$4 sm:$0xff]  }
 0x629   :  { %v2140_v51 = vadd.f32 %v959_v33, %v958_v36 }
 0x62b   :  { %1468 = vtanh.f32 %v2140_v51 }
 0x635   :  { %v1469_v3 = vpop.eup %1468 }
 0x636   :  { %v962_v4 = vmul.f32 %v1469_v3, %v1467_v62 }
 0x638   :  { %v974_v5 = vpack.c.bf16 %v962_v4, %v962_v4 }
 0x63a   :  { %1008 = vmatmul.mubr.bf16.vlgmr.msra.gmra.mrb[24].mxu0 %v974_v5  ;;  %1049 = vmatmul.mubr.bf16.vlgmr.msra.gmra.mrb[24].mxu1 %v974_v5 }
 0x63b   :  { %1098 = vmatpush1.bf16.msra.mxu0 %v2039_v8  ;;  %1139 = vmatpush1.bf16.msra.mxu1 %v2045_v54  ;;  %v1530_v8 = vld [vmem:[%s2257_s3 + $0x68] ss:$16 sps:$4 sm:$0xff]   ;;  %v1531_v54 = vld [vmem:[%s2257_s3 + $0x8c] ss:$16 sps:$4 sm:$0xff]  }
 0x63c   :  { %1099 = vmatprep.subr.bf16.mxu0 %v2051_v9  ;;  %1140 = vmatprep.subr.bf16.mxu1 %v2057_v10  ;;  %v1532_v9 = vld [vmem:[%s2257_s3 + $0x80] ss:$16 sps:$4 sm:$0xff]   ;;  %v1533_v10 = vld [vmem:[%s2257_s3 + $0x88] ss:$16 sps:$4 sm:$0xff]  }
 0x63d   :  { %1129 = vmatprep.mubr.bf16.mxu0 %v1547_v1  ;;  %1170 = vmatprep.mubr.bf16.mxu1 %v1547_v1  ;;  %v1529_v1 = vld [vmem:[%s2257_s3 + $0x6c] ss:$16 sps:$4 sm:$0xff]  }
 0x63f   :  { %1100 = vmatpush1.bf16.msra.mxu0 %v2065_v11  ;;  %1141 = vmatpush1.bf16.msra.mxu1 %v2071_v0  ;;  %v1534_v11 = vld [vmem:[%s2257_s3 + $0xa4] ss:$16 sps:$4 sm:$0xff]   ;;  %v1535_v0 = vld [vmem:[%s2257_s3 + $0xac] ss:$16 sps:$4 sm:$0xff]  }
 0x640   :  { %1101 = vmatprep.subr.bf16.mxu0 %v2077_v12  ;;  %1142 = vmatprep.subr.bf16.mxu1 %v1527_v2  ;;  %v1536_v12 = vld [vmem:[%s2257_s3 + $0xa0] ss:$16 sps:$4 sm:$0xff]  }
 0x643   :  { %1102 = vmatpush1.bf16.msra.mxu0 %v2084_v6  ;;  %1143 = vmatpush1.bf16.msra.mxu1 %v1528_v7  ;;  %v1537_v6 = vld [vmem:[%s2257_s3 + $0xa8] ss:$16 sps:$4 sm:$0xff]  }
 0x644   :  { %1103 = vmatprep.subr.bf16.mxu0 %v2091_v13  ;;  %1144 = vmatprep.subr.bf16.mxu1 %v1529_v1  ;;  %v1538_v13 = vld [vmem:[%s2257_s3 + $0xc4] ss:$16 sps:$4 sm:$0xff]  }
 0x647   :  { %1104 = vmatpush1.bf16.msra.mxu0 %v2098_v14  ;;  %1145 = vmatpush1.bf16.msra.mxu1 %v1530_v8  ;;  %v1539_v14 = vld [vmem:[%s2257_s3 + $0xcc] ss:$16 sps:$4 sm:$0xff]  }
 0x648   :  { %1105 = vmatprep.subr.bf16.mxu0 %v2105_v15  ;;  %1146 = vmatprep.subr.bf16.mxu1 %v1531_v54  ;;  %v1540_v15 = vld [vmem:[%s2257_s3 + $0xc0] ss:$16 sps:$4 sm:$0xff]  }
 0x649   :  { %v1207_v54 = vld [vmem:[%s2260_s1] sm:$0xf] }
 0x64b   :  { %1106 = vmatpush1.bf16.msra.mxu0 %v1532_v9  ;;  %1147 = vmatpush1.bf16.msra.mxu1 %v1533_v10  ;;  %v1209_v9 = vunpack.c.l.bf16 %v1207_v54  ;;  %v2263_v10 = vsub.s32 0, %v1805_v34 }
 0x64c   :  { %1107 = vmatprep.subr.bf16.mxu0 %v1534_v11  ;;  %1148 = vmatprep.subr.bf16.mxu1 %v1535_v0 }
 0x64f   :  { %1108 = vmatpush1.bf16.msra.mxu0 %v1536_v12  ;;  %1149 = vmatpush1.bf16.msra.mxu1 %v1537_v6 }
 0x650   :  { %1109 = vmatprep.subr.bf16.mxu0 %v1538_v13  ;;  %1150 = vmatprep.subr.bf16.mxu1 %v1539_v14  ;;  %v1208_v13 = vld [vmem:[%s2260_s1 + $0x8] sm:$0xff] }
 0x651   :  { %v1211_v14 = vunpack.c.h.bf16 %v1208_v13 }
 0x653   :  { %1110 = vmatpush1.bf16.msra.mxu0 %v1540_v15  ;;  %1151 = vmatpush1.bf16.msra.mxu1 %v1541_v16  ;;  %v1210_v16 = vunpack.c.l.bf16 %v1208_v13 }
 0x654   :  { %1111 = vmatprep.subr.bf16.mxu0 %v1542_v17  ;;  %1152 = vmatprep.subr.bf16.mxu1 %v1543_v18  ;;  %v1230_v17 = vadd.f32 %v1814_v39, %v1211_v14 }
 0x655   :  { %v1229_v18 = vadd.f32 %v1812_v38, %v1210_v16  ;;  %v1318_v38 = vld [vmem:[%s2259_s0 + $0x70] sm:$0xff] }
 0x656   :  { %v1088_v39 = vunpack.c.l.bf16 %v1318_v38 }
 0x657   :  { %1112 = vmatpush1.bf16.msra.mxu0 %v1544_v19  ;;  %1153 = vmatpush1.bf16.msra.mxu1 %v1545_v20  ;;  %v1324_v19 = vmul.f32 -1.442695, %v1230_v17 }
 0x70d   :  { %v1009_v27 = vpop.f32.mrb[24].mxu0  ;;  %v1050_v28 = vpop.f32.mrb[24].mxu1 }
 0x70e   :  { %v1057_v30 = vadd.f32 %v1009_v27, %v970_v24  ;;  %v1011_v31 = vpop.f32.mrb[25].mxu0  ;;  %v1052_v32 = vpop.f32.mrb[25].mxu1  ;;  %v1059_v61 = vadd.f32 %v1050_v28, %v972_v40  ;;  %v1089_v27 = vunpack.c.h.bf16 %v1318_v38  ;;  %v1092_v28 = vadd.f32 %v1088_v39, %v1826_v45 }
 0x70f   :  { %v1058_v41 = vadd.f32 %v1011_v31, %v971_v26  ;;  %v1013_v46 = vpop.f32.mrb[26].mxu0  ;;  %v1054_v42 = vpop.f32.mrb[26].mxu1  ;;  %v1060_v56 = vadd.f32 %v1052_v32, %v973_v35 }
 0x710   :  { %v1315_v53 = vmul.f32 -1.442695, %v1057_v30  ;;  %v1014_v48 = vpop.f32.mrb[27].mxu0  ;;  %v1055_v44 = vpop.f32.mrb[27].mxu1  ;;  %v1093_v30 = vadd.f32 %v1089_v27, %v1828_v47 }
 0x711   :  { %v1316_v55 = vmul.f32 -1.442695, %v1058_v41  ;;  %v1317_v58 = vmul.f32 -1.442695, %v1060_v56  ;;  %v1091_v41 = vunpack.c.h.bf16 %v1319_v29 }
 0x712   :  { %1470 = vpow2.f32 %v1315_v53 }
 0x713   :  { %1472 = vpow2.f32 %v1316_v55  ;;  %v1095_v45 = vadd.f32 %v1091_v41, %v1835_v52 }
 0x714   :  { %1474 = vpow2.f32 %v1317_v58  ;;  %v1090_v58 = vunpack.c.l.bf16 %v1319_v29 }
 0x715   :  { %1476 = vtanh.f32 %v1059_v61 }
 0x716   :  { %v1094_v47 = vadd.f32 %v1090_v58, %v1838_v63 }
 0x71c   :  { %v1471_v37 = vpop.eup %1470 }
 0x71d   :  { %v1473_v43 = vpop.eup %1472  ;;  %v1064_v60 = vadd.f32 1.0, %v1471_v37 }
 0x71e   :  { %v1070_v49 = vadd.f32 1.0, %v1473_v43  ;;  %v1475_v57 = vpop.eup %1474 }
 0x71f   :  { %1478 = vrcp.f32 %v1064_v60  ;;  %v1477_v33 = vpop.eup %1476  ;;  %v1077_v3 = vadd.f32 1.0, %v1475_v57 }
 0x720   :  { %1480 = vrcp.f32 %v1070_v49 }
 0x721   :  { %1482 = vrcp.f32 %v1077_v3 }
 0x729   :  { %v1479_v59 = vpop.eup %1478 }
 0x72a   :  { %v1481_v36 = vpop.eup %1480  ;;  %v1081_v62 = vmul.f32 %v1479_v59, %v1477_v33 }
 0x72b   :  { %v1080_v4 = vmul.f32 %v1481_v36, %v2140_v51  ;;  %v1483_v2 = vpop.eup %1482  ;;  %v1546_v51 = vld [vmem:[%s2258_s2 + $0x4] sm:$0xf] }
 0x72c   :  { %v1216_v11 = vrot.slane %v1546_v51, %v2263_v10 }
 0x72d   :  { %v2224_v5 = vadd.f32 %v1081_v62, %v1080_v4 }
 0x72e   :  { %v1228_v0 = vadd.f32 %v1216_v11, %v1209_v9 }
 0x72f   :  { %1484 = vtanh.f32 %v2224_v5 }
 0x730   :  { %v1323_v12 = vmul.f32 -1.442695, %v1228_v0 }
 0x732   :  { %1486 = vpow2.f32 %v1323_v12 }
 0x739   :  { %v1485_v7 = vpop.eup %1484 }
 0x73a   :  { %v1084_v1 = vmul.f32 %v1485_v7, %v1483_v2 }
 0x73c   :  { %v1096_v8 = vpack.c.bf16 %v1084_v1, %v1084_v1  ;;  %v1487_v6 = vpop.eup %1486 }
 0x73d   :  { %v1234_v15 = vadd.f32 1.0, %v1487_v6 }
 0x73e   :  { %1130 = vmatmul.mubr.bf16.vlgmr.msra.gmra.mrb[28].mxu0 %v1096_v8  ;;  %1171 = vmatmul.mubr.bf16.vlgmr.msra.gmra.mrb[28].mxu1 %v1096_v8 }
 0x73f   :  { %1488 = vrcp.f32 %v1234_v15 }
 0x740   :  { %1490 = vtanh.f32 %v1229_v18 }
 0x741   :  { %1492 = vpow2.f32 %v1324_v19 }
 0x749   :  { %v1489_v34 = vpop.eup %1488 }
 0x74a   :  { %v1491_v20 = vpop.eup %1490 }
 0x74b   :  { %v1493_v21 = vpop.eup %1492  ;;  %v1244_v22 = vmul.f32 %v1491_v20, %v1489_v34 }
 0x74c   :  { %v1241_v23 = vadd.f32 1.0, %v1493_v21 }
 0x74d   :  { %1494 = vtanh.f32 %v1244_v22 }
 0x74e   :  { %1496 = vrcp.f32 %v1241_v23 }
 0x757   :  { %v1495_v24 = vpop.eup %1494 }
 0x758   :  { %v1497_v25 = vpop.eup %1496 }
 0x759   :  { %v1246_v26 = vmul.f32 %v1497_v25, %v1495_v24 }
 0x75b   :  { %1248 = vst [vmem:[%s2261_s4 + $0x8] sm:$0xff] %v1246_v26 }
 0x811   :  { %v1131_v31 = vpop.f32.mrb[28].mxu0  ;;  %v1172_v32 = vpop.f32.mrb[28].mxu1 }
 0x812   :  { %v1179_v46 = vadd.f32 %v1131_v31, %v1092_v28  ;;  %v1133_v42 = vpop.f32.mrb[29].mxu0  ;;  %v1174_v53 = vpop.f32.mrb[29].mxu1  ;;  %v1181_v43 = vadd.f32 %v1172_v32, %v1094_v47 }
 0x813   :  { %v1180_v48 = vadd.f32 %v1133_v42, %v1093_v30  ;;  %v1135_v44 = vpop.f32.mrb[30].mxu0  ;;  %v1176_v55 = vpop.f32.mrb[30].mxu1  ;;  %v1182_v61 = vadd.f32 %v1174_v53, %v1095_v45 }
 0x814   :  { %v1320_v35 = vmul.f32 -1.442695, %v1179_v46  ;;  %v1136_v50 = vpop.f32.mrb[31].mxu0  ;;  %v1177_v56 = vpop.f32.mrb[31].mxu1 }
 0x815   :  { %v1321_v40 = vmul.f32 -1.442695, %v1180_v48  ;;  %v1322_v37 = vmul.f32 -1.442695, %v1182_v61 }
 0x816   :  { %1498 = vpow2.f32 %v1320_v35 }
 0x817   :  { %1500 = vpow2.f32 %v1321_v40 }
 0x818   :  { %1502 = vpow2.f32 %v1322_v37 }
 0x819   :  { %1504 = vtanh.f32 %v1181_v43 }
 0x820   :  { %v1499_v60 = vpop.eup %1498 }
 0x821   :  { %v1501_v49 = vpop.eup %1500  ;;  %v1186_v57 = vadd.f32 1.0, %v1499_v60 }
 0x822   :  { %v1192_v33 = vadd.f32 1.0, %v1501_v49  ;;  %v1503_v59 = vpop.eup %1502 }
 0x823   :  { %1506 = vrcp.f32 %v1186_v57  ;;  %v1505_v36 = vpop.eup %1504  ;;  %v1199_v4 = vadd.f32 1.0, %v1503_v59 }
 0x824   :  { %1508 = vrcp.f32 %v1192_v33 }
 0x825   :  { %1510 = vrcp.f32 %v1199_v4 }
 0x82d   :  { %v1507_v62 = vpop.eup %1506 }
 0x82e   :  { %v1509_v52 = vpop.eup %1508  ;;  %v1203_v3 = vmul.f32 %v1507_v62, %v1505_v36 }
 0x82f   :  { %v1202_v2 = vmul.f32 %v1509_v52, %v2224_v5  ;;  %v1511_v63 = vpop.eup %1510 }
 0x831   :  { %v1204_v7 = vadd.f32 %v1203_v3, %v1202_v2 }
 0x833   :  { %1512 = vtanh.f32 %v1204_v7 }
 0x83d   :  { %v1513_v1 = vpop.eup %1512 }
 0x83e   :  { %v1206_v8 = vmul.f32 %v1513_v1, %v1511_v63 }
 0x840   :  { %1247 = vst [vmem:[%s2261_s4] sm:$0xff] %v1206_v8 }

// kernel: white_sprague_forward.2
= control target key start
LH: loop header
LB: loop body
LE: loop exit
PB: predicated region body
PF: predicated region fallthrough
CT: control target
= control target key end

     0   :  { %9 = vsyncpa [#allocation3], 0  ;;  %s3127_s15 = smov [#allocation2]   ;;  %s4924_s0 = inlined_call_operand.vmem [shape: bf16[8,8,512], index: 0, kind: input, shape index: {}]   ;;  %s4925_s1 = inlined_call_operand.vmem [shape: bf16[8,8,512], index: 1, kind: input, shape index: {}]   ;;  %s4926_s2 = inlined_call_operand.hbm [shape: f32[1,1024], index: 2, kind: input, shape index: {}]   ;;  %s4927_s3 = inlined_call_operand.vmem [shape: bf16[2,128,512], index: 3, kind: input, shape index: {}]   ;;  %s4928_s4 = inlined_call_operand.vmem [shape: f32[8,8,256], index: 4, kind: output, shape index: {}]  }
   0x1   :  { %s20_s16 = sshll.u32 %s3127_s15, 4  ;;  %s3103_s19 = scalar_lea.hbm %s4926_s2, 128  ;;  %s21_s16 = int_to_ptr.vmem [resolvable:$true] %s20_s16 }
   0x2   :  { %p3104_p0 = scmp.ne.s32.totalorder %s4926_s2, %s3103_s19  ;;  %p3107_p1 = scmp.lt.u32.totalorder %s3103_s19, %s4926_s2 }
   0x4   :  { %p3109_p2 = pnand %p3107_p1, %p3104_p0 }
   0x6   :  { %3112 = shalt.err (!%p3109_p2)
}
   0x7   :  { %s3113_s24 = scalar_lea.vmem %s21_s16, 128  ;;  %p3118_p4 = scmp.lt.s32.totalorder %s21_s16, %s21_s16 }
   0x8   :  { %p3114_p3 = scmp.ne.s32.totalorder %s21_s16, %s3113_s24  ;;  %p3119_p5 = scmp.lt.s32.totalorder %s3113_s24, %s3113_s24 }
   0xa   :  { %p3120_p6 = por %p3119_p5, %p3118_p4 }
   0xc   :  { %p3121_p7 = pnand %p3120_p6, %p3114_p3 }
   0xe   :  { %3124 = shalt.err (!%p3121_p7)
}
   0xf   :  { %23 = dma.hbm_to_vmem [thread:$0]  %s4926_s2, 128, %s21_s16, [#allocation3]  }
  0x10   :  { %3125 = dma.done.wait [#allocation3], 128  }
  0x11   :  { %3126 = vsyncadd [#allocation3], 4294967168  ;;  %v4929_v0 = vmov 0   ;;  %v3171_v1 = vld [vmem:[%s4927_s3 + $0x4] ss:$16 sps:$4 sm:$0xff]  }
  0x12   :  { %320 = vmatprep.mubr.bf16.mxu0 %v4929_v0  ;;  %361 = vmatprep.mubr.bf16.mxu1 %v4929_v0  ;;  %v3176_v2 = vld [vmem:[%s4927_s3] ss:$16 sps:$4 sm:$0xff]   ;;  %v3182_v3 = vld [vmem:[%s4927_s3 + $0x24] ss:$16 sps:$4 sm:$0xff]   ;;  %v3199_v6 = vld [vmem:[%s4927_s3 + $0xc] ss:$16 sps:$4 sm:$0xff]  }
  0x13   :  { %288 = vmatprep.subr.bf16.mxu0 %v3171_v1  ;;  %v3188_v4 = vld [vmem:[%s4927_s3 + $0x20] ss:$16 sps:$4 sm:$0xff]   ;;  %v3194_v5 = vld [vmem:[%s4927_s3 + $0x44] ss:$16 sps:$4 sm:$0xff]   ;;  %v3204_v7 = vld [vmem:[%s4927_s3 + $0x8] ss:$16 sps:$4 sm:$0xff]   ;;  %329 = vmatprep.subr.bf16.mxu1 %v3199_v6 }
  0x14   :  { %289 = vmatpush1.bf16.msra.mxu0 %v3176_v2  ;;  %5031 = vst [vmem:[#allocation5_spill] sm:$0xff] %v3194_v5  ;;  %v3210_v8 = vld [vmem:[%s4927_s3 + $0x40] ss:$16 sps:$4 sm:$0xff]   ;;  %v3217_v9 = vld [vmem:[%s4927_s3 + $0x64] ss:$16 sps:$4 sm:$0xff]   ;;  %330 = vmatpush1.bf16.msra.mxu1 %v3204_v7 }
  0x15   :  { %290 = vmatprep.subr.bf16.mxu0 %v3182_v3  ;;  %5032 = vst [vmem:[#allocation6_spill] sm:$0xff] %v3210_v8  ;;  %5033 = vst [vmem:[#allocation7_spill] sm:$0xff] %v3217_v9  ;;  %v3223_v10 = vld [vmem:[%s4927_s3 + $0x2c] ss:$16 sps:$4 sm:$0xff]   ;;  %v3228_v11 = vld [vmem:[%s4927_s3 + $0x28] ss:$16 sps:$4 sm:$0xff]  }
  0x16   :  { %331 = vmatprep.subr.bf16.mxu1 %v3223_v10  ;;  %v3235_v12 = vld [vmem:[%s4927_s3 + $0x60] ss:$16 sps:$4 sm:$0xff]   ;;  %v3240_v13 = vld [vmem:[%s4927_s3 + $0x84] ss:$16 sps:$4 sm:$0xff]   ;;  %v3245_v14 = vld [vmem:[%s4927_s3 + $0x4c] ss:$16 sps:$4 sm:$0xff]  }
  0x17   :  { %5034 = vst [vmem:[#allocation8_spill] sm:$0xff] %v3235_v12  ;;  %5035 = vst [vmem:[#allocation9_spill] sm:$0xff] %v3240_v13  ;;  %v3252_v15 = vld [vmem:[%s4927_s3 + $0x48] ss:$16 sps:$4 sm:$0xff]   ;;  %v3258_v16 = vld [vmem:[%s4927_s3 + $0x6c] ss:$16 sps:$4 sm:$0xff]  }
  0x18   :  { %291 = vmatpush1.bf16.msra.mxu0 %v3188_v4  ;;  %5036 = vst [vmem:[#allocation10_spill] sm:$0xff] %v3245_v14  ;;  %332 = vmatpush1.bf16.msra.mxu1 %v3228_v11  ;;  %5037 = vst [vmem:[#allocation11_spill] sm:$0xff] %v3252_v15  ;;  %v3264_v17 = vld [vmem:[%s4927_s3 + $0x80] ss:$16 sps:$4 sm:$0xff]   ;;  %v3270_v18 = vld [vmem:[%s4927_s3 + $0xa4] ss:$16 sps:$4 sm:$0xff]  }
  0x19   :  { %292 = vmatprep.subr.bf16.mxu0 %v3194_v5  ;;  %333 = vmatprep.subr.bf16.mxu1 %v3245_v14  ;;  %5038 = vst [vmem:[#allocation12_spill] sm:$0xff] %v3258_v16  ;;  %5039 = vst [vmem:[#allocation13_spill] sm:$0xff] %v3264_v17  ;;  %v3276_v19 = vld [vmem:[%s4927_s3 + $0x68] ss:$16 sps:$4 sm:$0xff]   ;;  %v3282_v20 = vld [vmem:[%s4927_s3 + $0x8c] ss:$16 sps:$4 sm:$0xff]  }
  0x1a   :  { %5040 = vst [vmem:[#allocation14_spill] sm:$0xff] %v3270_v18  ;;  %5041 = vst [vmem:[#allocation15_spill] sm:$0xff] %v3276_v19  ;;  %v3288_v21 = vld [vmem:[%s4927_s3 + $0xa0] ss:$16 sps:$4 sm:$0xff]   ;;  %v3293_v22 = vld [vmem:[%s4927_s3 + $0xc4] ss:$16 sps:$4 sm:$0xff]  }
  0x1b   :  { %5042 = vst [vmem:[#allocation16_spill] sm:$0xff] %v3282_v20  ;;  %5043 = vst [vmem:[#allocation17_spill] sm:$0xff] %v3288_v21  ;;  %v3300_v23 = vld [vmem:[%s4927_s3 + $0x88] ss:$16 sps:$4 sm:$0xff]   ;;  %v3306_v24 = vld [vmem:[%s4927_s3 + $0xac] ss:$16 sps:$4 sm:$0xff]  }
  0x1c   :  { %293 = vmatpush1.bf16.msra.mxu0 %v3210_v8  ;;  %334 = vmatpush1.bf16.msra.mxu1 %v3252_v15  ;;  %5044 = vst [vmem:[#allocation18_spill] sm:$0xff] %v3293_v22  ;;  %5045 = vst [vmem:[#allocation19_spill] sm:$0xff] %v3300_v23  ;;  %v3312_v25 = vld [vmem:[%s4927_s3 + $0xc0] ss:$16 sps:$4 sm:$0xff]   ;;  %v3318_v26 = vld [vmem:[%s4927_s3 + $0xe4] ss:$16 sps:$4 sm:$0xff]  }
  0x1d   :  { %294 = vmatprep.subr.bf16.mxu0 %v3217_v9  ;;  %335 = vmatprep.subr.bf16.mxu1 %v3258_v16  ;;  %5046 = vst [vmem:[#allocation20_spill] sm:$0xff] %v3306_v24  ;;  %5047 = vst [vmem:[#allocation21_spill] sm:$0xff] %v3312_v25  ;;  %v3324_v27 = vld [vmem:[%s4927_s3 + $0xa8] ss:$16 sps:$4 sm:$0xff]   ;;  %v3330_v28 = vld [vmem:[%s4927_s3 + $0xcc] ss:$16 sps:$4 sm:$0xff]  }
  0x1e   :  { %5048 = vst [vmem:[#allocation22_spill] sm:$0xff] %v3318_v26  ;;  %5049 = vst [vmem:[#allocation23_spill] sm:$0xff] %v3324_v27  ;;  %v3336_v29 = vld [vmem:[%s4927_s3 + $0xe0] ss:$16 sps:$4 sm:$0xff]   ;;  %v3341_v30 = vld [vmem:[%s4927_s3 + $0x104] ss:$16 sps:$4 sm:$0xff]  }
  0x1f   :  { %5050 = vst [vmem:[#allocation24_spill] sm:$0xff] %v3330_v28  ;;  %5051 = vst [vmem:[#allocation25_spill] sm:$0xff] %v3336_v29  ;;  %v3348_v31 = vld [vmem:[%s4927_s3 + $0xc8] ss:$16 sps:$4 sm:$0xff]   ;;  %v3354_v32 = vld [vmem:[%s4927_s3 + $0xec] ss:$16 sps:$4 sm:$0xff]  }
  0x20   :  { %295 = vmatpush1.bf16.msra.mxu0 %v3235_v12  ;;  %336 = vmatpush1.bf16.msra.mxu1 %v3276_v19  ;;  %5052 = vst [vmem:[#allocation26_spill] sm:$0xff] %v3341_v30  ;;  %5053 = vst [vmem:[#allocation27_spill] sm:$0xff] %v3348_v31  ;;  %v3360_v33 = vld [vmem:[%s4927_s3 + $0x100] ss:$16 sps:$4 sm:$0xff]   ;;  %v3366_v34 = vld [vmem:[%s4927_s3 + $0x124] ss:$16 sps:$4 sm:$0xff]  }
  0x21   :  { %296 = vmatprep.subr.bf16.mxu0 %v3240_v13  ;;  %337 = vmatprep.subr.bf16.mxu1 %v3282_v20  ;;  %5054 = vst [vmem:[#allocation28_spill] sm:$0xff] %v3354_v32  ;;  %v3372_v35 = vld [vmem:[%s4927_s3 + $0xe8] ss:$16 sps:$4 sm:$0xff]   ;;  %v3378_v36 = vld [vmem:[%s4927_s3 + $0x10c] ss:$16 sps:$4 sm:$0xff]  }
  0x22   :  { %5055 = vst [vmem:[#allocation29_spill] sm:$0xff] %v3372_v35  ;;  %5056 = vst [vmem:[#allocation30_spill] sm:$0xff] %v3378_v36  ;;  %v3385_v37 = vld [vmem:[%s4927_s3 + $0x120] ss:$16 sps:$4 sm:$0xff]   ;;  %v3390_v38 = vld [vmem:[%s4927_s3 + $0x144] ss:$16 sps:$4 sm:$0xff]  }
  0x23   :  { %v3398_v39 = vld [vmem:[%s4927_s3 + $0x108] ss:$16 sps:$4 sm:$0xff]   ;;  %v3404_v40 = vld [vmem:[%s4927_s3 + $0x12c] ss:$16 sps:$4 sm:$0xff]   ;;  %v3410_v41 = vld [vmem:[%s4927_s3 + $0x140] ss:$16 sps:$4 sm:$0xff]  }
  0x24   :  { %297 = vmatpush1.bf16.msra.mxu0 %v3264_v17  ;;  %338 = vmatpush1.bf16.msra.mxu1 %v3300_v23  ;;  %v3415_v42 = vld [vmem:[%s4927_s3 + $0x164] ss:$16 sps:$4 sm:$0xff]   ;;  %v3423_v43 = vld [vmem:[%s4927_s3 + $0x128] ss:$16 sps:$4 sm:$0xff]   ;;  %v3429_v44 = vld [vmem:[%s4927_s3 + $0x14c] ss:$16 sps:$4 sm:$0xff]  }
  0x25   :  { %298 = vmatprep.subr.bf16.mxu0 %v3270_v18  ;;  %339 = vmatprep.subr.bf16.mxu1 %v3306_v24  ;;  %v3436_v45 = vld [vmem:[%s4927_s3 + $0x160] ss:$16 sps:$4 sm:$0xff]   ;;  %v3442_v46 = vld [vmem:[%s4927_s3 + $0x184] ss:$16 sps:$4 sm:$0xff]   ;;  %v3448_v47 = vld [vmem:[%s4927_s3 + $0x148] ss:$16 sps:$4 sm:$0xff]  }
  0x26   :  { %v3454_v48 = vld [vmem:[%s4927_s3 + $0x16c] ss:$16 sps:$4 sm:$0xff]   ;;  %v3460_v49 = vld [vmem:[%s4927_s3 + $0x180] ss:$16 sps:$4 sm:$0xff]   ;;  %v3466_v50 = vld [vmem:[%s4927_s3 + $0x1a4] ss:$16 sps:$4 sm:$0xff]  }
  0x27   :  { %v3472_v51 = vld [vmem:[%s4927_s3 + $0x168] ss:$16 sps:$4 sm:$0xff]   ;;  %v3478_v52 = vld [vmem:[%s4927_s3 + $0x18c] ss:$16 sps:$4 sm:$0xff]   ;;  %v3484_v53 = vld [vmem:[%s4927_s3 + $0x1a0] ss:$16 sps:$4 sm:$0xff]  }
  0x28   :  { %299 = vmatpush1.bf16.msra.mxu0 %v3288_v21  ;;  %340 = vmatpush1.bf16.msra.mxu1 %v3324_v27  ;;  %v3490_v54 = vld [vmem:[%s4927_s3 + $0x1c4] ss:$16 sps:$4 sm:$0xff]   ;;  %v3496_v55 = vld [vmem:[%s4927_s3 + $0x188] ss:$16 sps:$4 sm:$0xff]   ;;  %v3502_v56 = vld [vmem:[%s4927_s3 + $0x1ac] ss:$16 sps:$4 sm:$0xff]  }
  0x29   :  { %300 = vmatprep.subr.bf16.mxu0 %v3293_v22  ;;  %341 = vmatprep.subr.bf16.mxu1 %v3330_v28  ;;  %v3508_v57 = vld [vmem:[%s4927_s3 + $0x1c0] ss:$16 sps:$4 sm:$0xff]   ;;  %v3514_v58 = vld [vmem:[%s4927_s3 + $0x1e4] ss:$16 sps:$4 sm:$0xff]   ;;  %v3520_v59 = vld [vmem:[%s4927_s3 + $0x1a8] ss:$16 sps:$4 sm:$0xff]  }
  0x2a   :  { %5057 = vst [vmem:[#allocation31_spill] sm:$0xff] %v3514_v58  ;;  %v3526_v60 = vld [vmem:[%s4927_s3 + $0x1cc] ss:$16 sps:$4 sm:$0xff]   ;;  %v3532_v61 = vld [vmem:[%s4927_s3 + $0x1e0] ss:$16 sps:$4 sm:$0xff]  }
  0x2b   :  { %v3539_v62 = vld [vmem:[%s4927_s3 + $0x1c8] ss:$16 sps:$4 sm:$0xff]   ;;  %v3545_v63 = vld [vmem:[%s4927_s3 + $0x1ec] ss:$16 sps:$4 sm:$0xff]  }
  0x2c   :  { %301 = vmatpush1.bf16.msra.mxu0 %v3312_v25  ;;  %342 = vmatpush1.bf16.msra.mxu1 %v3348_v31 }
  0x2d   :  { %302 = vmatprep.subr.bf16.mxu0 %v3318_v26  ;;  %343 = vmatprep.subr.bf16.mxu1 %v3354_v32 }
  0x30   :  { %303 = vmatpush1.bf16.msra.mxu0 %v3336_v29  ;;  %344 = vmatpush1.bf16.msra.mxu1 %v3372_v35 }
  0x31   :  { %566 = vmatprep.subr.bf16.mxu0 %v3341_v30  ;;  %607 = vmatprep.subr.bf16.mxu1 %v3378_v36 }
  0x33   :  { %321 = vmatmul.mubr.bf16.vlgmr.msra.gmra.mrb[0].mxu0 %v4929_v0  ;;  %362 = vmatmul.mubr.bf16.vlgmr.msra.gmra.mrb[0].mxu1 %v4929_v0 }
  0x34   :  { %567 = vmatpush1.bf16.msra.mxu0 %v3360_v33  ;;  %598 = vmatprep.mubr.bf16.mxu0 %v4929_v0 }
  0x35   :  { %568 = vmatprep.subr.bf16.mxu0 %v3366_v34  ;;  %608 = vmatpush1.bf16.msra.mxu1 %v3398_v39 }
  0x36   :  { %609 = vmatprep.subr.bf16.mxu1 %v3404_v40  ;;  %639 = vmatprep.mubr.bf16.mxu1 %v4929_v0  ;;  %v3552_v0 = vld [vmem:[%s4927_s3 + $0x1e8] ss:$16 sps:$4 sm:$0xff]  }
  0x38   :  { %569 = vmatpush1.bf16.msra.mxu0 %v3385_v37 }
  0x39   :  { %570 = vmatprep.subr.bf16.mxu0 %v3390_v38  ;;  %610 = vmatpush1.bf16.msra.mxu1 %v3423_v43 }
  0x3a   :  { %611 = vmatprep.subr.bf16.mxu1 %v3429_v44 }
  0x3c   :  { %571 = vmatpush1.bf16.msra.mxu0 %v3410_v41 }
  0x3d   :  { %572 = vmatprep.subr.bf16.mxu0 %v3415_v42  ;;  %612 = vmatpush1.bf16.msra.mxu1 %v3448_v47 }
  0x3e   :  { %613 = vmatprep.subr.bf16.mxu1 %v3454_v48 }
  0x40   :  { %573 = vmatpush1.bf16.msra.mxu0 %v3436_v45 }
  0x41   :  { %574 = vmatprep.subr.bf16.mxu0 %v3442_v46  ;;  %614 = vmatpush1.bf16.msra.mxu1 %v3472_v51 }
  0x42   :  { %615 = vmatprep.subr.bf16.mxu1 %v3478_v52 }
  0x44   :  { %575 = vmatpush1.bf16.msra.mxu0 %v3460_v49 }
  0x45   :  { %576 = vmatprep.subr.bf16.mxu0 %v3466_v50  ;;  %616 = vmatpush1.bf16.msra.mxu1 %v3496_v55 }
  0x46   :  { %617 = vmatprep.subr.bf16.mxu1 %v3502_v56 }
  0x48   :  { %577 = vmatpush1.bf16.msra.mxu0 %v3484_v53 }
  0x49   :  { %578 = vmatprep.subr.bf16.mxu0 %v3490_v54  ;;  %618 = vmatpush1.bf16.msra.mxu1 %v3520_v59 }
  0x4a   :  { %619 = vmatprep.subr.bf16.mxu1 %v3526_v60 }
  0x4c   :  { %579 = vmatpush1.bf16.msra.mxu0 %v3508_v57 }
  0x4d   :  { %580 = vmatprep.subr.bf16.mxu0 %v3514_v58  ;;  %620 = vmatpush1.bf16.msra.mxu1 %v3539_v62  ;;  %v5058_v58 = vmov 0  }
  0x4e   :  { %621 = vmatprep.subr.bf16.mxu1 %v3545_v63 }
  0x50   :  { %581 = vmatpush1.bf16.msra.mxu0 %v3532_v61 }
  0x51   :  { %715 = vmatprep.subr.bf16.mxu0 %v3171_v1  ;;  %622 = vmatpush1.bf16.msra.mxu1 %v3552_v0 }
  0x52   :  { %756 = vmatprep.subr.bf16.mxu1 %v3199_v6 }
  0x53   :  { %599 = vmatmul.mubr.bf16.vlgmr.msra.gmra.mrb[4].mxu0 %v5058_v58 }
  0x54   :  { %716 = vmatpush1.bf16.msra.mxu0 %v3176_v2  ;;  %747 = vmatprep.mubr.bf16.mxu0 %v5058_v58 }
  0x55   :  { %717 = vmatprep.subr.bf16.mxu0 %v3182_v3  ;;  %640 = vmatmul.mubr.bf16.vlgmr.msra.gmra.mrb[4].mxu1 %v5058_v58 }
  0x56   :  { %757 = vmatpush1.bf16.msra.mxu1 %v3204_v7  ;;  %788 = vmatprep.mubr.bf16.mxu1 %v5058_v58 }
  0x57   :  { %758 = vmatprep.subr.bf16.mxu1 %v3223_v10 }
  0x58   :  { %718 = vmatpush1.bf16.msra.mxu0 %v3188_v4 }
  0x59   :  { %719 = vmatprep.subr.bf16.mxu0 %v3194_v5 }
  0x5a   :  { %759 = vmatpush1.bf16.msra.mxu1 %v3228_v11 }
  0x5b   :  { %760 = vmatprep.subr.bf16.mxu1 %v3245_v14 }
  0x5c   :  { %720 = vmatpush1.bf16.msra.mxu0 %v3210_v8 }
  0x5d   :  { %721 = vmatprep.subr.bf16.mxu0 %v3217_v9 }
  0x5e   :  { %761 = vmatpush1.bf16.msra.mxu1 %v3252_v15 }
  0x5f   :  { %762 = vmatprep.subr.bf16.mxu1 %v3258_v16 }
  0x60   :  { %722 = vmatpush1.bf16.msra.mxu0 %v3235_v12 }
  0x61   :  { %723 = vmatprep.subr.bf16.mxu0 %v3240_v13 }
  0x62   :  { %763 = vmatpush1.bf16.msra.mxu1 %v3276_v19 }
  0x63   :  { %764 = vmatprep.subr.bf16.mxu1 %v3282_v20 }
  0x64   :  { %724 = vmatpush1.bf16.msra.mxu0 %v3264_v17 }
  0x65   :  { %725 = vmatprep.subr.bf16.mxu0 %v3270_v18 }
  0x66   :  { %765 = vmatpush1.bf16.msra.mxu1 %v3300_v23 }
  0x67   :  { %766 = vmatprep.subr.bf16.mxu1 %v3306_v24 }
  0x68   :  { %726 = vmatpush1.bf16.msra.mxu0 %v3288_v21 }
  0x69   :  { %727 = vmatprep.subr.bf16.mxu0 %v3293_v22  ;;  %v104_v22 = vlaneseq }
  0x6a   :  { %767 = vmatpush1.bf16.msra.mxu1 %v3324_v27 }
  0x6b   :  { %768 = vmatprep.subr.bf16.mxu1 %v3330_v28 }
  0x6c   :  { %728 = vmatpush1.bf16.msra.mxu0 %v3312_v25  ;;  %v3594_v25 = vshrl.u32 %v104_v22, 7  ;;  %v98_v22 = vld [vmem:[%s4924_s0 + $0x8] sm:$0xff] }
  0x6d   :  { %729 = vmatprep.subr.bf16.mxu0 %v3318_v26  ;;  %v95_v26 = vld [vmem:[#allocation2] sm:$0xf]  ;;  %v102_v18 = vunpack.c.h.bf16 %v98_v22  ;;  %v101_v14 = vunpack.c.l.bf16 %v98_v22 }
  0x6e   :  { %769 = vmatpush1.bf16.msra.mxu1 %v3348_v31  ;;  %v106_v27 = vsub.s32 0, %v3594_v25  ;;  %v110_v31 = vsub.s32 1, %v3594_v25  ;;  %v114_v20 = vsub.s32 2, %v3594_v25 }
  0x6f   :  { %770 = vmatprep.subr.bf16.mxu1 %v3354_v32 }
  0x70   :  { %730 = vmatpush1.bf16.msra.mxu0 %v3336_v29  ;;  %v97_v29 = vld [vmem:[%s4924_s0] sm:$0xff]  ;;  %v3603_v21 = vrot.slane %v95_v26, %v110_v31  ;;  %v3615_v5 = vrot.slane %v95_v26, %v114_v20 }
  0x71   :  { %813 = vmatprep.subr.bf16.mxu0 %v3341_v30  ;;  %v99_v28 = vunpack.c.l.bf16 %v97_v29  ;;  %v3601_v30 = vrot.slane %v95_v26, %v106_v27  ;;  %v100_v32 = vunpack.c.h.bf16 %v97_v29 }
  0x72   :  { %771 = vmatpush1.bf16.msra.mxu1 %v3372_v35  ;;  %5060 = vst [vmem:[#allocation33_spill] sm:$0xff] %v3603_v21  ;;  %5061 = vst [vmem:[#allocation34_spill] sm:$0xff] %v3615_v5 }
  0x73   :  { %854 = vmatprep.subr.bf16.mxu1 %v3378_v36  ;;  %5059 = vst [vmem:[#allocation32_spill] sm:$0xff] %v3601_v30  ;;  %v118_v36 = vsub.s32 3, %v3594_v25  ;;  %v124_v35 = vadd.f32 %v3601_v30, %v99_v28  ;;  %v125_v24 = vadd.f32 %v3603_v21, %v100_v32  ;;  %v126_v25 = vadd.f32 %v3615_v5, %v101_v14 }
  0x75   :  { %v3611_v23 = vrot.slane %v95_v26, %v118_v36 }
  0x77   :  { %v127_v15 = vadd.f32 %v3611_v23, %v102_v18 }
 0x106   :  { %v322_v17 = vpop.f32.mrb[0].mxu0  ;;  %v363_v28 = vpop.f32.mrb[0].mxu1 }
 0x107   :  { %v370_v13 = vadd.f32 %v322_v17, %v124_v35  ;;  %v324_v29 = vpop.f32.mrb[1].mxu0  ;;  %v365_v32 = vpop.f32.mrb[1].mxu1 }
 0x108   :  { %v371_v19 = vadd.f32 %v324_v29, %v125_v24  ;;  %v326_v12 = vpop.f32.mrb[2].mxu0  ;;  %v373_v21 = vadd.f32 %v365_v32, %v127_v15  ;;  %v367_v30 = vpop.f32.mrb[2].mxu1  ;;  %v372_v24 = vadd.f32 %v363_v28, %v126_v25  ;;  %v2500_v28 = vld [vmem:[%s4925_s1 + $0x78] sm:$0xff] }
 0x109   :  { %v2533_v16 = vmul.f32 -1.442695, %v370_v13  ;;  %v327_v9 = vpop.f32.mrb[3].mxu0  ;;  %v368_v17 = vpop.f32.mrb[3].mxu1 }
 0x10a   :  { %v2534_v8 = vmul.f32 -1.442695, %v371_v19  ;;  %v2535_v35 = vmul.f32 -1.442695, %v373_v21  ;;  %v96_v19 = vld [vmem:[#allocation2 + $0x4] sm:$0xf] }
 0x10b   :  { %2719 = vpow2.f32 %v2533_v16  ;;  %v3621_v26 = vrot.slane %v96_v19, %v106_v27  ;;  %v3623_v30 = vrot.slane %v96_v19, %v110_v31  ;;  %v3630_v27 = vrot.slane %v96_v19, %v118_v36 }
 0x10c   :  { %2721 = vpow2.f32 %v2534_v8  ;;  %v2499_v8 = vld [vmem:[%s4925_s1 + $0x70] sm:$0xff] }
 0x10d   :  { %2723 = vpow2.f32 %v2535_v35  ;;  %v377_v16 = vunpack.c.l.bf16 %v2499_v8  ;;  %v378_v21 = vunpack.c.h.bf16 %v2499_v8  ;;  %5062 = vst [vmem:[#allocation35_spill] sm:$0xff] %v3623_v30 }
 0x10e   :  { %2725 = vtanh.f32 %v372_v24 }
 0x10f   :  { %v402_v17 = vadd.f32 %v3621_v26, %v377_v16  ;;  %v403_v24 = vadd.f32 %v3623_v30, %v378_v21  ;;  %v3636_v21 = vrot.slane %v96_v19, %v114_v20 }
 0x115   :  { %v2720_v12 = vpop.eup %2719 }
 0x116   :  { %v2722_v9 = vpop.eup %2721  ;;  %v655_v13 = vadd.f32 1.0, %v2720_v12  ;;  %v380_v12 = vunpack.c.h.bf16 %v2500_v28 }
 0x117   :  { %v661_v18 = vadd.f32 1.0, %v2722_v9  ;;  %v2724_v15 = vpop.eup %2723 }
 0x118   :  { %2727 = vrcp.f32 %v655_v13  ;;  %v2726_v14 = vpop.eup %2725  ;;  %v668_v29 = vadd.f32 1.0, %v2724_v15  ;;  %v405_v16 = vadd.f32 %v3630_v27, %v380_v12 }
 0x119   :  { %2729 = vrcp.f32 %v661_v18 }
 0x11a   :  { %2731 = vrcp.f32 %v668_v29 }
 0x122   :  { %v2728_v22 = vpop.eup %2727 }
 0x123   :  { %v2730_v32 = vpop.eup %2729  ;;  %v672_v25 = vmul.f32 %v2728_v22, %v2726_v14 }
 0x124   :  { %v671_v35 = vmul.f32 0.0, %v2730_v32  ;;  %v379_v32 = vunpack.c.l.bf16 %v2500_v28  ;;  %v2732_v30 = vpop.eup %2731 }
 0x126   :  { %v3632_v9 = vadd.f32 %v672_v25, %v671_v35  ;;  %v600_v31 = vpop.f32.mrb[4].mxu0 }
 0x127   :  { %v648_v13 = vadd.f32 %v600_v31, %v402_v17  ;;  %v602_v18 = vpop.f32.mrb[5].mxu0  ;;  %v404_v17 = vadd.f32 %v3636_v21, %v379_v32 }
 0x128   :  { %2733 = vtanh.f32 %v3632_v9  ;;  %v649_v8 = vadd.f32 %v602_v18, %v403_v24  ;;  %v604_v15 = vpop.f32.mrb[6].mxu0  ;;  %v641_v36 = vpop.f32.mrb[4].mxu1 }
 0x129   :  { %v2536_v5 = vmul.f32 -1.442695, %v648_v13  ;;  %v605_v14 = vpop.f32.mrb[7].mxu0  ;;  %v643_v25 = vpop.f32.mrb[5].mxu1  ;;  %v650_v13 = vadd.f32 %v641_v36, %v404_v17 }
 0x12a   :  { %v2537_v22 = vmul.f32 -1.442695, %v649_v8  ;;  %v651_v29 = vadd.f32 %v643_v25, %v405_v16  ;;  %v645_v35 = vpop.f32.mrb[6].mxu1 }
 0x12b   :  { %2735 = vpow2.f32 %v2536_v5  ;;  %v646_v31 = vpop.f32.mrb[7].mxu1  ;;  %v5063_v35 = vld [vmem:[#allocation31_spill] sm:$0xff] }
 0x12c   :  { %2737 = vpow2.f32 %v2537_v22  ;;  %v2538_v24 = vmul.f32 -1.442695, %v651_v29 }
 0x12e   :  { %2739 = vpow2.f32 %v2538_v24 }
 0x12f   :  { %2741 = vtanh.f32 %v650_v13  ;;  %v5071_v13 = vld [vmem:[#allocation15_spill] sm:$0xff] }
 0x132   :  { %v2734_v18 = vpop.eup %2733 }
 0x133   :  { %v675_v15 = vmul.f32 %v2734_v18, %v2732_v30  ;;  %v5066_v18 = vld [vmem:[#allocation6_spill] sm:$0xff] }
 0x135   :  { %v2736_v14 = vpop.eup %2735  ;;  %700 = vst [vmem:[%s4928_s4] sm:$0xff] %v675_v15  ;;  %v714_v5 = vpack.c.bf16 %v675_v15, %v675_v15  ;;  %v5072_v15 = vld [vmem:[#allocation9_spill] sm:$0xff] }
 0x136   :  { %v2738_v20 = vpop.eup %2737  ;;  %v679_v19 = vadd.f32 1.0, %v2736_v14  ;;  %v5075_v14 = vld [vmem:[#allocation19_spill] sm:$0xff] }
 0x137   :  { %v685_v28 = vadd.f32 1.0, %v2738_v20  ;;  %748 = vmatmul.mubr.bf16.vlgmr.msra.gmra.mrb[8].mxu0 %v714_v5  ;;  %789 = vmatmul.mubr.bf16.vlgmr.msra.gmra.mrb[8].mxu1 %v714_v5  ;;  %v5076_v5 = vld [vmem:[#allocation14_spill] sm:$0xff]  ;;  %v5077_v20 = vld [vmem:[#allocation20_spill] sm:$0xff] }
 0x138   :  { %2743 = vrcp.f32 %v679_v19  ;;  %814 = vmatpush1.bf16.msra.mxu0 %v3360_v33  ;;  %855 = vmatpush1.bf16.msra.mxu1 %v3398_v39  ;;  %v2740_v30 = vpop.eup %2739  ;;  %v5078_v19 = vld [vmem:[#allocation17_spill] sm:$0xff] }
 0x139   :  { %2745 = vrcp.f32 %v685_v28  ;;  %815 = vmatprep.subr.bf16.mxu0 %v3366_v34  ;;  %856 = vmatprep.subr.bf16.mxu1 %v3404_v40  ;;  %v2742_v12 = vpop.eup %2741  ;;  %v692_v16 = vadd.f32 1.0, %v2740_v30  ;;  %v5079_v28 = vld [vmem:[#allocation23_spill] sm:$0xff]  ;;  %v5080_v30 = vld [vmem:[#allocation18_spill] sm:$0xff] }
 0x13a   :  { %845 = vmatprep.mubr.bf16.mxu0 %v5058_v58  ;;  %886 = vmatprep.mubr.bf16.mxu1 %v5058_v58 }
 0x13b   :  { %2747 = vrcp.f32 %v692_v16  ;;  %v5083_v16 = vld [vmem:[#allocation27_spill] sm:$0xff] }
 0x13c   :  { %816 = vmatpush1.bf16.msra.mxu0 %v3385_v37  ;;  %857 = vmatpush1.bf16.msra.mxu1 %v3423_v43 }
 0x13d   :  { %817 = vmatprep.subr.bf16.mxu0 %v3390_v38  ;;  %858 = vmatprep.subr.bf16.mxu1 %v3429_v44 }
 0x140   :  { %818 = vmatpush1.bf16.msra.mxu0 %v3410_v41  ;;  %859 = vmatpush1.bf16.msra.mxu1 %v3448_v47 }
 0x141   :  { %819 = vmatprep.subr.bf16.mxu0 %v3415_v42  ;;  %860 = vmatprep.subr.bf16.mxu1 %v3454_v48 }
 0x142   :  { %v2744_v8 = vpop.eup %2743 }
 0x143   :  { %v2746_v22 = vpop.eup %2745  ;;  %v696_v32 = vmul.f32 %v2744_v8, %v2742_v12  ;;  %v5081_v12 = vld [vmem:[#allocation24_spill] sm:$0xff]  ;;  %v5082_v8 = vld [vmem:[#allocation21_spill] sm:$0xff] }
 0x144   :  { %v695_v36 = vmul.f32 0.0, %v2746_v22  ;;  %820 = vmatpush1.bf16.msra.mxu0 %v3436_v45  ;;  %861 = vmatpush1.bf16.msra.mxu1 %v3472_v51  ;;  %v5084_v22 = vld [vmem:[#allocation22_spill] sm:$0xff] }
 0x145   :  { %821 = vmatprep.subr.bf16.mxu0 %v3442_v46  ;;  %862 = vmatprep.subr.bf16.mxu1 %v3478_v52  ;;  %v2748_v29 = vpop.eup %2747 }
 0x146   :  { %v3660_v25 = vadd.f32 %v696_v32, %v695_v36  ;;  %v5085_v32 = vld [vmem:[#allocation28_spill] sm:$0xff]  ;;  %v5086_v36 = vld [vmem:[#allocation25_spill] sm:$0xff] }
 0x148   :  { %2749 = vtanh.f32 %v3660_v25  ;;  %822 = vmatpush1.bf16.msra.mxu0 %v3460_v49  ;;  %863 = vmatpush1.bf16.msra.mxu1 %v3496_v55 }
 0x149   :  { %823 = vmatprep.subr.bf16.mxu0 %v3466_v50  ;;  %864 = vmatprep.subr.bf16.mxu1 %v3502_v56 }
 0x14c   :  { %824 = vmatpush1.bf16.msra.mxu0 %v3484_v53  ;;  %865 = vmatpush1.bf16.msra.mxu1 %v3520_v59 }
 0x14d   :  { %825 = vmatprep.subr.bf16.mxu0 %v3490_v54  ;;  %866 = vmatprep.subr.bf16.mxu1 %v3526_v60 }
 0x150   :  { %826 = vmatpush1.bf16.msra.mxu0 %v3508_v57  ;;  %867 = vmatpush1.bf16.msra.mxu1 %v3539_v62 }
 0x151   :  { %827 = vmatprep.subr.bf16.mxu0 %v5063_v35  ;;  %868 = vmatprep.subr.bf16.mxu1 %v3545_v63 }
 0x152   :  { %v2750_v17 = vpop.eup %2749 }
 0x153   :  { %v699_v31 = vmul.f32 %v2750_v17, %v2748_v29  ;;  %v5087_v29 = vld [vmem:[#allocation29_spill] sm:$0xff]  ;;  %v5088_v17 = vld [vmem:[#allocation26_spill] sm:$0xff] }
 0x154   :  { %828 = vmatpush1.bf16.msra.mxu0 %v3532_v61  ;;  %869 = vmatpush1.bf16.msra.mxu1 %v3552_v0 }
 0x155   :  { %2539 = vst [vmem:[%s4928_s4 + $0x78] sm:$0xff] %v699_v31  ;;  %v812_v24 = vpack.c.bf16 %v699_v31, %v699_v31  ;;  %963 = vmatprep.subr.bf16.mxu0 %v3171_v1  ;;  %1004 = vmatprep.subr.bf16.mxu1 %v3199_v6  ;;  %v5064_v1 = vld [vmem:[#allocation5_spill] sm:$0xff]  ;;  %v5065_v6 = vld [vmem:[#allocation10_spill] sm:$0xff] }
 0x156   :  { %v5089_v31 = vld [vmem:[#allocation30_spill] sm:$0xff] }
 0x157   :  { %846 = vmatmul.mubr.bf16.vlgmr.msra.gmra.mrb[12].mxu0 %v812_v24  ;;  %887 = vmatmul.mubr.bf16.vlgmr.msra.gmra.mrb[12].mxu1 %v812_v24  ;;  %v2540_v24 = vld [vmem:[%s4924_s0 + $0x10] sm:$0xff] }
 0x158   :  { %964 = vmatpush1.bf16.msra.mxu0 %v3176_v2  ;;  %1005 = vmatpush1.bf16.msra.mxu1 %v3204_v7  ;;  %v5067_v2 = vld [vmem:[#allocation11_spill] sm:$0xff] }
 0x159   :  { %965 = vmatprep.subr.bf16.mxu0 %v3182_v3  ;;  %1006 = vmatprep.subr.bf16.mxu1 %v3223_v10  ;;  %v5068_v7 = vld [vmem:[#allocation7_spill] sm:$0xff]  ;;  %v5069_v3 = vld [vmem:[#allocation12_spill] sm:$0xff] }
 0x15a   :  { %995 = vmatprep.mubr.bf16.mxu0 %v5058_v58  ;;  %1036 = vmatprep.mubr.bf16.mxu1 %v5058_v58  ;;  %v5070_v10 = vld [vmem:[#allocation8_spill] sm:$0xff] }
 0x15c   :  { %966 = vmatpush1.bf16.msra.mxu0 %v3188_v4  ;;  %1007 = vmatpush1.bf16.msra.mxu1 %v3228_v11  ;;  %v5073_v4 = vld [vmem:[#allocation16_spill] sm:$0xff]  ;;  %v5074_v11 = vld [vmem:[#allocation13_spill] sm:$0xff] }
 0x15d   :  { %967 = vmatprep.subr.bf16.mxu0 %v5064_v1  ;;  %1008 = vmatprep.subr.bf16.mxu1 %v5065_v6  ;;  %v706_v1 = vunpack.c.l.bf16 %v2540_v24  ;;  %v707_v6 = vunpack.c.h.bf16 %v2540_v24 }
 0x160   :  { %968 = vmatpush1.bf16.msra.mxu0 %v5066_v18  ;;  %1009 = vmatpush1.bf16.msra.mxu1 %v5067_v2  ;;  %v5090_v18 = vld [vmem:[#allocation32_spill] sm:$0xff] }
 0x161   :  { %969 = vmatprep.subr.bf16.mxu0 %v5068_v7  ;;  %1010 = vmatprep.subr.bf16.mxu1 %v5069_v3  ;;  %v710_v2 = vadd.f32 %v706_v1, %v5090_v18  ;;  %v2541_v7 = vld [vmem:[%s4924_s0 + $0x18] sm:$0xff]  ;;  %v5091_v3 = vld [vmem:[#allocation33_spill] sm:$0xff] }
 0x162   :  { %v708_v18 = vunpack.c.l.bf16 %v2541_v7 }
 0x164   :  { %970 = vmatpush1.bf16.msra.mxu0 %v5070_v10  ;;  %1011 = vmatpush1.bf16.msra.mxu1 %v5071_v13  ;;  %v711_v10 = vadd.f32 %v707_v6, %v5091_v3  ;;  %v5092_v6 = vld [vmem:[#allocation34_spill] sm:$0xff] }
 0x165   :  { %971 = vmatprep.subr.bf16.mxu0 %v5072_v15  ;;  %1012 = vmatprep.subr.bf16.mxu1 %v5073_v4  ;;  %v709_v4 = vunpack.c.h.bf16 %v2541_v7  ;;  %v712_v3 = vadd.f32 %v708_v18, %v5092_v6 }
 0x167   :  { %v713_v1 = vadd.f32 %v709_v4, %v3611_v23 }
 0x168   :  { %972 = vmatpush1.bf16.msra.mxu0 %v5074_v11  ;;  %1013 = vmatpush1.bf16.msra.mxu1 %v5075_v14 }
 0x169   :  { %973 = vmatprep.subr.bf16.mxu0 %v5076_v5  ;;  %1014 = vmatprep.subr.bf16.mxu1 %v5077_v20 }
 0x16c   :  { %974 = vmatpush1.bf16.msra.mxu0 %v5078_v19  ;;  %1015 = vmatpush1.bf16.msra.mxu1 %v5079_v28 }
 0x16d   :  { %975 = vmatprep.subr.bf16.mxu0 %v5080_v30  ;;  %1016 = vmatprep.subr.bf16.mxu1 %v5081_v12 }
 0x170   :  { %976 = vmatpush1.bf16.msra.mxu0 %v5082_v8  ;;  %1017 = vmatpush1.bf16.msra.mxu1 %v5083_v16 }
 0x171   :  { %977 = vmatprep.subr.bf16.mxu0 %v5084_v22  ;;  %1018 = vmatprep.subr.bf16.mxu1 %v5085_v32 }
 0x174   :  { %978 = vmatpush1.bf16.msra.mxu0 %v5086_v36  ;;  %1019 = vmatpush1.bf16.msra.mxu1 %v5087_v29 }
 0x175   :  { %1061 = vmatprep.subr.bf16.mxu0 %v5088_v17  ;;  %1102 = vmatprep.subr.bf16.mxu1 %v5089_v31 }
 0x20a   :  { %v749_v13 = vpop.f32.mrb[8].mxu0  ;;  %v790_v15 = vpop.f32.mrb[8].mxu1 }
 0x20b   :  { %v797_v11 = vadd.f32 %v749_v13, %v710_v2  ;;  %v751_v5 = vpop.f32.mrb[9].mxu0  ;;  %v792_v19 = vpop.f32.mrb[9].mxu1  ;;  %v799_v8 = vadd.f32 %v790_v15, %v712_v3 }
 0x20c   :  { %v798_v30 = vadd.f32 %v751_v5, %v711_v10  ;;  %v753_v31 = vpop.f32.mrb[10].mxu0  ;;  %v794_v17 = vpop.f32.mrb[10].mxu1  ;;  %v800_v22 = vadd.f32 %v792_v19, %v713_v1 }
 0x20d   :  { %v2544_v29 = vmul.f32 -1.442695, %v797_v11  ;;  %v754_v36 = vpop.f32.mrb[11].mxu0  ;;  %v795_v24 = vpop.f32.mrb[11].mxu1 }
 0x20e   :  { %v2545_v32 = vmul.f32 -1.442695, %v798_v30  ;;  %v2546_v16 = vmul.f32 -1.442695, %v800_v22  ;;  %v2542_v36 = vld [vmem:[%s4925_s1 + $0x60] sm:$0xff] }
 0x20f   :  { %2751 = vpow2.f32 %v2544_v29  ;;  %v804_v29 = vunpack.c.l.bf16 %v2542_v36 }
 0x210   :  { %2753 = vpow2.f32 %v2545_v32  ;;  %v805_v32 = vunpack.c.h.bf16 %v2542_v36 }
 0x211   :  { %2755 = vpow2.f32 %v2546_v16  ;;  %v808_v15 = vadd.f32 %v804_v29, %v3621_v26  ;;  %v5093_v16 = vld [vmem:[#allocation35_spill] sm:$0xff] }
 0x212   :  { %2757 = vtanh.f32 %v799_v8  ;;  %v2543_v8 = vld [vmem:[%s4925_s1 + $0x68] sm:$0xff]  ;;  %v809_v4 = vadd.f32 %v805_v32, %v5093_v16 }
 0x213   :  { %v807_v30 = vunpack.c.h.bf16 %v2543_v8 }
 0x215   :  { %v811_v32 = vadd.f32 %v807_v30, %v3630_v27  ;;  %v5111_v30 = vld [vmem:[#allocation24_spill] sm:$0xff] }
 0x219   :  { %v2752_v2 = vpop.eup %2751 }
 0x21a   :  { %v2754_v13 = vpop.eup %2753  ;;  %v902_v12 = vadd.f32 1.0, %v2752_v2 }
 0x21b   :  { %v908_v17 = vadd.f32 1.0, %v2754_v13  ;;  %v2756_v31 = vpop.eup %2755 }
 0x21c   :  { %2759 = vrcp.f32 %v902_v12  ;;  %v2758_v7 = vpop.eup %2757  ;;  %v915_v3 = vadd.f32 1.0, %v2756_v31 }
 0x21d   :  { %2761 = vrcp.f32 %v908_v17 }
 0x21e   :  { %2763 = vrcp.f32 %v915_v3 }
 0x226   :  { %v2760_v10 = vpop.eup %2759 }
 0x227   :  { %v2762_v18 = vpop.eup %2761  ;;  %v919_v22 = vmul.f32 %v2760_v10, %v2758_v7  ;;  %v806_v10 = vunpack.c.l.bf16 %v2543_v8 }
 0x228   :  { %v918_v12 = vmul.f32 %v2762_v18, %v3632_v9  ;;  %v2764_v3 = vpop.eup %2763 }
 0x22a   :  { %v3735_v11 = vadd.f32 %v919_v22, %v918_v12  ;;  %v847_v5 = vpop.f32.mrb[12].mxu0  ;;  %v888_v19 = vpop.f32.mrb[12].mxu1  ;;  %v810_v22 = vadd.f32 %v806_v10, %v3636_v21 }
 0x22b   :  { %v895_v24 = vadd.f32 %v847_v5, %v808_v15  ;;  %v849_v1 = vpop.f32.mrb[13].mxu0  ;;  %v890_v2 = vpop.f32.mrb[13].mxu1 }
 0x22c   :  { %2765 = vtanh.f32 %v3735_v11  ;;  %v896_v13 = vadd.f32 %v849_v1, %v809_v4  ;;  %v851_v17 = vpop.f32.mrb[14].mxu0  ;;  %v892_v36 = vpop.f32.mrb[14].mxu1  ;;  %v898_v18 = vadd.f32 %v890_v2, %v811_v32  ;;  %v897_v5 = vadd.f32 %v888_v19, %v810_v22  ;;  %v3909_v19 = vld [vmem:[%s4927_s3 + $0xa0] ss:$16 sps:$4 sm:$0xff]   ;;  %v5112_v2 = vld [vmem:[#allocation21_spill] sm:$0xff] }
 0x22d   :  { %v2547_v29 = vmul.f32 -1.442695, %v895_v24  ;;  %v852_v31 = vpop.f32.mrb[15].mxu0  ;;  %v893_v7 = vpop.f32.mrb[15].mxu1  ;;  %5109 = vst [vmem:[#allocation17_spill] sm:$0xff] %v3909_v19  ;;  %v5114_v17 = vld [vmem:[#allocation22_spill] sm:$0xff] }
 0x22e   :  { %v2548_v9 = vmul.f32 -1.442695, %v896_v13  ;;  %v2549_v12 = vmul.f32 -1.442695, %v898_v18  ;;  %v5115_v36 = vld [vmem:[#allocation28_spill] sm:$0xff]  ;;  %v5118_v31 = vld [vmem:[#allocation26_spill] sm:$0xff] }
 0x22f   :  { %2767 = vpow2.f32 %v2547_v29  ;;  %v5116_v29 = vld [vmem:[#allocation25_spill] sm:$0xff]  ;;  %v5119_v7 = vld [vmem:[#allocation30_spill] sm:$0xff]  ;;  %v5120_v18 = vld [vmem:[#allocation32_spill] sm:$0xff] }
 0x230   :  { %2769 = vpow2.f32 %v2548_v9  ;;  %v2552_v9 = vld [vmem:[%s4924_s0 + $0x20] sm:$0xff] }
 0x231   :  { %2771 = vpow2.f32 %v2549_v12  ;;  %v954_v32 = vunpack.c.l.bf16 %v2552_v9  ;;  %v955_v10 = vunpack.c.h.bf16 %v2552_v9 }
 0x232   :  { %2773 = vtanh.f32 %v897_v5 }
 0x233   :  { %v958_v22 = vadd.f32 %v954_v32, %v5120_v18 }
 0x236   :  { %v2766_v15 = vpop.eup %2765 }
 0x237   :  { %v922_v16 = vmul.f32 %v2766_v15, %v2764_v3  ;;  %v2553_v3 = vld [vmem:[%s4924_s0 + $0x28] sm:$0xff] }
 0x238   :  { %v5121_v15 = vld [vmem:[#allocation33_spill] sm:$0xff] }
 0x239   :  { %v2768_v4 = vpop.eup %2767  ;;  %2550 = vst [vmem:[%s4928_s4 + $0x10] sm:$0xff] %v922_v16  ;;  %v962_v24 = vpack.c.bf16 %v922_v16, %v922_v16  ;;  %v959_v12 = vadd.f32 %v955_v10, %v5121_v15 }
 0x23a   :  { %v2770_v1 = vpop.eup %2769  ;;  %v926_v13 = vadd.f32 1.0, %v2768_v4 }
 0x23b   :  { %v932_v8 = vadd.f32 1.0, %v2770_v1  ;;  %996 = vmatmul.mubr.bf16.vlgmr.msra.gmra.mrb[16].mxu0 %v962_v24  ;;  %1037 = vmatmul.mubr.bf16.vlgmr.msra.gmra.mrb[16].mxu1 %v962_v24  ;;  %v957_v24 = vunpack.c.h.bf16 %v2553_v3 }
 0x23c   :  { %2775 = vrcp.f32 %v926_v13  ;;  %1062 = vmatpush1.bf16.msra.mxu0 %v3360_v33  ;;  %1103 = vmatpush1.bf16.msra.mxu1 %v3398_v39  ;;  %v2772_v33 = vpop.eup %2771 }
 0x23d   :  { %2777 = vrcp.f32 %v932_v8  ;;  %1063 = vmatprep.subr.bf16.mxu0 %v3366_v34  ;;  %1104 = vmatprep.subr.bf16.mxu1 %v3404_v40  ;;  %v2774_v34 = vpop.eup %2773 }
 0x23e   :  { %1093 = vmatprep.mubr.bf16.mxu0 %v5058_v58  ;;  %1134 = vmatprep.mubr.bf16.mxu1 %v5058_v58 }
 0x240   :  { %1064 = vmatpush1.bf16.msra.mxu0 %v3385_v37  ;;  %1105 = vmatpush1.bf16.msra.mxu1 %v3423_v43  ;;  %v939_v37 = vadd.f32 1.0, %v2772_v33 }
 0x241   :  { %1065 = vmatprep.subr.bf16.mxu0 %v3390_v38  ;;  %1106 = vmatprep.subr.bf16.mxu1 %v3429_v44 }
 0x242   :  { %2779 = vrcp.f32 %v939_v37 }
 0x244   :  { %1066 = vmatpush1.bf16.msra.mxu0 %v3410_v41  ;;  %1107 = vmatpush1.bf16.msra.mxu1 %v3448_v47  ;;  %v3791_v47 = vld [vmem:[%s4927_s3 + $0xc] ss:$16 sps:$4 sm:$0xff]  }
 0x245   :  { %1067 = vmatprep.subr.bf16.mxu0 %v3415_v42  ;;  %1108 = vmatprep.subr.bf16.mxu1 %v3454_v48  ;;  %v3803_v48 = vld [vmem:[%s4927_s3 + $0x8] ss:$16 sps:$4 sm:$0xff]  }
 0x246   :  { %v2776_v39 = vpop.eup %2775 }
 0x247   :  { %v2778_v40 = vpop.eup %2777  ;;  %v943_v16 = vmul.f32 %v2776_v39, %v2774_v34 }
 0x248   :  { %v942_v43 = vmul.f32 %v2778_v40, %v3660_v25  ;;  %1068 = vmatpush1.bf16.msra.mxu0 %v3436_v45  ;;  %1109 = vmatpush1.bf16.msra.mxu1 %v3472_v51  ;;  %v3823_v51 = vld [vmem:[%s4927_s3 + $0x20] ss:$16 sps:$4 sm:$0xff]  }
 0x249   :  { %1069 = vmatprep.subr.bf16.mxu0 %v3442_v46  ;;  %1110 = vmatprep.subr.bf16.mxu1 %v3478_v52  ;;  %v3785_v46 = vld [vmem:[%s4927_s3 + $0x4] ss:$16 sps:$4 sm:$0xff]   ;;  %5095 = vst [vmem:[#allocation5_spill] sm:$0xff] %v3823_v51  ;;  %v3829_v52 = vld [vmem:[%s4927_s3 + $0x28] ss:$16 sps:$4 sm:$0xff]  }
 0x24a   :  { %v3762_v38 = vadd.f32 %v943_v16, %v942_v43  ;;  %5096 = vst [vmem:[#allocation10_spill] sm:$0xff] %v3829_v52  ;;  %v3895_v25 = vld [vmem:[%s4927_s3 + $0x80] ss:$16 sps:$4 sm:$0xff]  }
 0x24b   :  { %5107 = vst [vmem:[#allocation14_spill] sm:$0xff] %v3895_v25 }
 0x24c   :  { %2781 = vtanh.f32 %v3762_v38  ;;  %1070 = vmatpush1.bf16.msra.mxu0 %v3460_v49  ;;  %1111 = vmatpush1.bf16.msra.mxu1 %v3496_v55  ;;  %v2780_v41 = vpop.eup %2779  ;;  %v3809_v49 = vld [vmem:[%s4927_s3 + $0x24] ss:$16 sps:$4 sm:$0xff]   ;;  %v3847_v55 = vld [vmem:[%s4927_s3 + $0x40] ss:$16 sps:$4 sm:$0xff]  }
 0x24d   :  { %1071 = vmatprep.subr.bf16.mxu0 %v3466_v50  ;;  %1112 = vmatprep.subr.bf16.mxu1 %v3502_v56  ;;  %v3815_v50 = vld [vmem:[%s4927_s3 + $0x2c] ss:$16 sps:$4 sm:$0xff]   ;;  %5099 = vst [vmem:[#allocation7_spill] sm:$0xff] %v3847_v55  ;;  %v3853_v56 = vld [vmem:[%s4927_s3 + $0x48] ss:$16 sps:$4 sm:$0xff]  }
 0x24e   :  { %5094 = vst [vmem:[#allocation31_spill] sm:$0xff] %v3815_v50  ;;  %5100 = vst [vmem:[#allocation12_spill] sm:$0xff] %v3853_v56 }
 0x250   :  { %1072 = vmatpush1.bf16.msra.mxu0 %v3484_v53  ;;  %1113 = vmatpush1.bf16.msra.mxu1 %v3520_v59  ;;  %v3835_v53 = vld [vmem:[%s4927_s3 + $0x44] ss:$16 sps:$4 sm:$0xff]   ;;  %v3865_v59 = vld [vmem:[%s4927_s3 + $0x6c] ss:$16 sps:$4 sm:$0xff]  }
 0x251   :  { %1073 = vmatprep.subr.bf16.mxu0 %v3490_v54  ;;  %1114 = vmatprep.subr.bf16.mxu1 %v3526_v60  ;;  %5097 = vst [vmem:[#allocation6_spill] sm:$0xff] %v3835_v53  ;;  %v3841_v54 = vld [vmem:[%s4927_s3 + $0x4c] ss:$16 sps:$4 sm:$0xff]   ;;  %5102 = vst [vmem:[#allocation15_spill] sm:$0xff] %v3865_v59  ;;  %v3871_v60 = vld [vmem:[%s4927_s3 + $0x60] ss:$16 sps:$4 sm:$0xff]  }
 0x252   :  { %5098 = vst [vmem:[#allocation11_spill] sm:$0xff] %v3841_v54  ;;  %5103 = vst [vmem:[#allocation9_spill] sm:$0xff] %v3871_v60 }
 0x254   :  { %1074 = vmatpush1.bf16.msra.mxu0 %v3508_v57  ;;  %1115 = vmatpush1.bf16.msra.mxu1 %v3539_v62  ;;  %v3859_v57 = vld [vmem:[%s4927_s3 + $0x64] ss:$16 sps:$4 sm:$0xff]  }
 0x255   :  { %1075 = vmatprep.subr.bf16.mxu0 %v5063_v35  ;;  %1116 = vmatprep.subr.bf16.mxu1 %v3545_v63  ;;  %5101 = vst [vmem:[#allocation8_spill] sm:$0xff] %v3859_v57  ;;  %v3883_v62 = vld [vmem:[%s4927_s3 + $0x84] ss:$16 sps:$4 sm:$0xff]   ;;  %v3889_v63 = vld [vmem:[%s4927_s3 + $0x8c] ss:$16 sps:$4 sm:$0xff]  }
 0x256   :  { %v2782_v42 = vpop.eup %2781  ;;  %5105 = vst [vmem:[#allocation13_spill] sm:$0xff] %v3883_v62  ;;  %5106 = vst [vmem:[#allocation19_spill] sm:$0xff] %v3889_v63  ;;  %v3902_v35 = vld [vmem:[%s4927_s3 + $0xa4] ss:$16 sps:$4 sm:$0xff]  }
 0x257   :  { %v946_v44 = vmul.f32 %v2782_v42, %v2780_v41  ;;  %5108 = vst [vmem:[#allocation20_spill] sm:$0xff] %v3902_v35  ;;  %v961_v41 = vadd.f32 %v957_v24, %v3611_v23  ;;  %v956_v42 = vunpack.c.l.bf16 %v2553_v3 }
 0x258   :  { %1076 = vmatpush1.bf16.msra.mxu0 %v3532_v61  ;;  %1117 = vmatpush1.bf16.msra.mxu1 %v3552_v0  ;;  %v3797_v0 = vld [vmem:[%s4927_s3] ss:$16 sps:$4 sm:$0xff]   ;;  %v3877_v61 = vld [vmem:[%s4927_s3 + $0x68] ss:$16 sps:$4 sm:$0xff]  }
 0x259   :  { %2551 = vst [vmem:[%s4928_s4 + $0x68] sm:$0xff] %v946_v44  ;;  %v1060_v45 = vpack.c.bf16 %v946_v44, %v946_v44  ;;  %1211 = vmatprep.subr.bf16.mxu0 %v3785_v46  ;;  %1252 = vmatprep.subr.bf16.mxu1 %v3791_v47  ;;  %5104 = vst [vmem:[#allocation16_spill] sm:$0xff] %v3877_v61 }
 0x25b   :  { %1094 = vmatmul.mubr.bf16.vlgmr.msra.gmra.mrb[20].mxu0 %v1060_v45  ;;  %1135 = vmatmul.mubr.bf16.vlgmr.msra.gmra.mrb[20].mxu1 %v1060_v45  ;;  %v960_v45 = vadd.f32 %v956_v42, %v5092_v6 }
 0x25c   :  { %1212 = vmatpush1.bf16.msra.mxu0 %v3797_v0  ;;  %1253 = vmatpush1.bf16.msra.mxu1 %v3803_v48 }
 0x25d   :  { %1213 = vmatprep.subr.bf16.mxu0 %v3809_v49  ;;  %1254 = vmatprep.subr.bf16.mxu1 %v3815_v50 }
 0x25e   :  { %1243 = vmatprep.mubr.bf16.mxu0 %v5058_v58  ;;  %1284 = vmatprep.mubr.bf16.mxu1 %v5058_v58 }
 0x260   :  { %1214 = vmatpush1.bf16.msra.mxu0 %v3823_v51  ;;  %1255 = vmatpush1.bf16.msra.mxu1 %v3829_v52 }
 0x261   :  { %1215 = vmatprep.subr.bf16.mxu0 %v3835_v53  ;;  %1256 = vmatprep.subr.bf16.mxu1 %v3841_v54 }
 0x264   :  { %1216 = vmatpush1.bf16.msra.mxu0 %v3847_v55  ;;  %1257 = vmatpush1.bf16.msra.mxu1 %v3853_v56 }
 0x265   :  { %1217 = vmatprep.subr.bf16.mxu0 %v3859_v57  ;;  %1258 = vmatprep.subr.bf16.mxu1 %v3865_v59 }
 0x268   :  { %1218 = vmatpush1.bf16.msra.mxu0 %v3871_v60  ;;  %1259 = vmatpush1.bf16.msra.mxu1 %v3877_v61 }
 0x269   :  { %1219 = vmatprep.subr.bf16.mxu0 %v3883_v62  ;;  %1260 = vmatprep.subr.bf16.mxu1 %v3889_v63 }
 0x26c   :  { %1220 = vmatpush1.bf16.msra.mxu0 %v3895_v25  ;;  %1261 = vmatpush1.bf16.msra.mxu1 %v5075_v14  ;;  %v3916_v14 = vld [vmem:[%s4927_s3 + $0xc4] ss:$16 sps:$4 sm:$0xff]  }
 0x26d   :  { %1221 = vmatprep.subr.bf16.mxu0 %v3902_v35  ;;  %1262 = vmatprep.subr.bf16.mxu1 %v5077_v20  ;;  %5110 = vst [vmem:[#allocation23_spill] sm:$0xff] %v3916_v14  ;;  %v5113_v20 = vld [vmem:[#allocation27_spill] sm:$0xff] }
 0x270   :  { %1222 = vmatpush1.bf16.msra.mxu0 %v3909_v19  ;;  %1263 = vmatpush1.bf16.msra.mxu1 %v5079_v28  ;;  %v5117_v28 = vld [vmem:[#allocation29_spill] sm:$0xff] }
 0x271   :  { %1223 = vmatprep.subr.bf16.mxu0 %v3916_v14  ;;  %1264 = vmatprep.subr.bf16.mxu1 %v5111_v30 }
 0x274   :  { %1224 = vmatpush1.bf16.msra.mxu0 %v5112_v2  ;;  %1265 = vmatpush1.bf16.msra.mxu1 %v5113_v20 }
 0x275   :  { %1225 = vmatprep.subr.bf16.mxu0 %v5114_v17  ;;  %1266 = vmatprep.subr.bf16.mxu1 %v5115_v36 }
 0x278   :  { %1226 = vmatpush1.bf16.msra.mxu0 %v5116_v29  ;;  %1267 = vmatpush1.bf16.msra.mxu1 %v5117_v28  ;;  %v2554_v28 = vld [vmem:[%s4925_s1 + $0x50] sm:$0xff] }
 0x279   :  { %1309 = vmatprep.subr.bf16.mxu0 %v5118_v31  ;;  %1350 = vmatprep.subr.bf16.mxu1 %v5119_v7  ;;  %v1052_v31 = vunpack.c.l.bf16 %v2554_v28  ;;  %v1053_v9 = vunpack.c.h.bf16 %v2554_v28 }
 0x30e   :  { %v997_v5 = vpop.f32.mrb[16].mxu0  ;;  %v1038_v4 = vpop.f32.mrb[16].mxu1 }
 0x30f   :  { %v1045_v1 = vadd.f32 %v997_v5, %v958_v22  ;;  %v999_v13 = vpop.f32.mrb[17].mxu0  ;;  %v1040_v8 = vpop.f32.mrb[17].mxu1  ;;  %v1047_v2 = vadd.f32 %v1038_v4, %v960_v45  ;;  %v1056_v5 = vadd.f32 %v1052_v31, %v3621_v26  ;;  %v2555_v4 = vld [vmem:[%s4925_s1 + $0x58] sm:$0xff] }
 0x310   :  { %v1046_v33 = vadd.f32 %v999_v13, %v959_v12  ;;  %v1001_v34 = vpop.f32.mrb[18].mxu0  ;;  %v1042_v39 = vpop.f32.mrb[18].mxu1  ;;  %v1048_v44 = vadd.f32 %v1040_v8, %v961_v41 }
 0x311   :  { %v2556_v40 = vmul.f32 -1.442695, %v1045_v1  ;;  %v1002_v16 = vpop.f32.mrb[19].mxu0  ;;  %v1043_v37 = vpop.f32.mrb[19].mxu1  ;;  %v5122_v1 = vld [vmem:[#allocation35_spill] sm:$0xff]  ;;  %v1055_v39 = vunpack.c.h.bf16 %v2555_v4 }
 0x312   :  { %v2557_v43 = vmul.f32 -1.442695, %v1046_v33  ;;  %v2558_v30 = vmul.f32 -1.442695, %v1048_v44  ;;  %v1057_v13 = vadd.f32 %v1053_v9, %v5122_v1 }
 0x313   :  { %2783 = vpow2.f32 %v2556_v40 }
 0x314   :  { %2785 = vpow2.f32 %v2557_v43 }
 0x315   :  { %2787 = vpow2.f32 %v2558_v30 }
 0x316   :  { %2789 = vtanh.f32 %v1047_v2  ;;  %v1059_v2 = vadd.f32 %v1055_v39, %v3630_v27  ;;  %v3996_v39 = vld [vmem:[%s4927_s3 + $0x144] ss:$16 sps:$4 sm:$0xff]  }
 0x31d   :  { %v2784_v20 = vpop.eup %2783 }
 0x31e   :  { %v2786_v17 = vpop.eup %2785  ;;  %v1150_v36 = vadd.f32 1.0, %v2784_v20  ;;  %v1054_v20 = vunpack.c.l.bf16 %v2555_v4  ;;  %v3964_v4 = vld [vmem:[%s4927_s3 + $0x108] ss:$16 sps:$4 sm:$0xff]  }
 0x31f   :  { %v1156_v29 = vadd.f32 1.0, %v2786_v17  ;;  %v2788_v7 = vpop.eup %2787 }
 0x320   :  { %2791 = vrcp.f32 %v1150_v36  ;;  %v2790_v32 = vpop.eup %2789  ;;  %v1163_v12 = vadd.f32 1.0, %v2788_v7  ;;  %v1058_v36 = vadd.f32 %v1054_v20, %v3636_v21 }
 0x321   :  { %2793 = vrcp.f32 %v1156_v29 }
 0x322   :  { %2795 = vrcp.f32 %v1163_v12 }
 0x32a   :  { %v2792_v10 = vpop.eup %2791 }
 0x32b   :  { %v2794_v22 = vpop.eup %2793  ;;  %v1167_v3 = vmul.f32 %v2792_v10, %v2790_v32 }
 0x32c   :  { %v1166_v24 = vmul.f32 %v2794_v22, %v3735_v11  ;;  %v2796_v29 = vpop.eup %2795 }
 0x32e   :  { %v3947_v8 = vadd.f32 %v1167_v3, %v1166_v24  ;;  %v1095_v33 = vpop.f32.mrb[20].mxu0  ;;  %v1136_v34 = vpop.f32.mrb[20].mxu1  ;;  %v3970_v24 = vld [vmem:[%s4927_s3 + $0x124] ss:$16 sps:$4 sm:$0xff]  }
 0x32f   :  { %v1143_v40 = vadd.f32 %v1095_v33, %v1056_v5  ;;  %v1097_v16 = vpop.f32.mrb[21].mxu0  ;;  %v1138_v37 = vpop.f32.mrb[21].mxu1  ;;  %v1145_v7 = vadd.f32 %v1136_v34, %v1058_v36  ;;  %v3958_v5 = vld [vmem:[%s4927_s3 + $0x100] ss:$16 sps:$4 sm:$0xff]   ;;  %v3990_v34 = vld [vmem:[%s4927_s3 + $0x128] ss:$16 sps:$4 sm:$0xff]  }
 0x330   :  { %2797 = vtanh.f32 %v3947_v8  ;;  %v1144_v43 = vadd.f32 %v1097_v16, %v1057_v13  ;;  %v1099_v41 = vpop.f32.mrb[22].mxu0  ;;  %v1140_v42 = vpop.f32.mrb[22].mxu1  ;;  %v1146_v17 = vadd.f32 %v1138_v37, %v1059_v2  ;;  %v3976_v13 = vld [vmem:[%s4927_s3 + $0x12c] ss:$16 sps:$4 sm:$0xff]   ;;  %v3984_v33 = vld [vmem:[%s4927_s3 + $0x120] ss:$16 sps:$4 sm:$0xff]  }
 0x331   :  { %v2559_v44 = vmul.f32 -1.442695, %v1143_v40  ;;  %v1100_v45 = vpop.f32.mrb[23].mxu0  ;;  %v1141_v30 = vpop.f32.mrb[23].mxu1  ;;  %v4002_v40 = vld [vmem:[%s4927_s3 + $0x14c] ss:$16 sps:$4 sm:$0xff]  }
 0x332   :  { %v2560_v11 = vmul.f32 -1.442695, %v1144_v43  ;;  %v2561_v31 = vmul.f32 -1.442695, %v1146_v17  ;;  %v4008_v37 = vld [vmem:[%s4927_s3 + $0x140] ss:$16 sps:$4 sm:$0xff]  }
 0x333   :  { %2799 = vpow2.f32 %v2559_v44  ;;  %v4014_v43 = vld [vmem:[%s4927_s3 + $0x148] ss:$16 sps:$4 sm:$0xff]   ;;  %v4020_v42 = vld [vmem:[%s4927_s3 + $0x164] ss:$16 sps:$4 sm:$0xff]   ;;  %v4026_v44 = vld [vmem:[%s4927_s3 + $0x16c] ss:$16 sps:$4 sm:$0xff]  }
 0x334   :  { %2801 = vpow2.f32 %v2560_v11  ;;  %v4033_v17 = vld [vmem:[%s4927_s3 + $0x160] ss:$16 sps:$4 sm:$0xff]   ;;  %v4039_v36 = vld [vmem:[%s4927_s3 + $0x168] ss:$16 sps:$4 sm:$0xff]  }
 0x335   :  { %2803 = vpow2.f32 %v2561_v31  ;;  %v4060_v31 = vld [vmem:[%s4927_s3 + $0x180] ss:$16 sps:$4 sm:$0xff]  }
 0x336   :  { %2805 = vtanh.f32 %v1145_v7  ;;  %v4066_v7 = vld [vmem:[%s4927_s3 + $0x188] ss:$16 sps:$4 sm:$0xff]  }
 0x33a   :  { %v2798_v28 = vpop.eup %2797 }
 0x33b   :  { %v1170_v9 = vmul.f32 %v2798_v28, %v2796_v29  ;;  %v4045_v29 = vld [vmem:[%s4927_s3 + $0x184] ss:$16 sps:$4 sm:$0xff]  }
 0x33d   :  { %v2800_v32 = vpop.eup %2799  ;;  %2562 = vst [vmem:[%s4928_s4 + $0x20] sm:$0xff] %v1170_v9  ;;  %v1210_v10 = vpack.c.bf16 %v1170_v9, %v1170_v9  ;;  %v4072_v9 = vld [vmem:[%s4927_s3 + $0x1a4] ss:$16 sps:$4 sm:$0xff]  }
 0x33e   :  { %v2802_v22 = vpop.eup %2801  ;;  %v1174_v3 = vadd.f32 1.0, %v2800_v32  ;;  %v4078_v32 = vld [vmem:[%s4927_s3 + $0x1ac] ss:$16 sps:$4 sm:$0xff]  }
 0x33f   :  { %v1180_v12 = vadd.f32 1.0, %v2802_v22  ;;  %1244 = vmatmul.mubr.bf16.vlgmr.msra.gmra.mrb[24].mxu0 %v1210_v10  ;;  %1285 = vmatmul.mubr.bf16.vlgmr.msra.gmra.mrb[24].mxu1 %v1210_v10  ;;  %v2804_v16 = vpop.eup %2803  ;;  %v4084_v10 = vld [vmem:[%s4927_s3 + $0x1a0] ss:$16 sps:$4 sm:$0xff]   ;;  %v4090_v22 = vld [vmem:[%s4927_s3 + $0x1a8] ss:$16 sps:$4 sm:$0xff]  }
 0x340   :  { %2807 = vrcp.f32 %v1174_v3  ;;  %1310 = vmatpush1.bf16.msra.mxu0 %v3958_v5  ;;  %1351 = vmatpush1.bf16.msra.mxu1 %v3964_v4  ;;  %v2806_v41 = vpop.eup %2805  ;;  %v1187_v2 = vadd.f32 1.0, %v2804_v16  ;;  %v4096_v3 = vld [vmem:[%s4927_s3 + $0x1c4] ss:$16 sps:$4 sm:$0xff]   ;;  %v4108_v16 = vld [vmem:[%s4927_s3 + $0x1c0] ss:$16 sps:$4 sm:$0xff]  }
 0x341   :  { %2809 = vrcp.f32 %v1180_v12  ;;  %1311 = vmatprep.subr.bf16.mxu0 %v3970_v24  ;;  %1352 = vmatprep.subr.bf16.mxu1 %v3976_v13  ;;  %v4102_v12 = vld [vmem:[%s4927_s3 + $0x1cc] ss:$16 sps:$4 sm:$0xff]  }
 0x342   :  { %1341 = vmatprep.mubr.bf16.mxu0 %v5058_v58  ;;  %1382 = vmatprep.mubr.bf16.mxu1 %v5058_v58  ;;  %2811 = vrcp.f32 %v1187_v2 }
 0x344   :  { %1312 = vmatpush1.bf16.msra.mxu0 %v3984_v33  ;;  %1353 = vmatpush1.bf16.msra.mxu1 %v3990_v34 }
 0x345   :  { %1313 = vmatprep.subr.bf16.mxu0 %v3996_v39  ;;  %1354 = vmatprep.subr.bf16.mxu1 %v4002_v40 }
 0x348   :  { %1314 = vmatpush1.bf16.msra.mxu0 %v4008_v37  ;;  %1355 = vmatpush1.bf16.msra.mxu1 %v4014_v43 }
 0x349   :  { %1315 = vmatprep.subr.bf16.mxu0 %v4020_v42  ;;  %1356 = vmatprep.subr.bf16.mxu1 %v4026_v44 }
 0x34a   :  { %v2808_v45 = vpop.eup %2807 }
 0x34b   :  { %v2810_v30 = vpop.eup %2809  ;;  %v1191_v11 = vmul.f32 %v2808_v45, %v2806_v41  ;;  %v4114_v41 = vld [vmem:[%s4927_s3 + $0x1c8] ss:$16 sps:$4 sm:$0xff]  }
 0x34c   :  { %v1190_v20 = vmul.f32 %v2810_v30, %v3762_v38  ;;  %1316 = vmatpush1.bf16.msra.mxu0 %v4033_v17  ;;  %1357 = vmatpush1.bf16.msra.mxu1 %v4039_v36  ;;  %v4051_v38 = vld [vmem:[%s4927_s3 + $0x18c] ss:$16 sps:$4 sm:$0xff]   ;;  %5123 = vst [vmem:[#allocation18_spill] sm:$0xff] %v4114_v41  ;;  %v2812_v45 = vpop.eup %2811  ;;  %v4120_v30 = vld [vmem:[%s4927_s3 + $0x1e4] ss:$16 sps:$4 sm:$0xff]  }
 0x34d   :  { %1317 = vmatprep.subr.bf16.mxu0 %v4045_v29  ;;  %1358 = vmatprep.subr.bf16.mxu1 %v4051_v38  ;;  %5124 = vst [vmem:[#allocation34_spill] sm:$0xff] %v4120_v30 }
 0x34e   :  { %v4054_v28 = vadd.f32 %v1191_v11, %v1190_v20  ;;  %v4126_v11 = vld [vmem:[%s4927_s3 + $0x1ec] ss:$16 sps:$4 sm:$0xff]  }
 0x34f   :  { %5125 = vst [vmem:[#allocation24_spill] sm:$0xff] %v4126_v11 }
 0x350   :  { %2813 = vtanh.f32 %v4054_v28  ;;  %1318 = vmatpush1.bf16.msra.mxu0 %v4060_v31  ;;  %1359 = vmatpush1.bf16.msra.mxu1 %v4066_v7 }
 0x351   :  { %1319 = vmatprep.subr.bf16.mxu0 %v4072_v9  ;;  %1360 = vmatprep.subr.bf16.mxu1 %v4078_v32 }
 0x354   :  { %1320 = vmatpush1.bf16.msra.mxu0 %v4084_v10  ;;  %1361 = vmatpush1.bf16.msra.mxu1 %v4090_v22 }
 0x355   :  { %1321 = vmatprep.subr.bf16.mxu0 %v4096_v3  ;;  %1362 = vmatprep.subr.bf16.mxu1 %v4102_v12 }
 0x358   :  { %1322 = vmatpush1.bf16.msra.mxu0 %v4108_v16  ;;  %1363 = vmatpush1.bf16.msra.mxu1 %v4114_v41  ;;  %v4132_v41 = vld [vmem:[%s4927_s3 + $0x1e0] ss:$16 sps:$4 sm:$0xff]  }
 0x359   :  { %1323 = vmatprep.subr.bf16.mxu0 %v4120_v30  ;;  %1364 = vmatprep.subr.bf16.mxu1 %v4126_v11  ;;  %v4138_v30 = vld [vmem:[%s4927_s3 + $0x1e8] ss:$16 sps:$4 sm:$0xff]  }
 0x35a   :  { %v2814_v2 = vpop.eup %2813 }
 0x35b   :  { %v1194_v20 = vmul.f32 %v2814_v2, %v2812_v45  ;;  %v4168_v45 = vld [vmem:[%s4927_s3 + $0x88] ss:$16 sps:$4 sm:$0xff]  }
 0x35c   :  { %1324 = vmatpush1.bf16.msra.mxu0 %v4132_v41  ;;  %1365 = vmatpush1.bf16.msra.mxu1 %v4138_v30  ;;  %5126 = vst [vmem:[#allocation21_spill] sm:$0xff] %v4168_v45  ;;  %v4182_v2 = vld [vmem:[%s4927_s3 + $0xa8] ss:$16 sps:$4 sm:$0xff]  }
 0x35d   :  { %2563 = vst [vmem:[%s4928_s4 + $0x58] sm:$0xff] %v1194_v20  ;;  %v1308_v11 = vpack.c.bf16 %v1194_v20, %v1194_v20  ;;  %1459 = vmatprep.subr.bf16.mxu0 %v3785_v46  ;;  %1500 = vmatprep.subr.bf16.mxu1 %v3791_v47  ;;  %5128 = vst [vmem:[#allocation22_spill] sm:$0xff] %v4182_v2  ;;  %v4189_v20 = vld [vmem:[%s4927_s3 + $0xcc] ss:$16 sps:$4 sm:$0xff]  }
 0x35e   :  { %5129 = vst [vmem:[#allocation28_spill] sm:$0xff] %v4189_v20 }
 0x35f   :  { %1342 = vmatmul.mubr.bf16.vlgmr.msra.gmra.mrb[28].mxu0 %v1308_v11  ;;  %1383 = vmatmul.mubr.bf16.vlgmr.msra.gmra.mrb[28].mxu1 %v1308_v11  ;;  %v4175_v11 = vld [vmem:[%s4927_s3 + $0xac] ss:$16 sps:$4 sm:$0xff]  }
 0x360   :  { %1460 = vmatpush1.bf16.msra.mxu0 %v3797_v0  ;;  %1501 = vmatpush1.bf16.msra.mxu1 %v3803_v48  ;;  %5127 = vst [vmem:[#allocation27_spill] sm:$0xff] %v4175_v11 }
 0x361   :  { %1461 = vmatprep.subr.bf16.mxu0 %v3809_v49  ;;  %1502 = vmatprep.subr.bf16.mxu1 %v3815_v50 }
 0x362   :  { %1491 = vmatprep.mubr.bf16.mxu0 %v5058_v58  ;;  %1532 = vmatprep.mubr.bf16.mxu1 %v5058_v58 }
 0x364   :  { %1462 = vmatpush1.bf16.msra.mxu0 %v3823_v51  ;;  %1503 = vmatpush1.bf16.msra.mxu1 %v3829_v52 }
 0x365   :  { %1463 = vmatprep.subr.bf16.mxu0 %v3835_v53  ;;  %1504 = vmatprep.subr.bf16.mxu1 %v3841_v54 }
 0x368   :  { %1464 = vmatpush1.bf16.msra.mxu0 %v3847_v55  ;;  %1505 = vmatpush1.bf16.msra.mxu1 %v3853_v56 }
 0x369   :  { %1465 = vmatprep.subr.bf16.mxu0 %v3859_v57  ;;  %1506 = vmatprep.subr.bf16.mxu1 %v3865_v59 }
 0x36c   :  { %1466 = vmatpush1.bf16.msra.mxu0 %v3871_v60  ;;  %1507 = vmatpush1.bf16.msra.mxu1 %v3877_v61 }
 0x36d   :  { %1467 = vmatprep.subr.bf16.mxu0 %v3883_v62  ;;  %1508 = vmatprep.subr.bf16.mxu1 %v3889_v63 }
 0x370   :  { %1468 = vmatpush1.bf16.msra.mxu0 %v3895_v25  ;;  %1509 = vmatpush1.bf16.msra.mxu1 %v4168_v45  ;;  %v2565_v45 = vld [vmem:[%s4924_s0 + $0x38] sm:$0xff] }
 0x371   :  { %1469 = vmatprep.subr.bf16.mxu0 %v3902_v35  ;;  %1510 = vmatprep.subr.bf16.mxu1 %v4175_v11  ;;  %v1205_v62 = vunpack.c.h.bf16 %v2565_v45 }
 0x374   :  { %1470 = vmatpush1.bf16.msra.mxu0 %v3909_v19  ;;  %1511 = vmatpush1.bf16.msra.mxu1 %v4182_v2  ;;  %v4195_v19 = vld [vmem:[%s4927_s3 + $0xc0] ss:$16 sps:$4 sm:$0xff]   ;;  %v4201_v2 = vld [vmem:[%s4927_s3 + $0xc8] ss:$16 sps:$4 sm:$0xff]  }
 0x375   :  { %1471 = vmatprep.subr.bf16.mxu0 %v3916_v14  ;;  %1512 = vmatprep.subr.bf16.mxu1 %v4189_v20  ;;  %5130 = vst [vmem:[#allocation25_spill] sm:$0xff] %v4195_v19  ;;  %5131 = vst [vmem:[#allocation29_spill] sm:$0xff] %v4201_v2  ;;  %v4207_v14 = vld [vmem:[%s4927_s3 + $0xe4] ss:$16 sps:$4 sm:$0xff]   ;;  %v4213_v20 = vld [vmem:[%s4927_s3 + $0xec] ss:$16 sps:$4 sm:$0xff]  }
 0x376   :  { %5132 = vst [vmem:[#allocation26_spill] sm:$0xff] %v4207_v14  ;;  %5133 = vst [vmem:[#allocation30_spill] sm:$0xff] %v4213_v20 }
 0x378   :  { %1472 = vmatpush1.bf16.msra.mxu0 %v4195_v19  ;;  %1513 = vmatpush1.bf16.msra.mxu1 %v4201_v2  ;;  %v4219_v19 = vld [vmem:[%s4927_s3 + $0xe0] ss:$16 sps:$4 sm:$0xff]   ;;  %v4225_v2 = vld [vmem:[%s4927_s3 + $0xe8] ss:$16 sps:$4 sm:$0xff]  }
 0x379   :  { %1473 = vmatprep.subr.bf16.mxu0 %v4207_v14  ;;  %1514 = vmatprep.subr.bf16.mxu1 %v4213_v20  ;;  %5134 = vst [vmem:[#allocation35_spill] sm:$0xff] %v4219_v19  ;;  %5135 = vst [vmem:[#allocation36_spill] sm:$0xff] %v4225_v2  ;;  %v4231_v14 = vld [vmem:[%s4927_s3 + $0x104] ss:$16 sps:$4 sm:$0xff]   ;;  %v4237_v20 = vld [vmem:[%s4927_s3 + $0x10c] ss:$16 sps:$4 sm:$0xff]  }
 0x37a   :  { %5136 = vst [vmem:[#allocation37_spill] sm:$0xff] %v4231_v14  ;;  %5137 = vst [vmem:[#allocation38_spill] sm:$0xff] %v4237_v20 }
 0x37c   :  { %1474 = vmatpush1.bf16.msra.mxu0 %v4219_v19  ;;  %1515 = vmatpush1.bf16.msra.mxu1 %v4225_v2  ;;  %v2564_v19 = vld [vmem:[%s4924_s0 + $0x30] sm:$0xff] }
 0x37d   :  { %1557 = vmatprep.subr.bf16.mxu0 %v4231_v14  ;;  %1598 = vmatprep.subr.bf16.mxu1 %v4237_v20  ;;  %v1202_v11 = vunpack.c.l.bf16 %v2564_v19  ;;  %v1203_v2 = vunpack.c.h.bf16 %v2564_v19 }
 0x37f   :  { %v1206_v35 = vadd.f32 %v1202_v11, %v5120_v18  ;;  %v1207_v14 = vadd.f32 %v1203_v2, %v5121_v15  ;;  %v1209_v11 = vadd.f32 %v1205_v62, %v3611_v23  ;;  %v1204_v18 = vunpack.c.l.bf16 %v2565_v45 }
 0x381   :  { %v1208_v2 = vadd.f32 %v1204_v18, %v5092_v6 }
 0x412   :  { %v1245_v25 = vpop.f32.mrb[24].mxu0  ;;  %v1286_v63 = vpop.f32.mrb[24].mxu1 }
 0x413   :  { %v1293_v61 = vadd.f32 %v1245_v25, %v1206_v35  ;;  %v1247_v60 = vpop.f32.mrb[25].mxu0  ;;  %v1288_v20 = vpop.f32.mrb[25].mxu1  ;;  %v1295_v51 = vadd.f32 %v1286_v63, %v1208_v2 }
 0x414   :  { %v1294_v59 = vadd.f32 %v1247_v60, %v1207_v14  ;;  %v1249_v57 = vpop.f32.mrb[26].mxu0  ;;  %v1290_v56 = vpop.f32.mrb[26].mxu1  ;;  %v1296_v52 = vadd.f32 %v1288_v20, %v1209_v11 }
 0x415   :  { %v2568_v55 = vmul.f32 -1.442695, %v1293_v61  ;;  %v1250_v54 = vpop.f32.mrb[27].mxu0  ;;  %v1291_v19 = vpop.f32.mrb[27].mxu1 }
 0x416   :  { %v2569_v53 = vmul.f32 -1.442695, %v1294_v59  ;;  %v2570_v15 = vmul.f32 -1.442695, %v1296_v52  ;;  %v2566_v54 = vld [vmem:[%s4925_s1 + $0x40] sm:$0xff] }
 0x417   :  { %2815 = vpow2.f32 %v2568_v55  ;;  %v1300_v55 = vunpack.c.l.bf16 %v2566_v54 }
 0x418   :  { %2817 = vpow2.f32 %v2569_v53  ;;  %v1301_v53 = vunpack.c.h.bf16 %v2566_v54 }
 0x419   :  { %2819 = vpow2.f32 %v2570_v15  ;;  %v1304_v63 = vadd.f32 %v1300_v55, %v3621_v26 }
 0x41a   :  { %2821 = vtanh.f32 %v1295_v51  ;;  %v2567_v51 = vld [vmem:[%s4925_s1 + $0x48] sm:$0xff]  ;;  %v1305_v14 = vadd.f32 %v1301_v53, %v5122_v1 }
 0x41b   :  { %v1303_v20 = vunpack.c.h.bf16 %v2567_v51 }
 0x41d   :  { %v1307_v53 = vadd.f32 %v1303_v20, %v3630_v27 }
 0x421   :  { %v2816_v25 = vpop.eup %2815 }
 0x422   :  { %v2818_v35 = vpop.eup %2817  ;;  %v1398_v50 = vadd.f32 1.0, %v2816_v25 }
 0x423   :  { %v1404_v56 = vadd.f32 1.0, %v2818_v35  ;;  %v2820_v57 = vpop.eup %2819 }
 0x424   :  { %2823 = vrcp.f32 %v1398_v50  ;;  %v2822_v59 = vpop.eup %2821  ;;  %v1411_v62 = vadd.f32 1.0, %v2820_v57 }
 0x425   :  { %2825 = vrcp.f32 %v1404_v56 }
 0x426   :  { %2827 = vrcp.f32 %v1411_v62 }
 0x42e   :  { %v2824_v60 = vpop.eup %2823 }
 0x42f   :  { %v2826_v61 = vpop.eup %2825  ;;  %v1415_v52 = vmul.f32 %v2824_v60, %v2822_v59  ;;  %v1302_v59 = vunpack.c.l.bf16 %v2567_v51 }
 0x430   :  { %v1414_v50 = vmul.f32 %v2826_v61, %v3947_v8 }
 0x431   :  { %v1306_v61 = vadd.f32 %v1302_v59, %v3636_v21  ;;  %v5140_v59 = vld [vmem:[#allocation24_spill] sm:$0xff] }
 0x432   :  { %v4259_v18 = vadd.f32 %v1415_v52, %v1414_v50  ;;  %v1343_v15 = vpop.f32.mrb[28].mxu0  ;;  %v1384_v45 = vpop.f32.mrb[28].mxu1 }
 0x433   :  { %v1391_v19 = vadd.f32 %v1343_v15, %v1304_v63  ;;  %v1345_v11 = vpop.f32.mrb[29].mxu0  ;;  %v1386_v2 = vpop.f32.mrb[29].mxu1  ;;  %v1393_v50 = vadd.f32 %v1384_v45, %v1306_v61 }
 0x434   :  { %2829 = vtanh.f32 %v4259_v18  ;;  %v1392_v25 = vadd.f32 %v1345_v11, %v1305_v14  ;;  %v1347_v35 = vpop.f32.mrb[30].mxu0  ;;  %v1388_v56 = vpop.f32.mrb[30].mxu1  ;;  %v1394_v60 = vadd.f32 %v1386_v2, %v1307_v53  ;;  %v5139_v53 = vld [vmem:[#allocation34_spill] sm:$0xff] }
 0x435   :  { %v2571_v54 = vmul.f32 -1.442695, %v1391_v19  ;;  %v1348_v55 = vpop.f32.mrb[31].mxu0  ;;  %v1389_v57 = vpop.f32.mrb[31].mxu1 }
 0x436   :  { %v2572_v8 = vmul.f32 -1.442695, %v1392_v25  ;;  %v2828_v52 = vpop.eup %2827  ;;  %v2573_v63 = vmul.f32 -1.442695, %v1394_v60 }
 0x437   :  { %2831 = vpow2.f32 %v2571_v54 }
 0x438   :  { %2833 = vpow2.f32 %v2572_v8 }
 0x439   :  { %2835 = vpow2.f32 %v2573_v63  ;;  %v5142_v63 = vld [vmem:[#allocation5_spill] sm:$0xff] }
 0x43a   :  { %2837 = vtanh.f32 %v1393_v50  ;;  %v5143_v50 = vld [vmem:[#allocation10_spill] sm:$0xff] }
 0x43e   :  { %v2830_v62 = vpop.eup %2829 }
 0x43f   :  { %v1418_v15 = vmul.f32 %v2830_v62, %v2828_v52  ;;  %v5141_v62 = vld [vmem:[#allocation31_spill] sm:$0xff] }
 0x441   :  { %v2832_v14 = vpop.eup %2831  ;;  %2574 = vst [vmem:[%s4928_s4 + $0x30] sm:$0xff] %v1418_v15  ;;  %v1458_v19 = vpack.c.bf16 %v1418_v15, %v1418_v15  ;;  %v5146_v15 = vld [vmem:[#allocation7_spill] sm:$0xff] }
 0x442   :  { %v2834_v11 = vpop.eup %2833  ;;  %v1422_v25 = vadd.f32 1.0, %v2832_v14  ;;  %v5150_v14 = vld [vmem:[#allocation9_spill] sm:$0xff] }
 0x443   :  { %v1428_v51 = vadd.f32 1.0, %v2834_v11  ;;  %1492 = vmatmul.mubr.bf16.vlgmr.msra.gmra.mrb[32].mxu0 %v1458_v19  ;;  %1533 = vmatmul.mubr.bf16.vlgmr.msra.gmra.mrb[32].mxu1 %v1458_v19  ;;  %v2836_v45 = vpop.eup %2835  ;;  %v5151_v19 = vld [vmem:[#allocation16_spill] sm:$0xff]  ;;  %v5152_v11 = vld [vmem:[#allocation13_spill] sm:$0xff] }
 0x444   :  { %2839 = vrcp.f32 %v1422_v25  ;;  %1558 = vmatpush1.bf16.msra.mxu0 %v3958_v5  ;;  %1599 = vmatpush1.bf16.msra.mxu1 %v3964_v4  ;;  %v2838_v20 = vpop.eup %2837  ;;  %v1435_v54 = vadd.f32 1.0, %v2836_v45  ;;  %v5153_v25 = vld [vmem:[#allocation19_spill] sm:$0xff]  ;;  %v5155_v45 = vld [vmem:[#allocation21_spill] sm:$0xff] }
 0x445   :  { %2841 = vrcp.f32 %v1428_v51  ;;  %1559 = vmatprep.subr.bf16.mxu0 %v3970_v24  ;;  %1600 = vmatprep.subr.bf16.mxu1 %v3976_v13  ;;  %v5154_v51 = vld [vmem:[#allocation14_spill] sm:$0xff] }
 0x446   :  { %1589 = vmatprep.mubr.bf16.mxu0 %v5058_v58  ;;  %1630 = vmatprep.mubr.bf16.mxu1 %v5058_v58  ;;  %2843 = vrcp.f32 %v1435_v54  ;;  %v5160_v54 = vld [vmem:[#allocation23_spill] sm:$0xff] }
 0x448   :  { %1560 = vmatpush1.bf16.msra.mxu0 %v3984_v33  ;;  %1601 = vmatpush1.bf16.msra.mxu1 %v3990_v34 }
 0x449   :  { %1561 = vmatprep.subr.bf16.mxu0 %v3996_v39  ;;  %1602 = vmatprep.subr.bf16.mxu1 %v4002_v40 }
 0x44c   :  { %1562 = vmatpush1.bf16.msra.mxu0 %v4008_v37  ;;  %1603 = vmatpush1.bf16.msra.mxu1 %v4014_v43 }
 0x44d   :  { %1563 = vmatprep.subr.bf16.mxu0 %v4020_v42  ;;  %1604 = vmatprep.subr.bf16.mxu1 %v4026_v44 }
 0x44e   :  { %v2840_v2 = vpop.eup %2839 }
 0x44f   :  { %v2842_v35 = vpop.eup %2841  ;;  %v1439_v56 = vmul.f32 %v2840_v2, %v2838_v20  ;;  %v5156_v20 = vld [vmem:[#allocation20_spill] sm:$0xff]  ;;  %v5157_v2 = vld [vmem:[#allocation27_spill] sm:$0xff] }
 0x450   :  { %v1438_v55 = vmul.f32 %v2842_v35, %v4054_v28  ;;  %1564 = vmatpush1.bf16.msra.mxu0 %v4033_v17  ;;  %1605 = vmatpush1.bf16.msra.mxu1 %v4039_v36  ;;  %v5138_v28 = vld [vmem:[#allocation18_spill] sm:$0xff]  ;;  %v2844_v8 = vpop.eup %2843  ;;  %v5158_v35 = vld [vmem:[#allocation17_spill] sm:$0xff] }
 0x451   :  { %1565 = vmatprep.subr.bf16.mxu0 %v4045_v29  ;;  %1606 = vmatprep.subr.bf16.mxu1 %v4051_v38 }
 0x452   :  { %v4286_v57 = vadd.f32 %v1439_v56, %v1438_v55  ;;  %v5159_v56 = vld [vmem:[#allocation22_spill] sm:$0xff]  ;;  %v5161_v55 = vld [vmem:[#allocation28_spill] sm:$0xff] }
 0x454   :  { %2845 = vtanh.f32 %v4286_v57  ;;  %1566 = vmatpush1.bf16.msra.mxu0 %v4060_v31  ;;  %1607 = vmatpush1.bf16.msra.mxu1 %v4066_v7 }
 0x455   :  { %1567 = vmatprep.subr.bf16.mxu0 %v4072_v9  ;;  %1608 = vmatprep.subr.bf16.mxu1 %v4078_v32 }
 0x458   :  { %1568 = vmatpush1.bf16.msra.mxu0 %v4084_v10  ;;  %1609 = vmatpush1.bf16.msra.mxu1 %v4090_v22 }
 0x459   :  { %1569 = vmatprep.subr.bf16.mxu0 %v4096_v3  ;;  %1610 = vmatprep.subr.bf16.mxu1 %v4102_v12 }
 0x45c   :  { %1570 = vmatpush1.bf16.msra.mxu0 %v4108_v16  ;;  %1611 = vmatpush1.bf16.msra.mxu1 %v5138_v28 }
 0x45d   :  { %1571 = vmatprep.subr.bf16.mxu0 %v5139_v53  ;;  %1612 = vmatprep.subr.bf16.mxu1 %v5140_v59 }
 0x45e   :  { %v2846_v60 = vpop.eup %2845 }
 0x45f   :  { %v1442_v61 = vmul.f32 %v2846_v60, %v2844_v8  ;;  %v5162_v8 = vld [vmem:[#allocation25_spill] sm:$0xff] }
 0x460   :  { %1572 = vmatpush1.bf16.msra.mxu0 %v4132_v41  ;;  %1613 = vmatpush1.bf16.msra.mxu1 %v4138_v30  ;;  %v5163_v60 = vld [vmem:[#allocation29_spill] sm:$0xff] }
 0x461   :  { %2575 = vst [vmem:[%s4928_s4 + $0x48] sm:$0xff] %v1442_v61  ;;  %v1556_v52 = vpack.c.bf16 %v1442_v61, %v1442_v61  ;;  %1705 = vmatprep.subr.bf16.mxu0 %v3785_v46  ;;  %1746 = vmatprep.subr.bf16.mxu1 %v3791_v47  ;;  %v5144_v46 = vld [vmem:[#allocation6_spill] sm:$0xff]  ;;  %v5145_v47 = vld [vmem:[#allocation11_spill] sm:$0xff] }
 0x462   :  { %v5164_v61 = vld [vmem:[#allocation26_spill] sm:$0xff] }
 0x463   :  { %1590 = vmatmul.mubr.bf16.vlgmr.msra.gmra.mrb[36].mxu0 %v1556_v52  ;;  %1631 = vmatmul.mubr.bf16.vlgmr.msra.gmra.mrb[36].mxu1 %v1556_v52  ;;  %v5165_v52 = vld [vmem:[#allocation30_spill] sm:$0xff] }
 0x464   :  { %1706 = vmatpush1.bf16.msra.mxu0 %v3797_v0  ;;  %1747 = vmatpush1.bf16.msra.mxu1 %v3803_v48  ;;  %v5147_v0 = vld [vmem:[#allocation12_spill] sm:$0xff] }
 0x465   :  { %1707 = vmatprep.subr.bf16.mxu0 %v3809_v49  ;;  %1748 = vmatprep.subr.bf16.mxu1 %v5141_v62  ;;  %v5148_v48 = vld [vmem:[#allocation8_spill] sm:$0xff]  ;;  %v5149_v49 = vld [vmem:[#allocation15_spill] sm:$0xff] }
 0x466   :  { %1737 = vmatprep.mubr.bf16.mxu0 %v5058_v58  ;;  %1778 = vmatprep.mubr.bf16.mxu1 %v5058_v58  ;;  %v5166_v62 = vld [vmem:[#allocation35_spill] sm:$0xff] }
 0x468   :  { %1708 = vmatpush1.bf16.msra.mxu0 %v5142_v63  ;;  %1749 = vmatpush1.bf16.msra.mxu1 %v5143_v50  ;;  %v5167_v63 = vld [vmem:[#allocation36_spill] sm:$0xff]  ;;  %v5168_v50 = vld [vmem:[#allocation37_spill] sm:$0xff] }
 0x469   :  { %1709 = vmatprep.subr.bf16.mxu0 %v5144_v46  ;;  %1750 = vmatprep.subr.bf16.mxu1 %v5145_v47  ;;  %v5169_v46 = vld [vmem:[#allocation38_spill] sm:$0xff]  ;;  %v2576_v47 = vld [vmem:[%s4924_s0 + $0x40] sm:$0xff] }
 0x46c   :  { %1710 = vmatpush1.bf16.msra.mxu0 %v5146_v15  ;;  %1751 = vmatpush1.bf16.msra.mxu1 %v5147_v0  ;;  %v1450_v15 = vunpack.c.l.bf16 %v2576_v47  ;;  %v1451_v0 = vunpack.c.h.bf16 %v2576_v47 }
 0x46d   :  { %1711 = vmatprep.subr.bf16.mxu0 %v5148_v48  ;;  %1752 = vmatprep.subr.bf16.mxu1 %v5149_v49  ;;  %v5170_v48 = vld [vmem:[#allocation32_spill] sm:$0xff] }
 0x46e   :  { %v1454_v49 = vadd.f32 %v1450_v15, %v5170_v48 }
 0x470   :  { %1712 = vmatpush1.bf16.msra.mxu0 %v5150_v14  ;;  %1753 = vmatpush1.bf16.msra.mxu1 %v5151_v19  ;;  %v2577_v14 = vld [vmem:[%s4924_s0 + $0x48] sm:$0xff] }
 0x471   :  { %1713 = vmatprep.subr.bf16.mxu0 %v5152_v11  ;;  %1754 = vmatprep.subr.bf16.mxu1 %v5153_v25  ;;  %v5171_v19 = vld [vmem:[#allocation33_spill] sm:$0xff]  ;;  %v1452_v48 = vunpack.c.l.bf16 %v2577_v14 }
 0x472   :  { %v1455_v11 = vadd.f32 %v1451_v0, %v5171_v19 }
 0x473   :  { %v1456_v0 = vadd.f32 %v1452_v48, %v5092_v6 }
 0x474   :  { %1714 = vmatpush1.bf16.msra.mxu0 %v5154_v51  ;;  %1755 = vmatpush1.bf16.msra.mxu1 %v5155_v45 }
 0x475   :  { %1715 = vmatprep.subr.bf16.mxu0 %v5156_v20  ;;  %1756 = vmatprep.subr.bf16.mxu1 %v5157_v2  ;;  %v1453_v20 = vunpack.c.h.bf16 %v2577_v14 }
 0x477   :  { %v1457_v15 = vadd.f32 %v1453_v20, %v3611_v23 }
 0x478   :  { %1716 = vmatpush1.bf16.msra.mxu0 %v5158_v35  ;;  %1757 = vmatpush1.bf16.msra.mxu1 %v5159_v56 }
 0x479   :  { %1717 = vmatprep.subr.bf16.mxu0 %v5160_v54  ;;  %1758 = vmatprep.subr.bf16.mxu1 %v5161_v55 }
 0x47c   :  { %1718 = vmatpush1.bf16.msra.mxu0 %v5162_v8  ;;  %1759 = vmatpush1.bf16.msra.mxu1 %v5163_v60 }
 0x47d   :  { %1719 = vmatprep.subr.bf16.mxu0 %v5164_v61  ;;  %1760 = vmatprep.subr.bf16.mxu1 %v5165_v52 }
 0x480   :  { %1720 = vmatpush1.bf16.msra.mxu0 %v5166_v62  ;;  %1761 = vmatpush1.bf16.msra.mxu1 %v5167_v63 }
 0x481   :  { %1803 = vmatprep.subr.bf16.mxu0 %v5168_v50  ;;  %1844 = vmatprep.subr.bf16.mxu1 %v5169_v46 }
 0x516   :  { %v1493_v25 = vpop.f32.mrb[32].mxu0  ;;  %v1534_v51 = vpop.f32.mrb[32].mxu1 }
 0x517   :  { %v1541_v35 = vadd.f32 %v1493_v25, %v1454_v49  ;;  %v1495_v54 = vpop.f32.mrb[33].mxu0  ;;  %v1536_v46 = vpop.f32.mrb[33].mxu1  ;;  %v1543_v55 = vadd.f32 %v1534_v51, %v1456_v0 }
 0x518   :  { %v1542_v50 = vadd.f32 %v1495_v54, %v1455_v11  ;;  %v1497_v63 = vpop.f32.mrb[34].mxu0  ;;  %v1538_v62 = vpop.f32.mrb[34].mxu1  ;;  %v1544_v8 = vadd.f32 %v1536_v46, %v1457_v15 }
 0x519   :  { %v2580_v52 = vmul.f32 -1.442695, %v1541_v35  ;;  %v1498_v61 = vpop.f32.mrb[35].mxu0  ;;  %v1539_v47 = vpop.f32.mrb[35].mxu1 }
 0x51a   :  { %v2581_v60 = vmul.f32 -1.442695, %v1542_v50  ;;  %v2582_v19 = vmul.f32 -1.442695, %v1544_v8  ;;  %v2578_v61 = vld [vmem:[%s4925_s1 + $0x30] sm:$0xff] }
 0x51b   :  { %2847 = vpow2.f32 %v2580_v52  ;;  %v1548_v52 = vunpack.c.l.bf16 %v2578_v61 }
 0x51c   :  { %2849 = vpow2.f32 %v2581_v60  ;;  %v1549_v60 = vunpack.c.h.bf16 %v2578_v61 }
 0x51d   :  { %2851 = vpow2.f32 %v2582_v19  ;;  %v1552_v11 = vadd.f32 %v1548_v52, %v3621_v26 }
 0x51e   :  { %2853 = vtanh.f32 %v1543_v55  ;;  %v2579_v55 = vld [vmem:[%s4925_s1 + $0x38] sm:$0xff]  ;;  %v1553_v19 = vadd.f32 %v1549_v60, %v5122_v1 }
 0x51f   :  { %v1551_v54 = vunpack.c.h.bf16 %v2579_v55 }
 0x521   :  { %v1555_v60 = vadd.f32 %v1551_v54, %v3630_v27  ;;  %v4535_v54 = vld [vmem:[%s4927_s3 + $0xa0] ss:$16 sps:$4 sm:$0xff]  }
 0x525   :  { %v2848_v49 = vpop.eup %2847 }
 0x526   :  { %v2850_v25 = vpop.eup %2849  ;;  %v1646_v56 = vadd.f32 1.0, %v2848_v49 }
 0x527   :  { %v1652_v62 = vadd.f32 1.0, %v2850_v25  ;;  %v2852_v63 = vpop.eup %2851 }
 0x528   :  { %2855 = vrcp.f32 %v1646_v56  ;;  %v2854_v50 = vpop.eup %2853  ;;  %v1659_v14 = vadd.f32 1.0, %v2852_v63 }
 0x529   :  { %2857 = vrcp.f32 %v1652_v62 }
 0x52a   :  { %2859 = vrcp.f32 %v1659_v14 }
 0x532   :  { %v2856_v46 = vpop.eup %2855 }
 0x533   :  { %v2858_v48 = vpop.eup %2857  ;;  %v1663_v8 = vmul.f32 %v2856_v46, %v2854_v50  ;;  %v1550_v50 = vunpack.c.l.bf16 %v2579_v55 }
 0x534   :  { %v1662_v56 = vmul.f32 %v2858_v48, %v4259_v18 }
 0x535   :  { %v1554_v48 = vadd.f32 %v1550_v50, %v3636_v21  ;;  %v5181_v50 = vld [vmem:[#allocation38_spill] sm:$0xff] }
 0x536   :  { %v4361_v51 = vadd.f32 %v1663_v8, %v1662_v56  ;;  %v1591_v20 = vpop.f32.mrb[36].mxu0  ;;  %v1632_v35 = vpop.f32.mrb[36].mxu1 }
 0x537   :  { %v1639_v47 = vadd.f32 %v1591_v20, %v1552_v11  ;;  %v1593_v15 = vpop.f32.mrb[37].mxu0  ;;  %v1634_v0 = vpop.f32.mrb[37].mxu1  ;;  %v1641_v56 = vadd.f32 %v1632_v35, %v1554_v48 }
 0x538   :  { %2861 = vtanh.f32 %v4361_v51  ;;  %v1640_v49 = vadd.f32 %v1593_v15, %v1553_v19  ;;  %v1595_v25 = vpop.f32.mrb[38].mxu0  ;;  %v1636_v62 = vpop.f32.mrb[38].mxu1  ;;  %v1642_v46 = vadd.f32 %v1634_v0, %v1555_v60  ;;  %v5172_v0 = vld [vmem:[#allocation22_spill] sm:$0xff]  ;;  %v5180_v60 = vld [vmem:[#allocation37_spill] sm:$0xff] }
 0x539   :  { %v2583_v61 = vmul.f32 -1.442695, %v1639_v47  ;;  %v1596_v52 = vpop.f32.mrb[39].mxu0  ;;  %v1637_v63 = vpop.f32.mrb[39].mxu1  ;;  %v5173_v25 = vld [vmem:[#allocation28_spill] sm:$0xff]  ;;  %v5174_v62 = vld [vmem:[#allocation25_spill] sm:$0xff] }
 0x53a   :  { %v2584_v18 = vmul.f32 -1.442695, %v1640_v49  ;;  %v2860_v8 = vpop.eup %2859  ;;  %v2585_v11 = vmul.f32 -1.442695, %v1642_v46  ;;  %v5177_v52 = vld [vmem:[#allocation30_spill] sm:$0xff]  ;;  %v5178_v63 = vld [vmem:[#allocation35_spill] sm:$0xff] }
 0x53b   :  { %2863 = vpow2.f32 %v2583_v61  ;;  %v5176_v61 = vld [vmem:[#allocation26_spill] sm:$0xff] }
 0x53c   :  { %2865 = vpow2.f32 %v2584_v18  ;;  %v5179_v18 = vld [vmem:[#allocation36_spill] sm:$0xff]  ;;  %v2588_v46 = vld [vmem:[%s4924_s0 + $0x50] sm:$0xff] }
 0x53d   :  { %2867 = vpow2.f32 %v2585_v11  ;;  %v1696_v48 = vunpack.c.l.bf16 %v2588_v46 }
 0x53e   :  { %2869 = vtanh.f32 %v1641_v56  ;;  %v2589_v56 = vld [vmem:[%s4924_s0 + $0x58] sm:$0xff] }
 0x542   :  { %v2862_v14 = vpop.eup %2861 }
 0x543   :  { %v1666_v20 = vmul.f32 %v2862_v14, %v2860_v8  ;;  %v1697_v8 = vunpack.c.h.bf16 %v2588_v46  ;;  %v5182_v14 = vld [vmem:[#allocation32_spill] sm:$0xff] }
 0x544   :  { %v1700_v11 = vadd.f32 %v1696_v48, %v5182_v14 }
 0x545   :  { %v2864_v19 = vpop.eup %2863  ;;  %2586 = vst [vmem:[%s4928_s4 + $0x40] sm:$0xff] %v1666_v20  ;;  %v1704_v47 = vpack.c.bf16 %v1666_v20, %v1666_v20  ;;  %v5183_v20 = vld [vmem:[#allocation33_spill] sm:$0xff] }
 0x546   :  { %v2866_v15 = vpop.eup %2865  ;;  %v1670_v49 = vadd.f32 1.0, %v2864_v19  ;;  %v1701_v19 = vadd.f32 %v1697_v8, %v5183_v20 }
 0x547   :  { %v1676_v55 = vadd.f32 1.0, %v2866_v15  ;;  %1738 = vmatmul.mubr.bf16.vlgmr.msra.gmra.mrb[40].mxu0 %v1704_v47  ;;  %1779 = vmatmul.mubr.bf16.vlgmr.msra.gmra.mrb[40].mxu1 %v1704_v47 }
 0x548   :  { %2871 = vrcp.f32 %v1670_v49  ;;  %1804 = vmatpush1.bf16.msra.mxu0 %v3958_v5  ;;  %1845 = vmatpush1.bf16.msra.mxu1 %v3964_v4  ;;  %v2868_v5 = vpop.eup %2867  ;;  %v1699_v49 = vunpack.c.h.bf16 %v2589_v56 }
 0x549   :  { %2873 = vrcp.f32 %v1676_v55  ;;  %1805 = vmatprep.subr.bf16.mxu0 %v3970_v24  ;;  %1846 = vmatprep.subr.bf16.mxu1 %v3976_v13  ;;  %v2870_v4 = vpop.eup %2869 }
 0x54a   :  { %1835 = vmatprep.mubr.bf16.mxu0 %v5058_v58  ;;  %1876 = vmatprep.mubr.bf16.mxu1 %v5058_v58 }
 0x54c   :  { %1806 = vmatpush1.bf16.msra.mxu0 %v3984_v33  ;;  %1847 = vmatpush1.bf16.msra.mxu1 %v3990_v34  ;;  %v1683_v33 = vadd.f32 1.0, %v2868_v5 }
 0x54d   :  { %1807 = vmatprep.subr.bf16.mxu0 %v3996_v39  ;;  %1848 = vmatprep.subr.bf16.mxu1 %v4002_v40 }
 0x54e   :  { %2875 = vrcp.f32 %v1683_v33 }
 0x550   :  { %1808 = vmatpush1.bf16.msra.mxu0 %v4008_v37  ;;  %1849 = vmatpush1.bf16.msra.mxu1 %v4014_v43 }
 0x551   :  { %1809 = vmatprep.subr.bf16.mxu0 %v4020_v42  ;;  %1850 = vmatprep.subr.bf16.mxu1 %v4026_v44  ;;  %v4411_v44 = vld [vmem:[%s4927_s3 + $0x4] ss:$16 sps:$4 sm:$0xff]  }
 0x552   :  { %v2872_v24 = vpop.eup %2871 }
 0x553   :  { %v2874_v13 = vpop.eup %2873  ;;  %v1687_v35 = vmul.f32 %v2872_v24, %v2870_v4 }
 0x554   :  { %v1686_v34 = vmul.f32 %v2874_v13, %v4286_v57  ;;  %1810 = vmatpush1.bf16.msra.mxu0 %v4033_v17  ;;  %1851 = vmatpush1.bf16.msra.mxu1 %v4039_v36  ;;  %v4417_v17 = vld [vmem:[%s4927_s3 + $0xc] ss:$16 sps:$4 sm:$0xff]   ;;  %v4423_v36 = vld [vmem:[%s4927_s3] ss:$16 sps:$4 sm:$0xff]   ;;  %v4509_v57 = vld [vmem:[%s4927_s3 + $0x84] ss:$16 sps:$4 sm:$0xff]  }
 0x555   :  { %1811 = vmatprep.subr.bf16.mxu0 %v4045_v29  ;;  %1852 = vmatprep.subr.bf16.mxu1 %v4051_v38  ;;  %v4429_v29 = vld [vmem:[%s4927_s3 + $0x8] ss:$16 sps:$4 sm:$0xff]   ;;  %v4435_v38 = vld [vmem:[%s4927_s3 + $0x24] ss:$16 sps:$4 sm:$0xff]  }
 0x556   :  { %v4388_v39 = vadd.f32 %v1687_v35, %v1686_v34 }
 0x558   :  { %2877 = vtanh.f32 %v4388_v39  ;;  %1812 = vmatpush1.bf16.msra.mxu0 %v4060_v31  ;;  %1853 = vmatpush1.bf16.msra.mxu1 %v4066_v7  ;;  %v2876_v40 = vpop.eup %2875  ;;  %v4441_v31 = vld [vmem:[%s4927_s3 + $0x2c] ss:$16 sps:$4 sm:$0xff]   ;;  %v4449_v7 = vld [vmem:[%s4927_s3 + $0x20] ss:$16 sps:$4 sm:$0xff]  }
 0x559   :  { %1813 = vmatprep.subr.bf16.mxu0 %v4072_v9  ;;  %1854 = vmatprep.subr.bf16.mxu1 %v4078_v32  ;;  %v4455_v9 = vld [vmem:[%s4927_s3 + $0x28] ss:$16 sps:$4 sm:$0xff]   ;;  %v4461_v32 = vld [vmem:[%s4927_s3 + $0x44] ss:$16 sps:$4 sm:$0xff]  }
 0x55c   :  { %1814 = vmatpush1.bf16.msra.mxu0 %v4084_v10  ;;  %1855 = vmatpush1.bf16.msra.mxu1 %v4090_v22  ;;  %v4467_v10 = vld [vmem:[%s4927_s3 + $0x4c] ss:$16 sps:$4 sm:$0xff]   ;;  %v4473_v22 = vld [vmem:[%s4927_s3 + $0x40] ss:$16 sps:$4 sm:$0xff]  }
 0x55d   :  { %1815 = vmatprep.subr.bf16.mxu0 %v4096_v3  ;;  %1856 = vmatprep.subr.bf16.mxu1 %v4102_v12  ;;  %v4479_v3 = vld [vmem:[%s4927_s3 + $0x48] ss:$16 sps:$4 sm:$0xff]   ;;  %v4485_v12 = vld [vmem:[%s4927_s3 + $0x64] ss:$16 sps:$4 sm:$0xff]  }
 0x560   :  { %1816 = vmatpush1.bf16.msra.mxu0 %v4108_v16  ;;  %1857 = vmatpush1.bf16.msra.mxu1 %v5138_v28  ;;  %v4491_v16 = vld [vmem:[%s4927_s3 + $0x6c] ss:$16 sps:$4 sm:$0xff]  }
 0x561   :  { %1817 = vmatprep.subr.bf16.mxu0 %v5139_v53  ;;  %1858 = vmatprep.subr.bf16.mxu1 %v5140_v59  ;;  %v4515_v28 = vld [vmem:[%s4927_s3 + $0x8c] ss:$16 sps:$4 sm:$0xff]   ;;  %v4521_v53 = vld [vmem:[%s4927_s3 + $0x80] ss:$16 sps:$4 sm:$0xff]   ;;  %v4528_v59 = vld [vmem:[%s4927_s3 + $0xa4] ss:$16 sps:$4 sm:$0xff]  }
 0x562   :  { %v2878_v37 = vpop.eup %2877 }
 0x563   :  { %v1690_v43 = vmul.f32 %v2878_v37, %v2876_v40 }
 0x564   :  { %1818 = vmatpush1.bf16.msra.mxu0 %v4132_v41  ;;  %1859 = vmatpush1.bf16.msra.mxu1 %v4138_v30  ;;  %v4497_v41 = vld [vmem:[%s4927_s3 + $0x60] ss:$16 sps:$4 sm:$0xff]   ;;  %v4503_v30 = vld [vmem:[%s4927_s3 + $0x68] ss:$16 sps:$4 sm:$0xff]  }
 0x565   :  { %2587 = vst [vmem:[%s4928_s4 + $0x38] sm:$0xff] %v1690_v43  ;;  %v1802_v42 = vpack.c.bf16 %v1690_v43, %v1690_v43  ;;  %1951 = vmatprep.subr.bf16.mxu0 %v4411_v44  ;;  %1992 = vmatprep.subr.bf16.mxu1 %v4417_v17  ;;  %v1703_v43 = vadd.f32 %v1699_v49, %v3611_v23  ;;  %v2591_v49 = vld [vmem:[%s4925_s1 + $0x28] sm:$0xff] }
 0x567   :  { %1836 = vmatmul.mubr.bf16.vlgmr.msra.gmra.mrb[44].mxu0 %v1802_v42  ;;  %1877 = vmatmul.mubr.bf16.vlgmr.msra.gmra.mrb[44].mxu1 %v1802_v42  ;;  %v1698_v42 = vunpack.c.l.bf16 %v2589_v56 }
 0x568   :  { %1952 = vmatpush1.bf16.msra.mxu0 %v4423_v36  ;;  %1993 = vmatpush1.bf16.msra.mxu1 %v4429_v29 }
 0x569   :  { %1953 = vmatprep.subr.bf16.mxu0 %v4435_v38  ;;  %1994 = vmatprep.subr.bf16.mxu1 %v4441_v31 }
 0x56a   :  { %1983 = vmatprep.mubr.bf16.mxu0 %v5058_v58  ;;  %2024 = vmatprep.mubr.bf16.mxu1 %v5058_v58 }
 0x56c   :  { %1954 = vmatpush1.bf16.msra.mxu0 %v4449_v7  ;;  %1995 = vmatpush1.bf16.msra.mxu1 %v4455_v9 }
 0x56d   :  { %1955 = vmatprep.subr.bf16.mxu0 %v4461_v32  ;;  %1996 = vmatprep.subr.bf16.mxu1 %v4467_v10 }
 0x570   :  { %1956 = vmatpush1.bf16.msra.mxu0 %v4473_v22  ;;  %1997 = vmatpush1.bf16.msra.mxu1 %v4479_v3 }
 0x571   :  { %1957 = vmatprep.subr.bf16.mxu0 %v4485_v12  ;;  %1998 = vmatprep.subr.bf16.mxu1 %v4491_v16 }
 0x574   :  { %1958 = vmatpush1.bf16.msra.mxu0 %v4497_v41  ;;  %1999 = vmatpush1.bf16.msra.mxu1 %v4503_v30 }
 0x575   :  { %1959 = vmatprep.subr.bf16.mxu0 %v4509_v57  ;;  %2000 = vmatprep.subr.bf16.mxu1 %v4515_v28 }
 0x578   :  { %1960 = vmatpush1.bf16.msra.mxu0 %v4521_v53  ;;  %2001 = vmatpush1.bf16.msra.mxu1 %v5155_v45  ;;  %v4542_v45 = vld [vmem:[%s4927_s3 + $0xc4] ss:$16 sps:$4 sm:$0xff]  }
 0x579   :  { %1961 = vmatprep.subr.bf16.mxu0 %v4528_v59  ;;  %2002 = vmatprep.subr.bf16.mxu1 %v5157_v2  ;;  %v5175_v2 = vld [vmem:[#allocation29_spill] sm:$0xff] }
 0x57c   :  { %1962 = vmatpush1.bf16.msra.mxu0 %v4535_v54  ;;  %2003 = vmatpush1.bf16.msra.mxu1 %v5172_v0 }
 0x57d   :  { %1963 = vmatprep.subr.bf16.mxu0 %v4542_v45  ;;  %2004 = vmatprep.subr.bf16.mxu1 %v5173_v25  ;;  %v1702_v25 = vadd.f32 %v1698_v42, %v5092_v6 }
 0x580   :  { %1964 = vmatpush1.bf16.msra.mxu0 %v5174_v62  ;;  %2005 = vmatpush1.bf16.msra.mxu1 %v5175_v2 }
 0x581   :  { %1965 = vmatprep.subr.bf16.mxu0 %v5176_v61  ;;  %2006 = vmatprep.subr.bf16.mxu1 %v5177_v52 }
 0x584   :  { %1966 = vmatpush1.bf16.msra.mxu0 %v5178_v63  ;;  %2007 = vmatpush1.bf16.msra.mxu1 %v5179_v18 }
 0x585   :  { %2049 = vmatprep.subr.bf16.mxu0 %v5180_v60  ;;  %2090 = vmatprep.subr.bf16.mxu1 %v5181_v50  ;;  %v2590_v60 = vld [vmem:[%s4925_s1 + $0x20] sm:$0xff] }
 0x586   :  { %v1794_v50 = vunpack.c.l.bf16 %v2590_v60  ;;  %v1795_v48 = vunpack.c.h.bf16 %v2590_v60 }
 0x61a   :  { %v1739_v47 = vpop.f32.mrb[40].mxu0  ;;  %v1780_v15 = vpop.f32.mrb[40].mxu1 }
 0x61b   :  { %v1787_v55 = vadd.f32 %v1739_v47, %v1700_v11  ;;  %v1741_v5 = vpop.f32.mrb[41].mxu0  ;;  %v1782_v4 = vpop.f32.mrb[41].mxu1  ;;  %v1789_v2 = vadd.f32 %v1780_v15, %v1702_v25  ;;  %v1798_v15 = vadd.f32 %v1794_v50, %v3621_v26 }
 0x61c   :  { %v1788_v24 = vadd.f32 %v1741_v5, %v1701_v19  ;;  %v1743_v13 = vpop.f32.mrb[42].mxu0  ;;  %v1784_v35 = vpop.f32.mrb[42].mxu1  ;;  %v1790_v0 = vadd.f32 %v1782_v4, %v1703_v43  ;;  %v1799_v5 = vadd.f32 %v1795_v48, %v5122_v1 }
 0x61d   :  { %v2592_v33 = vmul.f32 -1.442695, %v1787_v55  ;;  %v1744_v34 = vpop.f32.mrb[43].mxu0  ;;  %v1785_v40 = vpop.f32.mrb[43].mxu1  ;;  %v1797_v35 = vunpack.c.h.bf16 %v2591_v49 }
 0x61e   :  { %v2593_v37 = vmul.f32 -1.442695, %v1788_v24  ;;  %v2594_v62 = vmul.f32 -1.442695, %v1790_v0 }
 0x61f   :  { %2879 = vpow2.f32 %v2592_v33 }
 0x620   :  { %2881 = vpow2.f32 %v2593_v37 }
 0x621   :  { %2883 = vpow2.f32 %v2594_v62 }
 0x622   :  { %2885 = vtanh.f32 %v1789_v2  ;;  %v1801_v2 = vadd.f32 %v1797_v35, %v3630_v27  ;;  %v4622_v35 = vld [vmem:[%s4927_s3 + $0x144] ss:$16 sps:$4 sm:$0xff]  }
 0x629   :  { %v2880_v61 = vpop.eup %2879 }
 0x62a   :  { %v2882_v52 = vpop.eup %2881  ;;  %v1892_v63 = vadd.f32 1.0, %v2880_v61  ;;  %v1796_v61 = vunpack.c.l.bf16 %v2591_v49  ;;  %v4590_v49 = vld [vmem:[%s4927_s3 + $0x108] ss:$16 sps:$4 sm:$0xff]  }
 0x62b   :  { %v1898_v18 = vadd.f32 1.0, %v2882_v52  ;;  %v2884_v46 = vpop.eup %2883 }
 0x62c   :  { %2887 = vrcp.f32 %v1892_v63  ;;  %v2886_v8 = vpop.eup %2885  ;;  %v1905_v47 = vadd.f32 1.0, %v2884_v46  ;;  %v1800_v63 = vadd.f32 %v1796_v61, %v3636_v21 }
 0x62d   :  { %2889 = vrcp.f32 %v1898_v18 }
 0x62e   :  { %2891 = vrcp.f32 %v1905_v47 }
 0x636   :  { %v2888_v11 = vpop.eup %2887 }
 0x637   :  { %v2890_v56 = vpop.eup %2889  ;;  %v1909_v19 = vmul.f32 %v2888_v11, %v2886_v8 }
 0x638   :  { %v1908_v55 = vmul.f32 %v2890_v56, %v4361_v51  ;;  %v2892_v18 = vpop.eup %2891 }
 0x63a   :  { %v4573_v4 = vadd.f32 %v1909_v19, %v1908_v55  ;;  %v1837_v24 = vpop.f32.mrb[44].mxu0  ;;  %v1878_v13 = vpop.f32.mrb[44].mxu1  ;;  %v4596_v55 = vld [vmem:[%s4927_s3 + $0x124] ss:$16 sps:$4 sm:$0xff]  }
 0x63b   :  { %v1885_v33 = vadd.f32 %v1837_v24, %v1798_v15  ;;  %v1839_v34 = vpop.f32.mrb[45].mxu0  ;;  %v1880_v40 = vpop.f32.mrb[45].mxu1  ;;  %v1887_v46 = vadd.f32 %v1878_v13, %v1800_v63  ;;  %v4584_v15 = vld [vmem:[%s4927_s3 + $0x100] ss:$16 sps:$4 sm:$0xff]   ;;  %v4616_v13 = vld [vmem:[%s4927_s3 + $0x128] ss:$16 sps:$4 sm:$0xff]  }
 0x63c   :  { %2893 = vtanh.f32 %v4573_v4  ;;  %v1886_v37 = vadd.f32 %v1839_v34, %v1799_v5  ;;  %v1841_v43 = vpop.f32.mrb[46].mxu0  ;;  %v1882_v42 = vpop.f32.mrb[46].mxu1  ;;  %v1888_v52 = vadd.f32 %v1880_v40, %v1801_v2  ;;  %v4602_v5 = vld [vmem:[%s4927_s3 + $0x12c] ss:$16 sps:$4 sm:$0xff]   ;;  %v4610_v24 = vld [vmem:[%s4927_s3 + $0x120] ss:$16 sps:$4 sm:$0xff]  }
 0x63d   :  { %v2595_v0 = vmul.f32 -1.442695, %v1885_v33  ;;  %v1842_v25 = vpop.f32.mrb[47].mxu0  ;;  %v1883_v62 = vpop.f32.mrb[47].mxu1  ;;  %v4628_v33 = vld [vmem:[%s4927_s3 + $0x14c] ss:$16 sps:$4 sm:$0xff]  }
 0x63e   :  { %v2596_v51 = vmul.f32 -1.442695, %v1886_v37  ;;  %v2597_v50 = vmul.f32 -1.442695, %v1888_v52  ;;  %v4634_v40 = vld [vmem:[%s4927_s3 + $0x140] ss:$16 sps:$4 sm:$0xff]  }
 0x63f   :  { %2895 = vpow2.f32 %v2595_v0  ;;  %v4640_v37 = vld [vmem:[%s4927_s3 + $0x148] ss:$16 sps:$4 sm:$0xff]   ;;  %v4646_v42 = vld [vmem:[%s4927_s3 + $0x164] ss:$16 sps:$4 sm:$0xff]   ;;  %v4652_v0 = vld [vmem:[%s4927_s3 + $0x16c] ss:$16 sps:$4 sm:$0xff]  }
 0x640   :  { %2897 = vpow2.f32 %v2596_v51  ;;  %v4659_v52 = vld [vmem:[%s4927_s3 + $0x160] ss:$16 sps:$4 sm:$0xff]   ;;  %v4665_v63 = vld [vmem:[%s4927_s3 + $0x168] ss:$16 sps:$4 sm:$0xff]  }
 0x641   :  { %2899 = vpow2.f32 %v2597_v50  ;;  %v4686_v50 = vld [vmem:[%s4927_s3 + $0x180] ss:$16 sps:$4 sm:$0xff]  }
 0x642   :  { %2901 = vtanh.f32 %v1887_v46  ;;  %v4692_v46 = vld [vmem:[%s4927_s3 + $0x188] ss:$16 sps:$4 sm:$0xff]  }
 0x646   :  { %v2894_v60 = vpop.eup %2893 }
 0x647   :  { %v1912_v48 = vmul.f32 %v2894_v60, %v2892_v18  ;;  %v4671_v18 = vld [vmem:[%s4927_s3 + $0x184] ss:$16 sps:$4 sm:$0xff]  }
 0x649   :  { %v2896_v8 = vpop.eup %2895  ;;  %2598 = vst [vmem:[%s4928_s4 + $0x50] sm:$0xff] %v1912_v48  ;;  %v1950_v11 = vpack.c.bf16 %v1912_v48, %v1912_v48  ;;  %v4698_v48 = vld [vmem:[%s4927_s3 + $0x1a4] ss:$16 sps:$4 sm:$0xff]  }
 0x64a   :  { %v2898_v56 = vpop.eup %2897  ;;  %v1916_v19 = vadd.f32 1.0, %v2896_v8  ;;  %v4704_v8 = vld [vmem:[%s4927_s3 + $0x1ac] ss:$16 sps:$4 sm:$0xff]  }
 0x64b   :  { %v1922_v47 = vadd.f32 1.0, %v2898_v56  ;;  %1984 = vmatmul.mubr.bf16.vlgmr.msra.gmra.mrb[48].mxu0 %v1950_v11  ;;  %2025 = vmatmul.mubr.bf16.vlgmr.msra.gmra.mrb[48].mxu1 %v1950_v11  ;;  %v2900_v34 = vpop.eup %2899  ;;  %v4710_v11 = vld [vmem:[%s4927_s3 + $0x1a0] ss:$16 sps:$4 sm:$0xff]   ;;  %v4716_v56 = vld [vmem:[%s4927_s3 + $0x1a8] ss:$16 sps:$4 sm:$0xff]  }
 0x64c   :  { %2903 = vrcp.f32 %v1916_v19  ;;  %2050 = vmatpush1.bf16.msra.mxu0 %v4584_v15  ;;  %2091 = vmatpush1.bf16.msra.mxu1 %v4590_v49  ;;  %v2902_v43 = vpop.eup %2901  ;;  %v1929_v2 = vadd.f32 1.0, %v2900_v34  ;;  %v4722_v19 = vld [vmem:[%s4927_s3 + $0x1c4] ss:$16 sps:$4 sm:$0xff]   ;;  %v4734_v34 = vld [vmem:[%s4927_s3 + $0x1c0] ss:$16 sps:$4 sm:$0xff]  }
 0x64d   :  { %2905 = vrcp.f32 %v1922_v47  ;;  %2051 = vmatprep.subr.bf16.mxu0 %v4596_v55  ;;  %2092 = vmatprep.subr.bf16.mxu1 %v4602_v5  ;;  %v4728_v47 = vld [vmem:[%s4927_s3 + $0x1cc] ss:$16 sps:$4 sm:$0xff]  }
 0x64e   :  { %2081 = vmatprep.mubr.bf16.mxu0 %v5058_v58  ;;  %2122 = vmatprep.mubr.bf16.mxu1 %v5058_v58  ;;  %2907 = vrcp.f32 %v1929_v2 }
 0x650   :  { %2052 = vmatpush1.bf16.msra.mxu0 %v4610_v24  ;;  %2093 = vmatpush1.bf16.msra.mxu1 %v4616_v13 }
 0x651   :  { %2053 = vmatprep.subr.bf16.mxu0 %v4622_v35  ;;  %2094 = vmatprep.subr.bf16.mxu1 %v4628_v33 }
 0x654   :  { %2054 = vmatpush1.bf16.msra.mxu0 %v4634_v40  ;;  %2095 = vmatpush1.bf16.msra.mxu1 %v4640_v37 }
 0x655   :  { %2055 = vmatprep.subr.bf16.mxu0 %v4646_v42  ;;  %2096 = vmatprep.subr.bf16.mxu1 %v4652_v0 }
 0x656   :  { %v2904_v25 = vpop.eup %2903 }
 0x657   :  { %v2906_v62 = vpop.eup %2905  ;;  %v1933_v51 = vmul.f32 %v2904_v25, %v2902_v43  ;;  %v4740_v43 = vld [vmem:[%s4927_s3 + $0x1c8] ss:$16 sps:$4 sm:$0xff]  }
 0x658   :  { %v1932_v61 = vmul.f32 %v2906_v62, %v4388_v39  ;;  %2056 = vmatpush1.bf16.msra.mxu0 %v4659_v52  ;;  %2097 = vmatpush1.bf16.msra.mxu1 %v4665_v63  ;;  %v4677_v39 = vld [vmem:[%s4927_s3 + $0x18c] ss:$16 sps:$4 sm:$0xff]   ;;  %5184 = vst [vmem:[#allocation18_spill] sm:$0xff] %v4740_v43  ;;  %v2908_v25 = vpop.eup %2907  ;;  %v4746_v62 = vld [vmem:[%s4927_s3 + $0x1e4] ss:$16 sps:$4 sm:$0xff]  }
 0x659   :  { %2057 = vmatprep.subr.bf16.mxu0 %v4671_v18  ;;  %2098 = vmatprep.subr.bf16.mxu1 %v4677_v39  ;;  %5185 = vst [vmem:[#allocation34_spill] sm:$0xff] %v4746_v62 }
 0x65a   :  { %v4680_v60 = vadd.f32 %v1933_v51, %v1932_v61  ;;  %v4752_v51 = vld [vmem:[%s4927_s3 + $0x1ec] ss:$16 sps:$4 sm:$0xff]  }
 0x65b   :  { %5186 = vst [vmem:[#allocation24_spill] sm:$0xff] %v4752_v51 }
 0x65c   :  { %2909 = vtanh.f32 %v4680_v60  ;;  %2058 = vmatpush1.bf16.msra.mxu0 %v4686_v50  ;;  %2099 = vmatpush1.bf16.msra.mxu1 %v4692_v46 }
 0x65d   :  { %2059 = vmatprep.subr.bf16.mxu0 %v4698_v48  ;;  %2100 = vmatprep.subr.bf16.mxu1 %v4704_v8 }
 0x660   :  { %2060 = vmatpush1.bf16.msra.mxu0 %v4710_v11  ;;  %2101 = vmatpush1.bf16.msra.mxu1 %v4716_v56 }
 0x661   :  { %2061 = vmatprep.subr.bf16.mxu0 %v4722_v19  ;;  %2102 = vmatprep.subr.bf16.mxu1 %v4728_v47 }
 0x664   :  { %2062 = vmatpush1.bf16.msra.mxu0 %v4734_v34  ;;  %2103 = vmatpush1.bf16.msra.mxu1 %v4740_v43  ;;  %v4758_v43 = vld [vmem:[%s4927_s3 + $0x1e0] ss:$16 sps:$4 sm:$0xff]  }
 0x665   :  { %2063 = vmatprep.subr.bf16.mxu0 %v4746_v62  ;;  %2104 = vmatprep.subr.bf16.mxu1 %v4752_v51  ;;  %v4764_v62 = vld [vmem:[%s4927_s3 + $0x1e8] ss:$16 sps:$4 sm:$0xff]  }
 0x666   :  { %v2910_v2 = vpop.eup %2909 }
 0x667   :  { %v1936_v61 = vmul.f32 %v2910_v2, %v2908_v25 }
 0x668   :  { %2064 = vmatpush1.bf16.msra.mxu0 %v4758_v43  ;;  %2105 = vmatpush1.bf16.msra.mxu1 %v4764_v62 }
 0x669   :  { %2599 = vst [vmem:[%s4928_s4 + $0x28] sm:$0xff] %v1936_v61  ;;  %v2048_v51 = vpack.c.bf16 %v1936_v61, %v1936_v61  ;;  %2197 = vmatprep.subr.bf16.mxu0 %v4411_v44  ;;  %2238 = vmatprep.subr.bf16.mxu1 %v4417_v17  ;;  %v3091_v44 = vld [vmem:[%s4927_s3 + $0x88] ss:$16 sps:$4 sm:$0xff]   ;;  %v3092_v17 = vld [vmem:[%s4927_s3 + $0xac] ss:$16 sps:$4 sm:$0xff]  }
 0x66b   :  { %2082 = vmatmul.mubr.bf16.vlgmr.msra.gmra.mrb[52].mxu0 %v2048_v51  ;;  %2123 = vmatmul.mubr.bf16.vlgmr.msra.gmra.mrb[52].mxu1 %v2048_v51 }
 0x66c   :  { %2198 = vmatpush1.bf16.msra.mxu0 %v4423_v36  ;;  %2239 = vmatpush1.bf16.msra.mxu1 %v4429_v29  ;;  %v3093_v36 = vld [vmem:[%s4927_s3 + $0xa8] ss:$16 sps:$4 sm:$0xff]   ;;  %v3094_v29 = vld [vmem:[%s4927_s3 + $0xcc] ss:$16 sps:$4 sm:$0xff]  }
 0x66d   :  { %2199 = vmatprep.subr.bf16.mxu0 %v4435_v38  ;;  %2240 = vmatprep.subr.bf16.mxu1 %v4441_v31  ;;  %v3095_v38 = vld [vmem:[%s4927_s3 + $0xc0] ss:$16 sps:$4 sm:$0xff]   ;;  %v3096_v31 = vld [vmem:[%s4927_s3 + $0xc8] ss:$16 sps:$4 sm:$0xff]  }
 0x66e   :  { %2229 = vmatprep.mubr.bf16.mxu0 %v5058_v58  ;;  %2270 = vmatprep.mubr.bf16.mxu1 %v5058_v58 }
 0x670   :  { %2200 = vmatpush1.bf16.msra.mxu0 %v4449_v7  ;;  %2241 = vmatpush1.bf16.msra.mxu1 %v4455_v9  ;;  %v3097_v7 = vld [vmem:[%s4927_s3 + $0xe4] ss:$16 sps:$4 sm:$0xff]   ;;  %v3098_v9 = vld [vmem:[%s4927_s3 + $0xec] ss:$16 sps:$4 sm:$0xff]  }
 0x671   :  { %2201 = vmatprep.subr.bf16.mxu0 %v4461_v32  ;;  %2242 = vmatprep.subr.bf16.mxu1 %v4467_v10  ;;  %v3099_v32 = vld [vmem:[%s4927_s3 + $0xe0] ss:$16 sps:$4 sm:$0xff]   ;;  %v3100_v10 = vld [vmem:[%s4927_s3 + $0xe8] ss:$16 sps:$4 sm:$0xff]  }
 0x674   :  { %2202 = vmatpush1.bf16.msra.mxu0 %v4473_v22  ;;  %2243 = vmatpush1.bf16.msra.mxu1 %v4479_v3  ;;  %v3101_v22 = vld [vmem:[%s4927_s3 + $0x104] ss:$16 sps:$4 sm:$0xff]   ;;  %v3102_v3 = vld [vmem:[%s4927_s3 + $0x10c] ss:$16 sps:$4 sm:$0xff]  }
 0x675   :  { %2203 = vmatprep.subr.bf16.mxu0 %v4485_v12  ;;  %2244 = vmatprep.subr.bf16.mxu1 %v4491_v16  ;;  %v2600_v12 = vld [vmem:[%s4924_s0 + $0x60] sm:$0xff] }
 0x676   :  { %v1942_v16 = vunpack.c.l.bf16 %v2600_v12 }
 0x678   :  { %2204 = vmatpush1.bf16.msra.mxu0 %v4497_v41  ;;  %2245 = vmatpush1.bf16.msra.mxu1 %v4503_v30  ;;  %v1943_v41 = vunpack.c.h.bf16 %v2600_v12  ;;  %v1946_v30 = vadd.f32 %v1942_v16, %v5182_v14 }
 0x679   :  { %2205 = vmatprep.subr.bf16.mxu0 %v4509_v57  ;;  %2246 = vmatprep.subr.bf16.mxu1 %v4515_v28  ;;  %v2601_v57 = vld [vmem:[%s4924_s0 + $0x68] sm:$0xff] }
 0x67a   :  { %v1947_v28 = vadd.f32 %v1943_v41, %v5183_v20 }
 0x67c   :  { %2206 = vmatpush1.bf16.msra.mxu0 %v4521_v53  ;;  %2247 = vmatpush1.bf16.msra.mxu1 %v3091_v44 }
 0x67d   :  { %2207 = vmatprep.subr.bf16.mxu0 %v4528_v59  ;;  %2248 = vmatprep.subr.bf16.mxu1 %v3092_v17 }
 0x680   :  { %2208 = vmatpush1.bf16.msra.mxu0 %v4535_v54  ;;  %2249 = vmatpush1.bf16.msra.mxu1 %v3093_v36  ;;  %v1945_v54 = vunpack.c.h.bf16 %v2601_v57 }
 0x681   :  { %2209 = vmatprep.subr.bf16.mxu0 %v4542_v45  ;;  %2250 = vmatprep.subr.bf16.mxu1 %v3094_v29 }
 0x684   :  { %2210 = vmatpush1.bf16.msra.mxu0 %v3095_v38  ;;  %2251 = vmatpush1.bf16.msra.mxu1 %v3096_v31  ;;  %v1949_v31 = vadd.f32 %v1945_v54, %v3611_v23 }
 0x685   :  { %2211 = vmatprep.subr.bf16.mxu0 %v3097_v7  ;;  %2252 = vmatprep.subr.bf16.mxu1 %v3098_v9  ;;  %v1944_v7 = vunpack.c.l.bf16 %v2601_v57 }
 0x688   :  { %2212 = vmatpush1.bf16.msra.mxu0 %v3099_v32  ;;  %2253 = vmatpush1.bf16.msra.mxu1 %v3100_v10  ;;  %v1948_v32 = vadd.f32 %v1944_v7, %v5092_v6 }
 0x689   :  { %2294 = vmatprep.subr.bf16.mxu0 %v3101_v22  ;;  %2335 = vmatprep.subr.bf16.mxu1 %v3102_v3 }
 0x71e   :  { %v1985_v53 = vpop.f32.mrb[48].mxu0  ;;  %v2026_v59 = vpop.f32.mrb[48].mxu1 }
 0x71f   :  { %v2033_v45 = vadd.f32 %v1985_v53, %v1946_v30  ;;  %v1987_v25 = vpop.f32.mrb[49].mxu0  ;;  %v2028_v51 = vpop.f32.mrb[49].mxu1  ;;  %v2035_v22 = vadd.f32 %v2026_v59, %v1948_v32  ;;  %v2602_v30 = vld [vmem:[%s4925_s1 + $0x10] sm:$0xff] }
 0x720   :  { %v2034_v2 = vadd.f32 %v1987_v25, %v1947_v28  ;;  %v1989_v61 = vpop.f32.mrb[50].mxu0  ;;  %v2030_v44 = vpop.f32.mrb[50].mxu1  ;;  %v2036_v9 = vadd.f32 %v2028_v51, %v1949_v31  ;;  %v2040_v28 = vunpack.c.l.bf16 %v2602_v30  ;;  %v2041_v53 = vunpack.c.h.bf16 %v2602_v30 }
 0x721   :  { %v2604_v17 = vmul.f32 -1.442695, %v2033_v45  ;;  %v1990_v36 = vpop.f32.mrb[51].mxu0  ;;  %v2031_v29 = vpop.f32.mrb[51].mxu1  ;;  %v2603_v61 = vld [vmem:[%s4925_s1 + $0x18] sm:$0xff] }
 0x722   :  { %v2605_v38 = vmul.f32 -1.442695, %v2034_v2  ;;  %v2606_v10 = vmul.f32 -1.442695, %v2036_v9  ;;  %v2044_v2 = vadd.f32 %v2040_v28, %v3621_v26  ;;  %v2043_v31 = vunpack.c.h.bf16 %v2603_v61 }
 0x723   :  { %2911 = vpow2.f32 %v2604_v17  ;;  %v2045_v17 = vadd.f32 %v2041_v53, %v5122_v1  ;;  %v2042_v28 = vunpack.c.l.bf16 %v2603_v61 }
 0x724   :  { %2913 = vpow2.f32 %v2605_v38  ;;  %v2047_v30 = vadd.f32 %v2043_v31, %v3630_v27 }
 0x725   :  { %2915 = vpow2.f32 %v2606_v10  ;;  %v2046_v53 = vadd.f32 %v2042_v28, %v3636_v21 }
 0x726   :  { %2917 = vtanh.f32 %v2035_v22 }
 0x72d   :  { %v2912_v3 = vpop.eup %2911 }
 0x72e   :  { %v2914_v12 = vpop.eup %2913  ;;  %v2138_v16 = vadd.f32 1.0, %v2912_v3 }
 0x72f   :  { %v2144_v41 = vadd.f32 1.0, %v2914_v12  ;;  %v2916_v57 = vpop.eup %2915 }
 0x730   :  { %2919 = vrcp.f32 %v2138_v16  ;;  %v2918_v54 = vpop.eup %2917  ;;  %v2151_v59 = vadd.f32 1.0, %v2916_v57 }
 0x731   :  { %2921 = vrcp.f32 %v2144_v41 }
 0x732   :  { %2923 = vrcp.f32 %v2151_v59 }
 0x73a   :  { %v2920_v45 = vpop.eup %2919 }
 0x73b   :  { %v2922_v25 = vpop.eup %2921  ;;  %v2155_v51 = vmul.f32 %v2920_v45, %v2918_v54 }
 0x73c   :  { %v2154_v44 = vmul.f32 %v2922_v25, %v4573_v4  ;;  %v2924_v54 = vpop.eup %2923 }
 0x73e   :  { %v4849_v36 = vadd.f32 %v2155_v51, %v2154_v44  ;;  %v2083_v29 = vpop.f32.mrb[52].mxu0  ;;  %v2124_v38 = vpop.f32.mrb[52].mxu1 }
 0x73f   :  { %v2131_v7 = vadd.f32 %v2083_v29, %v2044_v2  ;;  %v2085_v9 = vpop.f32.mrb[53].mxu0  ;;  %v2126_v32 = vpop.f32.mrb[53].mxu1  ;;  %v2133_v51 = vadd.f32 %v2124_v38, %v2046_v53 }
 0x740   :  { %2925 = vtanh.f32 %v4849_v36  ;;  %v2132_v10 = vadd.f32 %v2085_v9, %v2045_v17  ;;  %v2087_v22 = vpop.f32.mrb[54].mxu0  ;;  %v2128_v3 = vpop.f32.mrb[54].mxu1  ;;  %v2134_v57 = vadd.f32 %v2126_v32, %v2047_v30 }
 0x741   :  { %v2607_v12 = vmul.f32 -1.442695, %v2131_v7  ;;  %v2088_v16 = vpop.f32.mrb[55].mxu0  ;;  %v2129_v41 = vpop.f32.mrb[55].mxu1 }
 0x742   :  { %v2608_v4 = vmul.f32 -1.442695, %v2132_v10  ;;  %v2609_v25 = vmul.f32 -1.442695, %v2134_v57 }
 0x743   :  { %2927 = vpow2.f32 %v2607_v12 }
 0x744   :  { %2929 = vpow2.f32 %v2608_v4 }
 0x745   :  { %2931 = vpow2.f32 %v2609_v25 }
 0x746   :  { %2933 = vtanh.f32 %v2133_v51 }
 0x74a   :  { %v2926_v45 = vpop.eup %2925 }
 0x74b   :  { %v2158_v59 = vmul.f32 %v2926_v45, %v2924_v54 }
 0x74d   :  { %v2928_v2 = vpop.eup %2927  ;;  %2610 = vst [vmem:[%s4928_s4 + $0x60] sm:$0xff] %v2158_v59  ;;  %v2196_v44 = vpack.c.bf16 %v2158_v59, %v2158_v59 }
 0x74e   :  { %v2930_v17 = vpop.eup %2929  ;;  %v2162_v29 = vadd.f32 1.0, %v2928_v2  ;;  %v2284_v2 = vld [vmem:[%s4925_s1 + $0x8] sm:$0xff] }
 0x74f   :  { %v2168_v61 = vadd.f32 1.0, %v2930_v17  ;;  %2230 = vmatmul.mubr.bf16.vlgmr.msra.gmra.mrb[56].mxu0 %v2196_v44  ;;  %2271 = vmatmul.mubr.bf16.vlgmr.msra.gmra.mrb[56].mxu1 %v2196_v44 }
 0x750   :  { %2935 = vrcp.f32 %v2162_v29  ;;  %2295 = vmatpush1.bf16.msra.mxu0 %v4584_v15  ;;  %2336 = vmatpush1.bf16.msra.mxu1 %v4590_v49  ;;  %v2932_v15 = vpop.eup %2931 }
 0x751   :  { %2937 = vrcp.f32 %v2168_v61  ;;  %2296 = vmatprep.subr.bf16.mxu0 %v4596_v55  ;;  %2337 = vmatprep.subr.bf16.mxu1 %v4602_v5  ;;  %v2934_v49 = vpop.eup %2933 }
 0x752   :  { %2326 = vmatprep.mubr.bf16.mxu0 %v5058_v58  ;;  %2367 = vmatprep.mubr.bf16.mxu1 %v5058_v58 }
 0x754   :  { %2297 = vmatpush1.bf16.msra.mxu0 %v4610_v24  ;;  %2338 = vmatpush1.bf16.msra.mxu1 %v4616_v13  ;;  %v2175_v24 = vadd.f32 1.0, %v2932_v15 }
 0x755   :  { %2298 = vmatprep.subr.bf16.mxu0 %v4622_v35  ;;  %2339 = vmatprep.subr.bf16.mxu1 %v4628_v33  ;;  %v5187_v33 = vld [vmem:[#allocation18_spill] sm:$0xff] }
 0x756   :  { %2939 = vrcp.f32 %v2175_v24 }
 0x758   :  { %2299 = vmatpush1.bf16.msra.mxu0 %v4634_v40  ;;  %2340 = vmatpush1.bf16.msra.mxu1 %v4640_v37  ;;  %v5188_v37 = vld [vmem:[#allocation34_spill] sm:$0xff] }
 0x759   :  { %2300 = vmatprep.subr.bf16.mxu0 %v4646_v42  ;;  %2341 = vmatprep.subr.bf16.mxu1 %v4652_v0  ;;  %v5189_v42 = vld [vmem:[#allocation24_spill] sm:$0xff] }
 0x75a   :  { %v2936_v55 = vpop.eup %2935 }
 0x75b   :  { %v2938_v58 = vpop.eup %2937  ;;  %v2179_v5 = vmul.f32 %v2936_v55, %v2934_v49  ;;  %v2288_v49 = vunpack.c.h.bf16 %v2284_v2 }
 0x75c   :  { %v2178_v13 = vmul.f32 %v2938_v58, %v4680_v60  ;;  %2301 = vmatpush1.bf16.msra.mxu0 %v4659_v52  ;;  %2342 = vmatpush1.bf16.msra.mxu1 %v4665_v63 }
 0x75d   :  { %2302 = vmatprep.subr.bf16.mxu0 %v4671_v18  ;;  %2343 = vmatprep.subr.bf16.mxu1 %v4677_v39  ;;  %v2612_v18 = vld [vmem:[%s4924_s0 + $0x70] sm:$0xff] }
 0x75e   :  { %v4876_v35 = vadd.f32 %v2179_v5, %v2178_v13  ;;  %v2188_v39 = vunpack.c.l.bf16 %v2612_v18  ;;  %v2189_v60 = vunpack.c.h.bf16 %v2612_v18 }
 0x760   :  { %2941 = vtanh.f32 %v4876_v35  ;;  %2303 = vmatpush1.bf16.msra.mxu0 %v4686_v50  ;;  %2344 = vmatpush1.bf16.msra.mxu1 %v4692_v46  ;;  %v2940_v40 = vpop.eup %2939  ;;  %v2192_v50 = vadd.f32 %v2188_v39, %v5182_v14  ;;  %v2613_v46 = vld [vmem:[%s4924_s0 + $0x78] sm:$0xff] }
 0x761   :  { %2304 = vmatprep.subr.bf16.mxu0 %v4698_v48  ;;  %2345 = vmatprep.subr.bf16.mxu1 %v4704_v8  ;;  %v2193_v48 = vadd.f32 %v2189_v60, %v5183_v20  ;;  %v2190_v10 = vunpack.c.l.bf16 %v2613_v46 }
 0x763   :  { %v2194_v20 = vadd.f32 %v2190_v10, %v5092_v6 }
 0x764   :  { %2305 = vmatpush1.bf16.msra.mxu0 %v4710_v11  ;;  %2346 = vmatpush1.bf16.msra.mxu1 %v4716_v56  ;;  %v2191_v56 = vunpack.c.h.bf16 %v2613_v46 }
 0x765   :  { %2306 = vmatprep.subr.bf16.mxu0 %v4722_v19  ;;  %2347 = vmatprep.subr.bf16.mxu1 %v4728_v47 }
 0x766   :  { %v2195_v14 = vadd.f32 %v2191_v56, %v3611_v23  ;;  %v2283_v23 = vld [vmem:[%s4925_s1] sm:$0xff] }
 0x767   :  { %v2285_v28 = vunpack.c.l.bf16 %v2283_v23  ;;  %v2286_v53 = vunpack.c.h.bf16 %v2283_v23 }
 0x768   :  { %2307 = vmatpush1.bf16.msra.mxu0 %v4734_v34  ;;  %2348 = vmatpush1.bf16.msra.mxu1 %v5187_v33 }
 0x769   :  { %2308 = vmatprep.subr.bf16.mxu0 %v5188_v37  ;;  %2349 = vmatprep.subr.bf16.mxu1 %v5189_v42  ;;  %v2289_v59 = vadd.f32 %v2285_v28, %v3621_v26  ;;  %v2290_v17 = vadd.f32 %v2286_v53, %v5122_v1  ;;  %v2287_v1 = vunpack.c.l.bf16 %v2284_v2 }
 0x76a   :  { %v2942_v0 = vpop.eup %2941 }
 0x76b   :  { %v2182_v52 = vmul.f32 %v2942_v0, %v2940_v40 }
 0x76c   :  { %2309 = vmatpush1.bf16.msra.mxu0 %v4758_v43  ;;  %2350 = vmatpush1.bf16.msra.mxu1 %v4764_v62 }
 0x76d   :  { %2611 = vst [vmem:[%s4928_s4 + $0x18] sm:$0xff] %v2182_v52  ;;  %v2293_v63 = vpack.c.bf16 %v2182_v52, %v2182_v52  ;;  %v2291_v52 = vadd.f32 %v2287_v1, %v3636_v21 }
 0x76f   :  { %2327 = vmatmul.mubr.bf16.vlgmr.msra.gmra.mrb[60].mxu0 %v2293_v63  ;;  %2368 = vmatmul.mubr.bf16.vlgmr.msra.gmra.mrb[60].mxu1 %v2293_v63 }
 0x822   :  { %v2231_v8 = vpop.f32.mrb[56].mxu0  ;;  %v2272_v11 = vpop.f32.mrb[56].mxu1 }
 0x823   :  { %v2279_v19 = vadd.f32 %v2231_v8, %v2192_v50  ;;  %v2233_v47 = vpop.f32.mrb[57].mxu0  ;;  %v2274_v34 = vpop.f32.mrb[57].mxu1  ;;  %v2281_v12 = vadd.f32 %v2272_v11, %v2194_v20 }
 0x824   :  { %v2280_v43 = vadd.f32 %v2233_v47, %v2193_v48  ;;  %v2235_v62 = vpop.f32.mrb[58].mxu0  ;;  %v2276_v38 = vpop.f32.mrb[58].mxu1  ;;  %v2282_v22 = vadd.f32 %v2274_v34, %v2195_v14 }
 0x825   :  { %v2614_v31 = vmul.f32 -1.442695, %v2279_v19  ;;  %v2236_v7 = vpop.f32.mrb[59].mxu0  ;;  %v2277_v9 = vpop.f32.mrb[59].mxu1 }
 0x826   :  { %v2615_v32 = vmul.f32 -1.442695, %v2280_v43  ;;  %v2616_v3 = vmul.f32 -1.442695, %v2282_v22 }
 0x827   :  { %2943 = vpow2.f32 %v2614_v31 }
 0x828   :  { %2945 = vpow2.f32 %v2615_v32 }
 0x829   :  { %2947 = vpow2.f32 %v2616_v3 }
 0x82a   :  { %2949 = vtanh.f32 %v2281_v12 }
 0x831   :  { %v2944_v16 = vpop.eup %2943 }
 0x832   :  { %v2946_v41 = vpop.eup %2945  ;;  %v2383_v4 = vadd.f32 1.0, %v2944_v16 }
 0x833   :  { %v2389_v30 = vadd.f32 1.0, %v2946_v41  ;;  %v2948_v57 = vpop.eup %2947 }
 0x834   :  { %2951 = vrcp.f32 %v2383_v4  ;;  %v2950_v54 = vpop.eup %2949  ;;  %v2396_v51 = vadd.f32 1.0, %v2948_v57 }
 0x835   :  { %2953 = vrcp.f32 %v2389_v30 }
 0x836   :  { %2955 = vrcp.f32 %v2396_v51 }
 0x83e   :  { %v2952_v45 = vpop.eup %2951 }
 0x83f   :  { %v2954_v6 = vpop.eup %2953  ;;  %v2400_v25 = vmul.f32 %v2952_v45, %v2950_v54 }
 0x840   :  { %v2399_v44 = vmul.f32 %v2954_v6, %v4849_v36  ;;  %v2292_v36 = vadd.f32 %v2288_v49, %v3630_v27  ;;  %v2956_v63 = vpop.eup %2955 }
 0x842   :  { %v2401_v29 = vadd.f32 %v2400_v25, %v2399_v44  ;;  %v2328_v61 = vpop.f32.mrb[60].mxu0  ;;  %v2369_v15 = vpop.f32.mrb[60].mxu1 }
 0x843   :  { %v2376_v55 = vadd.f32 %v2328_v61, %v2289_v59  ;;  %v2330_v58 = vpop.f32.mrb[61].mxu0  ;;  %v2371_v5 = vpop.f32.mrb[61].mxu1  ;;  %v2378_v50 = vadd.f32 %v2369_v15, %v2291_v52 }
 0x844   :  { %2957 = vtanh.f32 %v2401_v29  ;;  %v2377_v24 = vadd.f32 %v2330_v58, %v2290_v17  ;;  %v2332_v13 = vpop.f32.mrb[62].mxu0  ;;  %v2373_v26 = vpop.f32.mrb[62].mxu1  ;;  %v2379_v0 = vadd.f32 %v2371_v5, %v2292_v36 }
 0x845   :  { %v2617_v33 = vmul.f32 -1.442695, %v2376_v55  ;;  %v2333_v40 = vpop.f32.mrb[63].mxu0  ;;  %v2374_v37 = vpop.f32.mrb[63].mxu1 }
 0x846   :  { %v2618_v42 = vmul.f32 -1.442695, %v2377_v24  ;;  %v2619_v39 = vmul.f32 -1.442695, %v2379_v0 }
 0x847   :  { %2959 = vpow2.f32 %v2617_v33 }
 0x848   :  { %2961 = vpow2.f32 %v2618_v42 }
 0x849   :  { %2963 = vpow2.f32 %v2619_v39 }
 0x84a   :  { %2965 = vtanh.f32 %v2378_v50 }
 0x84e   :  { %v2958_v18 = vpop.eup %2957 }
 0x84f   :  { %v2403_v60 = vmul.f32 %v2958_v18, %v2956_v63 }
 0x851   :  { %v2960_v46 = vpop.eup %2959  ;;  %2620 = vst [vmem:[%s4928_s4 + $0x70] sm:$0xff] %v2403_v60 }
 0x852   :  { %v2962_v48 = vpop.eup %2961  ;;  %v2407_v8 = vadd.f32 1.0, %v2960_v46 }
 0x853   :  { %v2413_v27 = vadd.f32 1.0, %v2962_v48  ;;  %v2964_v11 = vpop.eup %2963 }
 0x854   :  { %2967 = vrcp.f32 %v2407_v8  ;;  %v2966_v56 = vpop.eup %2965  ;;  %v2420_v34 = vadd.f32 1.0, %v2964_v11 }
 0x855   :  { %2969 = vrcp.f32 %v2413_v27 }
 0x856   :  { %2971 = vrcp.f32 %v2420_v34 }
 0x85e   :  { %v2968_v21 = vpop.eup %2967 }
 0x85f   :  { %v2970_v19 = vpop.eup %2969  ;;  %v2424_v47 = vmul.f32 %v2968_v21, %v2966_v56 }
 0x860   :  { %v2423_v43 = vmul.f32 %v2970_v19, %v4876_v35  ;;  %v2972_v38 = vpop.eup %2971 }
 0x862   :  { %v2425_v62 = vadd.f32 %v2424_v47, %v2423_v43 }
 0x864   :  { %2973 = vtanh.f32 %v2425_v62 }
 0x86e   :  { %v2974_v31 = vpop.eup %2973 }
 0x86f   :  { %v2427_v7 = vmul.f32 %v2974_v31, %v2972_v38 }
 0x871   :  { %2429 = vst [vmem:[%s4928_s4 + $0x8] sm:$0xff] %v2427_v7 }
 0x872   :  { %2434 = vsyncpa [#allocation3], 1 }

</bundles_post_ra>
